<compile_context>
chip_gen: v7x
topology: tpu7x:2x2x1
jax: 0.10.0
libtpu: 0.0.40
codegen_flags: <defaults>
</compile_context>

<pallas_src>
import functools

import jax
import jax.numpy as jnp
from jax import lax
from jax.experimental import pallas as pl
from jax.experimental.pallas import tpu as pltpu


def _fused_kernel(kv_ref, wq2_ref, wkv2_ref, wo2_ref, bo_ref, *rest,
                  heads, dim_head, scale, x_rows, seq_len_cfg, mem_len_cfg,
                  mem_rows, do_compress, return_weights, compute_dtype):
    # ---- unpack optional refs (inputs first, then outputs, in pallas_call order) ---------
    idx = 0
    if do_compress:
        om_ref, convw_ref, convb_ref = rest[idx], rest[idx + 1], rest[idx + 2]
        idx += 3
    logits_ref = rest[idx]
    idx += 1
    if return_weights:
        weights_ref = rest[idx]
        idx += 1
    if do_compress:
        cmem_out_ref, ssd_ref = rest[idx], rest[idx + 1]

    cd = compute_dtype
    e = heads * dim_head
    d2 = 2 * dim_head
    bb, kv_len, _ = kv_ref.shape

    def mm(a, b):      # (m,k)@(k,n), MXU, f32 accumulation
        return jnp.dot(a.astype(cd), b.astype(cd), preferred_element_type=jnp.float32)

    def mm_nt(a, b):   # (m,k)x(n,k) -> (m,n): contract last dims, no RHS relayout
        return lax.dot_general(a.astype(cd), b.astype(cd), (((1,), (1,)), ((), ())),
                               preferred_element_type=jnp.float32)

    def attend(q2, kvh):
        # q2:(Lq,2D) with zeros in the v half, kvh:(Lk,2D) packed [k|v].
        dots = mm_nt(q2, kvh)                            # == q @ k^T (scale folded into q)
        m = jnp.max(dots, axis=-1, keepdims=True)
        p = jnp.exp(dots - m)
        attn = p / jnp.sum(p, axis=-1, keepdims=True)    # exact divide (parity with torch)
        out2 = mm(attn, kvh)                             # [attn@k | attn@v]
        return out2, attn

    # ---- batch-stacked activations (8-aligned row concats only) --------------------------
    kv_bs = [kv_ref[i] for i in range(bb)]                               # each (kv_len, E)
    kvs = kv_bs[0] if bb == 1 else jnp.concatenate(kv_bs, axis=0)        # (bb*kv, E)
    x_bs = [kb[kv_len - x_rows:, :] for kb in kv_bs]                     # tail = x (concat_q)
    xs = (x_bs[0] if bb == 1 else jnp.concatenate(x_bs, axis=0)) * scale  # (bb*t, E), scaled q in

    if do_compress:
        # ConvCompress (kernel == stride == ratio) as a GEMM on flattened windows, per batch.
        comps = []
        for b in range(bb):
            comp_b = mm(om_ref[b], convw_ref[...]) + convb_ref[...]      # (nw, E) f32
            cmem_out_ref[b, :, :] = comp_b.astype(cmem_out_ref.dtype)
            comps.append(comp_b)
        start = max(kv_len - (min(mem_rows, mem_len_cfg) + seq_len_cfg), 0)
        stop = max(kv_len - seq_len_cfg, 0)
        # Mask selecting the v-half columns of packed (., 2D) attention outputs (hoisted).
        v_cols = lax.broadcasted_iota(jnp.int32, (x_rows, d2), 1) >= dim_head
        ssd = jnp.zeros((), jnp.float32)

    acc = None
    for h in range(heads):
        # One projection GEMM each for q and packed k|v over the WHOLE batch block.
        q2 = mm(xs, wq2_ref[h])              # (bb*t, 2D), v half exactly zero
        kvh = mm(kvs, wkv2_ref[h])           # (bb*kv, 2D) = [k | v]
        outs = []
        for b in range(bb):
            q2_b = q2[b * x_rows:(b + 1) * x_rows, :]
            kvh_b = kvh[b * kv_len:(b + 1) * kv_len, :]
            out2, attn = attend(q2_b, kvh_b)
            if return_weights:
                weights_ref[b * heads + h, :, :] = attn.astype(weights_ref.dtype)
            outs.append(out2)
            if do_compress:
                # Reconstruction attentions; only the per-batch SSD ever leaves VMEM.
                ckv_b = mm(comps[b], wkv2_ref[h])                        # (nw, 2D)
                rec_a2, _ = attend(q2_b, kvh_b[start:stop, :])
                rec_b2, _ = attend(q2_b, ckv_b)
                diff = jnp.where(v_cols, rec_a2 - rec_b2, 0.0)           # keep attn@v half only
                ssd = ssd + jnp.sum(diff * diff)
        out_h = outs[0] if bb == 1 else jnp.concatenate(outs, axis=0)    # (bb*t, 2D)
        part = mm(out_h, wo2_ref[h])          # zero rows drop the attn@k half
        acc = part if acc is None else acc + part

    logits = acc + bo_ref[...]
    for b in range(bb):
        logits_ref[b, :, :] = logits[b * x_rows:(b + 1) * x_rows, :].astype(logits_ref.dtype)

    if do_compress:
        ssd_ref[...] = jnp.reshape(ssd, (1, 1))


def memory_self_attention_forward(x, mem, cmem, params, *, heads, seq_len,
                                  mem_len_cfg, cmem_len_cfg, cmem_ratio,
                                  batch_block=None, return_weights=True,
                                  matmul_dtype=None):
    """Mirrors MemorySelfAttention.forward (pos_emb=None, input_mask=None, concat_q=True)."""
    b, t, e = x.shape
    dim_head = e // heads
    d2 = 2 * dim_head
    scale = dim_head ** (-0.5)
    mem_len = mem.shape[1]
    cmem_len = cmem.shape[1]
    kv_len = cmem_len + mem_len + t

    # Default: whole batch in ONE grid step -> tallest GEMMs, no per-step overhead (best for
    # tiny B and single-TensorCore v5e/v6e).  On v7x with B >= 2 pass batch_block=B//2 so the
    # "parallel" grid axis feeds both TensorCores.
    if batch_block is None:
        batch_block = b
    assert b % batch_block == 0, "batch must be divisible by batch_block"
    bb = batch_block
    nsteps = b // bb
    compute_dtype = jnp.dtype(matmul_dtype) if matmul_dtype is not None else x.dtype

    # ---- weight prep (tiny, once per call): per-head slabs of lane width 2*dim_head so the
    # kernel never lane-slices activations:
    #   wq2[h]  = [ Wq_h | 0 ]    -> q2 = x @ wq2[h] has zeros in the v half
    #   wkv2[h] = [ Wk_h | Wv_h ] -> one projection GEMM yields packed k|v
    #   wo2[h]  = [ 0 ; Wout_h ]  -> (attn @ [k|v]) @ wo2[h] keeps only the attn@v half
    wq_h = params["wq_t"].reshape(e, heads, dim_head).transpose(1, 0, 2)            # (H,E,D)
    wk_h = params["wkv_t"][:, :e].reshape(e, heads, dim_head).transpose(1, 0, 2)    # (H,E,D)
    wv_h = params["wkv_t"][:, e:].reshape(e, heads, dim_head).transpose(1, 0, 2)    # (H,E,D)
    wq2 = jnp.concatenate([wq_h, jnp.zeros_like(wq_h)], axis=-1)                    # (H,E,2D)
    wkv2 = jnp.concatenate([wk_h, wv_h], axis=-1)                                   # (H,E,2D)
    wo_h = params["wout_t"].reshape(heads, dim_head, e)                             # (H,D,E)
    wo2 = jnp.concatenate([jnp.zeros_like(wo_h), wo_h], axis=1)                     # (H,2D,E)
    bout2 = params["bout"].reshape(1, e).astype(jnp.float32)
    conv_w_flat = params["conv_w_flat"]
    conv_b2 = params["conv_b"].reshape(1, e).astype(jnp.float32)

    # kv_input = cat(cmem, mem, x) built once -> one rectangular DMA per grid step.
    kv_input = jnp.concatenate([cmem, mem, x], axis=1)                  # (B, kv_len, E)

    # queue_fifo(mem, x, length=mem_len_cfg, dim=1)
    queue = jnp.concatenate([mem, x], axis=1)
    if mem_len_cfg > 0:
        split = max(queue.shape[1] - mem_len_cfg, 0)
        old_mem, new_mem = queue[:, :split], queue[:, split:]
    else:
        old_mem, new_mem = queue, queue[:, :0]

    old_len = old_mem.shape[1]
    # Reference semantics: left-pad by (old_len % ratio); Conv1d(kernel=stride=ratio) then
    # uses floor(padded_len/ratio) windows and drops any remaining tail rows.
    pad_amt = old_len % cmem_ratio
    n_windows = (old_len + pad_amt) // cmem_ratio
    # TODO(synk): degenerate configs with 0 < padded length < ratio (n_windows == 0) take the
    #             early-return path here instead of producing an empty compressed memory.
    do_compress = (old_len != 0) and (cmem_len_cfg > 0) and (n_windows > 0)

    kern = functools.partial(
        _fused_kernel, heads=heads, dim_head=dim_head, scale=scale, x_rows=t,
        seq_len_cfg=seq_len, mem_len_cfg=mem_len_cfg, mem_rows=mem_len,
        do_compress=do_compress, return_weights=return_weights,
        compute_dtype=compute_dtype)

    in_specs = [
        pl.BlockSpec((bb, kv_len, e), lambda i: (i, 0, 0)),
        pl.BlockSpec((heads, e, d2), lambda i: (0, 0, 0)),
        pl.BlockSpec((heads, e, d2), lambda i: (0, 0, 0)),
        pl.BlockSpec((heads, d2, e), lambda i: (0, 0, 0)),
        pl.BlockSpec((1, e), lambda i: (0, 0)),
    ]
    args = [kv_input, wq2, wkv2, wo2, bout2]

    out_shape = [jax.ShapeDtypeStruct((b, t, e), x.dtype)]
    out_specs = [pl.BlockSpec((bb, t, e), lambda i: (i, 0, 0))]
    if return_weights:
        # Flattened to (B*H, t, kv) so stores use a single leading index; reshaped back below.
        # TODO(synk): at production sizes pad kv_len to a multiple of 128 (lane-dense stores)
        #             and/or tile this output over a head grid axis for v7x's 64 MiB VMEM.
        out_shape.append(jax.ShapeDtypeStruct((b * heads, t, kv_len), jnp.float32))
        out_specs.append(pl.BlockSpec((bb * heads, t, kv_len), lambda i: (i, 0, 0)))
    if do_compress:
        om = old_mem
        if pad_amt:
            om = jnp.pad(om, ((0, 0), (pad_amt, 0), (0, 0)))
        om = om[:, :n_windows * cmem_ratio]
        om_windows = om.reshape(b, n_windows, cmem_ratio * e)            # lane-dense windows
        in_specs += [
            pl.BlockSpec((bb, n_windows, cmem_ratio * e), lambda i: (i, 0, 0)),
            pl.BlockSpec((cmem_ratio * e, e), lambda i: (0, 0)),
            pl.BlockSpec((1, e), lambda i: (0, 0)),
        ]
        args += [om_windows, conv_w_flat, conv_b2]
        out_shape += [jax.ShapeDtypeStruct((b, n_windows, e), x.dtype),
                      jax.ShapeDtypeStruct((nsteps, 1, 1), jnp.float32)]
        out_specs += [pl.BlockSpec((bb, n_windows, e), lambda i: (i, 0, 0)),
                      pl.BlockSpec((pl.Squeezed(), 1, 1), lambda i: (i, 0, 0))]

    # Explicit VMEM budget: double-buffered pipeline blocks + headroom for in-kernel temps,
    # capped well below v7x's 64 MiB physical VMEM (v5e/v6e have 128 MiB).
    itemsize = max(jnp.dtype(x.dtype).itemsize, 4)
    blk_elems = bb * kv_len * e + bb * t * e + 2 * heads * e * d2 + heads * d2 * e + 2 * e
    if return_weights:
        blk_elems += bb * heads * t * kv_len
    if do_compress:
        blk_elems += bb * n_windows * (cmem_ratio * e + e) + cmem_ratio * e * e + e + 1
    vmem_limit = int(min(max(4 * blk_elems * itemsize + (4 << 20), 32 << 20), 48 << 20))

    results = pl.pallas_call(
        kern,
        out_shape=tuple(out_shape),
        grid=(nsteps,),
        in_specs=in_specs,
        out_specs=tuple(out_specs),
        compiler_params=pltpu.CompilerParams(
            dimension_semantics=("parallel",),
            vmem_limit_bytes=vmem_limit),
    )(*args)

    if not isinstance(results, (tuple, list)):
        results = (results,)
    ri = 0
    logits = results[ri]; ri += 1
    weights = None
    if return_weights:
        weights = results[ri].reshape(b, heads, t, kv_len); ri += 1
    if do_compress:
        compressed_mem, ssd = results[ri], results[ri + 1]
        new_cmem = jnp.concatenate([cmem, compressed_mem.astype(cmem.dtype)], axis=1)
        new_cmem = new_cmem[:, max(new_cmem.shape[1] - cmem_len_cfg, 0):]
        aux_loss = jnp.sum(ssd) / float(b * heads * t * dim_head)   # == F.mse_loss (mean)
    else:
        new_cmem = cmem
        # NOTE: reference returns shape-(1,) zeros here; a scalar is returned for consistency
        # with the main path (F.mse_loss is a scalar).
        aux_loss = jnp.zeros((), jnp.float32)

    return logits, new_mem, new_cmem, aux_loss, weights


# --------------------------------- main -------------------------------------

if __name__ == "__main__":
    heads = 4
    dim = 32
    seq_len = 8
    mem_len_cfg = 8
    cmem_len_cfg = 8
    cmem_ratio = 4
    batch = 2

    key = jax.random.PRNGKey(0)
    k_x, k_m, k_c, k_wq, k_wkv, k_wo, k_bo, k_cw, k_cb = jax.random.split(key, 9)

    x = jax.random.normal(k_x, (batch, seq_len, dim), jnp.float32)
    mem = jax.random.normal(k_m, (batch, mem_len_cfg, dim), jnp.float32)
    cmem = jax.random.normal(k_c, (batch, cmem_len_cfg, dim), jnp.float32)

    # deterministic synthetic parameters (stored pre-transposed: y = x @ W_t + b)
    wq_t = jax.random.normal(k_wq, (dim, dim), jnp.float32) * 0.1          # to_q.weight.T
    wkv_t = jax.random.normal(k_wkv, (dim, 2 * dim), jnp.float32) * 0.1    # to_kv.weight.T
    wout_t = jax.random.normal(k_wo, (dim, dim), jnp.float32) * 0.1        # to_out.weight.T
    bout = jax.random.normal(k_bo, (dim,), jnp.float32) * 0.1              # to_out.bias
    conv_w = jax.random.normal(k_cw, (dim, dim, cmem_ratio), jnp.float32) * 0.1  # Conv1d (out,in,k)
    conv_b = jax.random.normal(k_cb, (dim,), jnp.float32) * 0.1
    # Conv1d(out,in,k) with stride==kernel==ratio -> window-matmul weight of shape (k*in, out)
    conv_w_flat = jnp.transpose(conv_w, (2, 1, 0)).reshape(cmem_ratio * dim, dim)

    params = dict(wq_t=wq_t, wkv_t=wkv_t, wout_t=wout_t, bout=bout,
                  conv_w_flat=conv_w_flat, conv_b=conv_b)

    fwd = jax.jit(functools.partial(
        memory_self_attention_forward, heads=heads, seq_len=seq_len,
        mem_len_cfg=mem_len_cfg, cmem_len_cfg=cmem_len_cfg, cmem_ratio=cmem_ratio))

    logits, new_mem, new_cmem, aux_loss, weights = fwd(x, mem, cmem, params)
    jax.block_until_ready((logits, new_mem, new_cmem, aux_loss, weights))

    kv_len = cmem.shape[1] + mem.shape[1] + seq_len
    assert logits.shape == (batch, seq_len, dim)
    assert new_mem.shape == (batch, mem_len_cfg, dim)
    assert new_cmem.shape == (batch, cmem_len_cfg, dim)
    assert weights.shape == (batch, heads, seq_len, kv_len)
    assert aux_loss.shape == ()

    print("KERNEL_OK")
</pallas_src>

<mosaic_0001>
module attributes {stable_mosaic.version = 11 : i64} {
  func.func @_fused_kernel(%arg0: i32, %arg1: memref<2x24x32xf32, #tpu.memory_space<vmem>>, %arg2: memref<4x32x16xf32, #tpu.memory_space<vmem>>, %arg3: memref<4x32x16xf32, #tpu.memory_space<vmem>>, %arg4: memref<4x16x32xf32, #tpu.memory_space<vmem>>, %arg5: memref<1x32xf32, #tpu.memory_space<vmem>>, %arg6: memref<2x2x128xf32, #tpu.memory_space<vmem>>, %arg7: memref<128x32xf32, #tpu.memory_space<vmem>>, %arg8: memref<1x32xf32, #tpu.memory_space<vmem>>, %arg9: memref<2x8x32xf32, #tpu.memory_space<vmem>>, %arg10: memref<8x8x24xf32, #tpu.memory_space<vmem>>, %arg11: memref<2x2x32xf32, #tpu.memory_space<vmem>>, %arg12: memref<1x1x1xf32, #tpu.memory_space<vmem>>) attributes {dimension_semantics = [#tpu.dimension_semantics<parallel>], iteration_bounds = array<i64: 1>, scalar_prefetch = 0 : i64, scratch_operands = 0 : i64, tpu.core_type = #tpu.core_type<tc>, window_params = [{transform_indices = @transform_0, window_bounds = array<i64: 2, 24, 32>}, {pipeline_mode = #tpu.pipeline_mode<synchronous>, transform_indices = @transform_1, window_bounds = array<i64: 4, 32, 16>}, {pipeline_mode = #tpu.pipeline_mode<synchronous>, transform_indices = @transform_2, window_bounds = array<i64: 4, 32, 16>}, {pipeline_mode = #tpu.pipeline_mode<synchronous>, transform_indices = @transform_3, window_bounds = array<i64: 4, 16, 32>}, {pipeline_mode = #tpu.pipeline_mode<synchronous>, transform_indices = @transform_4, window_bounds = array<i64: 1, 32>}, {transform_indices = @transform_5, window_bounds = array<i64: 2, 2, 128>}, {pipeline_mode = #tpu.pipeline_mode<synchronous>, transform_indices = @transform_6, window_bounds = array<i64: 128, 32>}, {pipeline_mode = #tpu.pipeline_mode<synchronous>, transform_indices = @transform_7, window_bounds = array<i64: 1, 32>}, {transform_indices = @transform_8, window_bounds = array<i64: 2, 8, 32>}, {transform_indices = @transform_9, window_bounds = array<i64: 8, 8, 24>}, {transform_indices = @transform_10, window_bounds = array<i64: 2, 2, 32>}, {transform_indices = @transform_11, window_bounds = array<i64: 1, 1, 1>}]} {
    %c0 = arith.constant 0 : index
    %c0_0 = arith.constant 0 : index
    %c0_1 = arith.constant 0 : index
    %0 = vector.load %arg1[%c0, %c0_0, %c0_1] : memref<2x24x32xf32, #tpu.memory_space<vmem>>, vector<1x24x32xf32>
    %1 = vector.shape_cast %0 : vector<1x24x32xf32> to vector<24x32xf32>
    %c1 = arith.constant 1 : index
    %c0_2 = arith.constant 0 : index
    %c0_3 = arith.constant 0 : index
    %2 = vector.load %arg1[%c1, %c0_2, %c0_3] : memref<2x24x32xf32, #tpu.memory_space<vmem>>, vector<1x24x32xf32>
    %3 = vector.shape_cast %2 : vector<1x24x32xf32> to vector<24x32xf32>
    %4 = tpu.concatenate %1, %3 in 0 : vector<24x32xf32>, vector<24x32xf32> -> vector<48x32xf32>
    %5 = vector.extract_strided_slice %1 {offsets = [16, 0], sizes = [8, 32], strides = [1, 1]} : vector<24x32xf32> to vector<8x32xf32>
    %6 = vector.extract_strided_slice %3 {offsets = [16, 0], sizes = [8, 32], strides = [1, 1]} : vector<24x32xf32> to vector<8x32xf32>
    %7 = tpu.concatenate %5, %6 in 0 : vector<8x32xf32>, vector<8x32xf32> -> vector<16x32xf32>
    %cst = arith.constant 0.353553385 : f32
    %8 = vector.broadcast %cst : f32 to vector<16x32xf32>
    %9 = arith.mulf %7, %8 : vector<16x32xf32>
    %c0_4 = arith.constant 0 : index
    %c0_5 = arith.constant 0 : index
    %c0_6 = arith.constant 0 : index
    %10 = vector.load %arg6[%c0_4, %c0_5, %c0_6] : memref<2x2x128xf32, #tpu.memory_space<vmem>>, vector<1x2x128xf32>
    %11 = vector.shape_cast %10 : vector<1x2x128xf32> to vector<2x128xf32>
    %c0_7 = arith.constant 0 : index
    %c0_8 = arith.constant 0 : index
    %12 = vector.load %arg7[%c0_7, %c0_8] : memref<128x32xf32, #tpu.memory_space<vmem>>, vector<128x32xf32>
    %cst_9 = arith.constant dense<0.000000e+00> : vector<2x32xf32>
    %13 = tpu.matmul %11, %12, %cst_9 {dimension_numbers = #tpu.dot_dimension_numbers<[1], [0], [0], [1], [0, 0, 1, 1], [], []>} : vector<2x128xf32>, vector<128x32xf32>, vector<2x32xf32> -> vector<2x32xf32>
    %c0_10 = arith.constant 0 : index
    %c0_11 = arith.constant 0 : index
    %14 = vector.load %arg8[%c0_10, %c0_11] : memref<1x32xf32, #tpu.memory_space<vmem>>, vector<1x32xf32>
    %15 = vector.broadcast %14 : vector<1x32xf32> to vector<2x32xf32>
    %16 = arith.addf %13, %15 : vector<2x32xf32>
    %c0_12 = arith.constant 0 : index
    %c0_13 = arith.constant 0 : index
    %c0_14 = arith.constant 0 : index
    %17 = vector.load %arg11[%c0_12, %c0_13, %c0_14] : memref<2x2x32xf32, #tpu.memory_space<vmem>>, vector<1x2x32xf32>
    %18 = vector.shape_cast %17 : vector<1x2x32xf32> to vector<2x32xf32>
    %19 = vector.shape_cast %16 : vector<2x32xf32> to vector<1x2x32xf32>
    tpu.vector_store %arg11[%c0_12, %c0_13, %c0_14], %19 {strides = array<i32>} : memref<2x2x32xf32, #tpu.memory_space<vmem>>, vector<1x2x32xf32>,
    %c1_15 = arith.constant 1 : index
    %c0_16 = arith.constant 0 : index
    %c0_17 = arith.constant 0 : index
    %20 = vector.load %arg6[%c1_15, %c0_16, %c0_17] : memref<2x2x128xf32, #tpu.memory_space<vmem>>, vector<1x2x128xf32>
    %21 = vector.shape_cast %20 : vector<1x2x128xf32> to vector<2x128xf32>
    %c0_18 = arith.constant 0 : index
    %c0_19 = arith.constant 0 : index
    %22 = vector.load %arg7[%c0_18, %c0_19] : memref<128x32xf32, #tpu.memory_space<vmem>>, vector<128x32xf32>
    %cst_20 = arith.constant dense<0.000000e+00> : vector<2x32xf32>
    %23 = tpu.matmul %21, %22, %cst_20 {dimension_numbers = #tpu.dot_dimension_numbers<[1], [0], [0], [1], [0, 0, 1, 1], [], []>} : vector<2x128xf32>, vector<128x32xf32>, vector<2x32xf32> -> vector<2x32xf32>
    %c0_21 = arith.constant 0 : index
    %c0_22 = arith.constant 0 : index
    %24 = vector.load %arg8[%c0_21, %c0_22] : memref<1x32xf32, #tpu.memory_space<vmem>>, vector<1x32xf32>
    %25 = vector.broadcast %24 : vector<1x32xf32> to vector<2x32xf32>
    %26 = arith.addf %23, %25 : vector<2x32xf32>
    %c1_23 = arith.constant 1 : index
    %c0_24 = arith.constant 0 : index
    %c0_25 = arith.constant 0 : index
    %27 = vector.load %arg11[%c1_23, %c0_24, %c0_25] : memref<2x2x32xf32, #tpu.memory_space<vmem>>, vector<1x2x32xf32>
    %28 = vector.shape_cast %27 : vector<1x2x32xf32> to vector<2x32xf32>
    %29 = vector.shape_cast %26 : vector<2x32xf32> to vector<1x2x32xf32>
    tpu.vector_store %arg11[%c1_23, %c0_24, %c0_25], %29 {strides = array<i32>} : memref<2x2x32xf32, #tpu.memory_space<vmem>>, vector<1x2x32xf32>,
    %30 = tpu.iota {dimensions = array<i32: 1>} : vector<8x16xi32>
    %c8_i32 = arith.constant 8 : i32
    %31 = vector.broadcast %c8_i32 : i32 to vector<8x16xi32>
    %32 = arith.cmpi sge, %30, %31 : vector<8x16xi32>
    %c0_26 = arith.constant 0 : index
    %c0_27 = arith.constant 0 : index
    %c0_28 = arith.constant 0 : index
    %33 = vector.load %arg2[%c0_26, %c0_27, %c0_28] : memref<4x32x16xf32, #tpu.memory_space<vmem>>, vector<1x32x16xf32>
    %34 = vector.shape_cast %33 : vector<1x32x16xf32> to vector<32x16xf32>
    %cst_29 = arith.constant dense<0.000000e+00> : vector<16x16xf32>
    %35 = tpu.matmul %9, %34, %cst_29 {dimension_numbers = #tpu.dot_dimension_numbers<[1], [0], [0], [1], [0, 0, 1, 1], [], []>} : vector<16x32xf32>, vector<32x16xf32>, vector<16x16xf32> -> vector<16x16xf32>
    %c0_30 = arith.constant 0 : index
    %c0_31 = arith.constant 0 : index
    %c0_32 = arith.constant 0 : index
    %36 = vector.load %arg3[%c0_30, %c0_31, %c0_32] : memref<4x32x16xf32, #tpu.memory_space<vmem>>, vector<1x32x16xf32>
    %37 = vector.shape_cast %36 : vector<1x32x16xf32> to vector<32x16xf32>
    %cst_33 = arith.constant dense<0.000000e+00> : vector<48x16xf32>
    %38 = tpu.matmul %4, %37, %cst_33 {dimension_numbers = #tpu.dot_dimension_numbers<[1], [0], [0], [1], [0, 0, 1, 1], [], []>} : vector<48x32xf32>, vector<32x16xf32>, vector<48x16xf32> -> vector<48x16xf32>
    %39 = vector.extract_strided_slice %35 {offsets = [0, 0], sizes = [8, 16], strides = [1, 1]} : vector<16x16xf32> to vector<8x16xf32>
    %40 = vector.extract_strided_slice %38 {offsets = [0, 0], sizes = [24, 16], strides = [1, 1]} : vector<48x16xf32> to vector<24x16xf32>
    %cst_34 = arith.constant dense<0.000000e+00> : vector<8x24xf32>
    %41 = tpu.matmul %39, %40, %cst_34 {dimension_numbers = #tpu.dot_dimension_numbers<[1], [1], [0], [0], [0, 0, 1, 0], [], []>} : vector<8x16xf32>, vector<24x16xf32>, vector<8x24xf32> -> vector<8x24xf32>
    %cst_35 = arith.constant dense<0xFF800000> : vector<8xf32>
    %42 = vector.multi_reduction <maximumf>, %41, %cst_35 [1] : vector<8x24xf32> to vector<8xf32>
    %43 = vector.shape_cast %42 : vector<8xf32> to vector<8x1xf32>
    %44 = vector.broadcast %43 : vector<8x1xf32> to vector<8x24xf32>
    %45 = arith.subf %41, %44 : vector<8x24xf32>
    %46 = math.exp %45 : vector<8x24xf32>
    %cst_36 = arith.constant dense<0.000000e+00> : vector<8xf32>
    %47 = vector.multi_reduction <add>, %46, %cst_36 [1] : vector<8x24xf32> to vector<8xf32>
    %48 = vector.shape_cast %47 : vector<8xf32> to vector<8x1xf32>
    %49 = vector.broadcast %48 : vector<8x1xf32> to vector<8x24xf32>
    %50 = arith.divf %46, %49 : vector<8x24xf32>
    %cst_37 = arith.constant dense<0.000000e+00> : vector<8x16xf32>
    %51 = tpu.matmul %50, %40, %cst_37 {dimension_numbers = #tpu.dot_dimension_numbers<[1], [0], [0], [1], [0, 0, 1, 1], [], []>} : vector<8x24xf32>, vector<24x16xf32>, vector<8x16xf32> -> vector<8x16xf32>
    %c0_38 = arith.constant 0 : index
    %c0_39 = arith.constant 0 : index
    %c0_40 = arith.constant 0 : index
    %52 = vector.load %arg10[%c0_38, %c0_39, %c0_40] : memref<8x8x24xf32, #tpu.memory_space<vmem>>, vector<1x8x24xf32>
    %53 = vector.shape_cast %52 : vector<1x8x24xf32> to vector<8x24xf32>
    %54 = vector.shape_cast %50 : vector<8x24xf32> to vector<1x8x24xf32>
    tpu.vector_store %arg10[%c0_38, %c0_39, %c0_40], %54 {strides = array<i32>} : memref<8x8x24xf32, #tpu.memory_space<vmem>>, vector<1x8x24xf32>,
    %c0_41 = arith.constant 0 : index
    %c0_42 = arith.constant 0 : index
    %c0_43 = arith.constant 0 : index
    %55 = vector.load %arg3[%c0_41, %c0_42, %c0_43] : memref<4x32x16xf32, #tpu.memory_space<vmem>>, vector<1x32x16xf32>
    %56 = vector.shape_cast %55 : vector<1x32x16xf32> to vector<32x16xf32>
    %cst_44 = arith.constant dense<0.000000e+00> : vector<2x16xf32>
    %57 = tpu.matmul %16, %56, %cst_44 {dimension_numbers = #tpu.dot_dimension_numbers<[1], [0], [0], [1], [0, 0, 1, 1], [], []>} : vector<2x32xf32>, vector<32x16xf32>, vector<2x16xf32> -> vector<2x16xf32>
    %58 = vector.extract_strided_slice %40 {offsets = [8, 0], sizes = [8, 16], strides = [1, 1]} : vector<24x16xf32> to vector<8x16xf32>
    %cst_45 = arith.constant dense<0.000000e+00> : vector<8x8xf32>
    %59 = tpu.matmul %39, %58, %cst_45 {dimension_numbers = #tpu.dot_dimension_numbers<[1], [1], [0], [0], [0, 0, 1, 0], [], []>} : vector<8x16xf32>, vector<8x16xf32>, vector<8x8xf32> -> vector<8x8xf32>
    %cst_46 = arith.constant dense<0xFF800000> : vector<8xf32>
    %60 = vector.multi_reduction <maximumf>, %59, %cst_46 [1] : vector<8x8xf32> to vector<8xf32>
    %61 = vector.shape_cast %60 : vector<8xf32> to vector<8x1xf32>
    %62 = vector.broadcast %61 : vector<8x1xf32> to vector<8x8xf32>
    %63 = arith.subf %59, %62 : vector<8x8xf32>
    %64 = math.exp %63 : vector<8x8xf32>
    %cst_47 = arith.constant dense<0.000000e+00> : vector<8xf32>
    %65 = vector.multi_reduction <add>, %64, %cst_47 [1] : vector<8x8xf32> to vector<8xf32>
    %66 = vector.shape_cast %65 : vector<8xf32> to vector<8x1xf32>
    %67 = vector.broadcast %66 : vector<8x1xf32> to vector<8x8xf32>
    %68 = arith.divf %64, %67 : vector<8x8xf32>
    %cst_48 = arith.constant dense<0.000000e+00> : vector<8x16xf32>
    %69 = tpu.matmul %68, %58, %cst_48 {dimension_numbers = #tpu.dot_dimension_numbers<[1], [0], [0], [1], [0, 0, 1, 1], [], []>} : vector<8x8xf32>, vector<8x16xf32>, vector<8x16xf32> -> vector<8x16xf32>
    %cst_49 = arith.constant dense<0.000000e+00> : vector<8x2xf32>
    %70 = tpu.matmul %39, %57, %cst_49 {dimension_numbers = #tpu.dot_dimension_numbers<[1], [1], [0], [0], [0, 0, 1, 0], [], []>} : vector<8x16xf32>, vector<2x16xf32>, vector<8x2xf32> -> vector<8x2xf32>
    %cst_50 = arith.constant dense<0xFF800000> : vector<8xf32>
    %71 = vector.multi_reduction <maximumf>, %70, %cst_50 [1] : vector<8x2xf32> to vector<8xf32>
    %72 = vector.shape_cast %71 : vector<8xf32> to vector<8x1xf32>
    %73 = vector.broadcast %72 : vector<8x1xf32> to vector<8x2xf32>
    %74 = arith.subf %70, %73 : vector<8x2xf32>
    %75 = math.exp %74 : vector<8x2xf32>
    %cst_51 = arith.constant dense<0.000000e+00> : vector<8xf32>
    %76 = vector.multi_reduction <add>, %75, %cst_51 [1] : vector<8x2xf32> to vector<8xf32>
    %77 = vector.shape_cast %76 : vector<8xf32> to vector<8x1xf32>
    %78 = vector.broadcast %77 : vector<8x1xf32> to vector<8x2xf32>
    %79 = arith.divf %75, %78 : vector<8x2xf32>
    %cst_52 = arith.constant dense<0.000000e+00> : vector<8x16xf32>
    %80 = tpu.matmul %79, %57, %cst_52 {dimension_numbers = #tpu.dot_dimension_numbers<[1], [0], [0], [1], [0, 0, 1, 1], [], []>} : vector<8x2xf32>, vector<2x16xf32>, vector<8x16xf32> -> vector<8x16xf32>
    %81 = arith.subf %69, %80 : vector<8x16xf32>
    %cst_53 = arith.constant 0.000000e+00 : f32
    %82 = vector.broadcast %cst_53 : f32 to vector<8x16xf32>
    %83 = arith.select %32, %81, %82 : vector<8x16xi1>, vector<8x16xf32>
    %84 = arith.mulf %83, %83 : vector<8x16xf32>
    %85 = vector.shape_cast %84 : vector<8x16xf32> to vector<1x8x16xf32>
    %cst_54 = arith.constant dense<0.000000e+00> : vector<1xf32>
    %86 = vector.multi_reduction <add>, %85, %cst_54 [1, 2] : vector<1x8x16xf32> to vector<1xf32>
    %87 = vector.shape_cast %86 : vector<1xf32> to vector<1x1x1xf32>
    %88 = vector.extract %87[0, 0, 0] : f32 from vector<1x1x1xf32>
    %cst_55 = arith.constant 0.000000e+00 : f32
    %89 = arith.addf %cst_55, %88 : f32
    %90 = vector.extract_strided_slice %35 {offsets = [8, 0], sizes = [8, 16], strides = [1, 1]} : vector<16x16xf32> to vector<8x16xf32>
    %91 = vector.extract_strided_slice %38 {offsets = [24, 0], sizes = [24, 16], strides = [1, 1]} : vector<48x16xf32> to vector<24x16xf32>
    %cst_56 = arith.constant dense<0.000000e+00> : vector<8x24xf32>
    %92 = tpu.matmul %90, %91, %cst_56 {dimension_numbers = #tpu.dot_dimension_numbers<[1], [1], [0], [0], [0, 0, 1, 0], [], []>} : vector<8x16xf32>, vector<24x16xf32>, vector<8x24xf32> -> vector<8x24xf32>
    %cst_57 = arith.constant dense<0xFF800000> : vector<8xf32>
    %93 = vector.multi_reduction <maximumf>, %92, %cst_57 [1] : vector<8x24xf32> to vector<8xf32>
    %94 = vector.shape_cast %93 : vector<8xf32> to vector<8x1xf32>
    %95 = vector.broadcast %94 : vector<8x1xf32> to vector<8x24xf32>
    %96 = arith.subf %92, %95 : vector<8x24xf32>
    %97 = math.exp %96 : vector<8x24xf32>
    %cst_58 = arith.constant dense<0.000000e+00> : vector<8xf32>
    %98 = vector.multi_reduction <add>, %97, %cst_58 [1] : vector<8x24xf32> to vector<8xf32>
    %99 = vector.shape_cast %98 : vector<8xf32> to vector<8x1xf32>
    %100 = vector.broadcast %99 : vector<8x1xf32> to vector<8x24xf32>
    %101 = arith.divf %97, %100 : vector<8x24xf32>
    %cst_59 = arith.constant dense<0.000000e+00> : vector<8x16xf32>
    %102 = tpu.matmul %101, %91, %cst_59 {dimension_numbers = #tpu.dot_dimension_numbers<[1], [0], [0], [1], [0, 0, 1, 1], [], []>} : vector<8x24xf32>, vector<24x16xf32>, vector<8x16xf32> -> vector<8x16xf32>
    %c4 = arith.constant 4 : index
    %c0_60 = arith.constant 0 : index
    %c0_61 = arith.constant 0 : index
    %103 = vector.load %arg10[%c4, %c0_60, %c0_61] : memref<8x8x24xf32, #tpu.memory_space<vmem>>, vector<1x8x24xf32>
    %104 = vector.shape_cast %103 : vector<1x8x24xf32> to vector<8x24xf32>
    %105 = vector.shape_cast %101 : vector<8x24xf32> to vector<1x8x24xf32>
    tpu.vector_store %arg10[%c4, %c0_60, %c0_61], %105 {strides = array<i32>} : memref<8x8x24xf32, #tpu.memory_space<vmem>>, vector<1x8x24xf32>,
    %c0_62 = arith.constant 0 : index
    %c0_63 = arith.constant 0 : index
    %c0_64 = arith.constant 0 : index
    %106 = vector.load %arg3[%c0_62, %c0_63, %c0_64] : memref<4x32x16xf32, #tpu.memory_space<vmem>>, vector<1x32x16xf32>
    %107 = vector.shape_cast %106 : vector<1x32x16xf32> to vector<32x16xf32>
    %cst_65 = arith.constant dense<0.000000e+00> : vector<2x16xf32>
    %108 = tpu.matmul %26, %107, %cst_65 {dimension_numbers = #tpu.dot_dimension_numbers<[1], [0], [0], [1], [0, 0, 1, 1], [], []>} : vector<2x32xf32>, vector<32x16xf32>, vector<2x16xf32> -> vector<2x16xf32>
    %109 = vector.extract_strided_slice %91 {offsets = [8, 0], sizes = [8, 16], strides = [1, 1]} : vector<24x16xf32> to vector<8x16xf32>
    %cst_66 = arith.constant dense<0.000000e+00> : vector<8x8xf32>
    %110 = tpu.matmul %90, %109, %cst_66 {dimension_numbers = #tpu.dot_dimension_numbers<[1], [1], [0], [0], [0, 0, 1, 0], [], []>} : vector<8x16xf32>, vector<8x16xf32>, vector<8x8xf32> -> vector<8x8xf32>
    %cst_67 = arith.constant dense<0xFF800000> : vector<8xf32>
    %111 = vector.multi_reduction <maximumf>, %110, %cst_67 [1] : vector<8x8xf32> to vector<8xf32>
    %112 = vector.shape_cast %111 : vector<8xf32> to vector<8x1xf32>
    %113 = vector.broadcast %112 : vector<8x1xf32> to vector<8x8xf32>
    %114 = arith.subf %110, %113 : vector<8x8xf32>
    %115 = math.exp %114 : vector<8x8xf32>
    %cst_68 = arith.constant dense<0.000000e+00> : vector<8xf32>
    %116 = vector.multi_reduction <add>, %115, %cst_68 [1] : vector<8x8xf32> to vector<8xf32>
    %117 = vector.shape_cast %116 : vector<8xf32> to vector<8x1xf32>
    %118 = vector.broadcast %117 : vector<8x1xf32> to vector<8x8xf32>
    %119 = arith.divf %115, %118 : vector<8x8xf32>
    %cst_69 = arith.constant dense<0.000000e+00> : vector<8x16xf32>
    %120 = tpu.matmul %119, %109, %cst_69 {dimension_numbers = #tpu.dot_dimension_numbers<[1], [0], [0], [1], [0, 0, 1, 1], [], []>} : vector<8x8xf32>, vector<8x16xf32>, vector<8x16xf32> -> vector<8x16xf32>
    %cst_70 = arith.constant dense<0.000000e+00> : vector<8x2xf32>
    %121 = tpu.matmul %90, %108, %cst_70 {dimension_numbers = #tpu.dot_dimension_numbers<[1], [1], [0], [0], [0, 0, 1, 0], [], []>} : vector<8x16xf32>, vector<2x16xf32>, vector<8x2xf32> -> vector<8x2xf32>
    %cst_71 = arith.constant dense<0xFF800000> : vector<8xf32>
    %122 = vector.multi_reduction <maximumf>, %121, %cst_71 [1] : vector<8x2xf32> to vector<8xf32>
    %123 = vector.shape_cast %122 : vector<8xf32> to vector<8x1xf32>
    %124 = vector.broadcast %123 : vector<8x1xf32> to vector<8x2xf32>
    %125 = arith.subf %121, %124 : vector<8x2xf32>
    %126 = math.exp %125 : vector<8x2xf32>
    %cst_72 = arith.constant dense<0.000000e+00> : vector<8xf32>
    %127 = vector.multi_reduction <add>, %126, %cst_72 [1] : vector<8x2xf32> to vector<8xf32>
    %128 = vector.shape_cast %127 : vector<8xf32> to vector<8x1xf32>
    %129 = vector.broadcast %128 : vector<8x1xf32> to vector<8x2xf32>
    %130 = arith.divf %126, %129 : vector<8x2xf32>
    %cst_73 = arith.constant dense<0.000000e+00> : vector<8x16xf32>
    %131 = tpu.matmul %130, %108, %cst_73 {dimension_numbers = #tpu.dot_dimension_numbers<[1], [0], [0], [1], [0, 0, 1, 1], [], []>} : vector<8x2xf32>, vector<2x16xf32>, vector<8x16xf32> -> vector<8x16xf32>
    %132 = arith.subf %120, %131 : vector<8x16xf32>
    %cst_74 = arith.constant 0.000000e+00 : f32
    %133 = vector.broadcast %cst_74 : f32 to vector<8x16xf32>
    %134 = arith.select %32, %132, %133 : vector<8x16xi1>, vector<8x16xf32>
    %135 = arith.mulf %134, %134 : vector<8x16xf32>
    %136 = vector.shape_cast %135 : vector<8x16xf32> to vector<1x8x16xf32>
    %cst_75 = arith.constant dense<0.000000e+00> : vector<1xf32>
    %137 = vector.multi_reduction <add>, %136, %cst_75 [1, 2] : vector<1x8x16xf32> to vector<1xf32>
    %138 = vector.shape_cast %137 : vector<1xf32> to vector<1x1x1xf32>
    %139 = vector.extract %138[0, 0, 0] : f32 from vector<1x1x1xf32>
    %140 = arith.addf %89, %139 : f32
    %141 = tpu.concatenate %51, %102 in 0 : vector<8x16xf32>, vector<8x16xf32> -> vector<16x16xf32>
    %c0_76 = arith.constant 0 : index
    %c0_77 = arith.constant 0 : index
    %c0_78 = arith.constant 0 : index
    %142 = vector.load %arg4[%c0_76, %c0_77, %c0_78] : memref<4x16x32xf32, #tpu.memory_space<vmem>>, vector<1x16x32xf32>
    %143 = vector.shape_cast %142 : vector<1x16x32xf32> to vector<16x32xf32>
    %cst_79 = arith.constant dense<0.000000e+00> : vector<16x32xf32>
    %144 = tpu.matmul %141, %143, %cst_79 {dimension_numbers = #tpu.dot_dimension_numbers<[1], [0], [0], [1], [0, 0, 1, 1], [], []>} : vector<16x16xf32>, vector<16x32xf32>, vector<16x32xf32> -> vector<16x32xf32>
    %c1_80 = arith.constant 1 : index
    %c0_81 = arith.constant 0 : index
    %c0_82 = arith.constant 0 : index
    %145 = vector.load %arg2[%c1_80, %c0_81, %c0_82] : memref<4x32x16xf32, #tpu.memory_space<vmem>>, vector<1x32x16xf32>
    %146 = vector.shape_cast %145 : vector<1x32x16xf32> to vector<32x16xf32>
    %cst_83 = arith.constant dense<0.000000e+00> : vector<16x16xf32>
    %147 = tpu.matmul %9, %146, %cst_83 {dimension_numbers = #tpu.dot_dimension_numbers<[1], [0], [0], [1], [0, 0, 1, 1], [], []>} : vector<16x32xf32>, vector<32x16xf32>, vector<16x16xf32> -> vector<16x16xf32>
    %c1_84 = arith.constant 1 : index
    %c0_85 = arith.constant 0 : index
    %c0_86 = arith.constant 0 : index
    %148 = vector.load %arg3[%c1_84, %c0_85, %c0_86] : memref<4x32x16xf32, #tpu.memory_space<vmem>>, vector<1x32x16xf32>
    %149 = vector.shape_cast %148 : vector<1x32x16xf32> to vector<32x16xf32>
    %cst_87 = arith.constant dense<0.000000e+00> : vector<48x16xf32>
    %150 = tpu.matmul %4, %149, %cst_87 {dimension_numbers = #tpu.dot_dimension_numbers<[1], [0], [0], [1], [0, 0, 1, 1], [], []>} : vector<48x32xf32>, vector<32x16xf32>, vector<48x16xf32> -> vector<48x16xf32>
    %151 = vector.extract_strided_slice %147 {offsets = [0, 0], sizes = [8, 16], strides = [1, 1]} : vector<16x16xf32> to vector<8x16xf32>
    %152 = vector.extract_strided_slice %150 {offsets = [0, 0], sizes = [24, 16], strides = [1, 1]} : vector<48x16xf32> to vector<24x16xf32>
    %cst_88 = arith.constant dense<0.000000e+00> : vector<8x24xf32>
    %153 = tpu.matmul %151, %152, %cst_88 {dimension_numbers = #tpu.dot_dimension_numbers<[1], [1], [0], [0], [0, 0, 1, 0], [], []>} : vector<8x16xf32>, vector<24x16xf32>, vector<8x24xf32> -> vector<8x24xf32>
    %cst_89 = arith.constant dense<0xFF800000> : vector<8xf32>
    %154 = vector.multi_reduction <maximumf>, %153, %cst_89 [1] : vector<8x24xf32> to vector<8xf32>
    %155 = vector.shape_cast %154 : vector<8xf32> to vector<8x1xf32>
    %156 = vector.broadcast %155 : vector<8x1xf32> to vector<8x24xf32>
    %157 = arith.subf %153, %156 : vector<8x24xf32>
    %158 = math.exp %157 : vector<8x24xf32>
    %cst_90 = arith.constant dense<0.000000e+00> : vector<8xf32>
    %159 = vector.multi_reduction <add>, %158, %cst_90 [1] : vector<8x24xf32> to vector<8xf32>
    %160 = vector.shape_cast %159 : vector<8xf32> to vector<8x1xf32>
    %161 = vector.broadcast %160 : vector<8x1xf32> to vector<8x24xf32>
    %162 = arith.divf %158, %161 : vector<8x24xf32>
    %cst_91 = arith.constant dense<0.000000e+00> : vector<8x16xf32>
    %163 = tpu.matmul %162, %152, %cst_91 {dimension_numbers = #tpu.dot_dimension_numbers<[1], [0], [0], [1], [0, 0, 1, 1], [], []>} : vector<8x24xf32>, vector<24x16xf32>, vector<8x16xf32> -> vector<8x16xf32>
    %c1_92 = arith.constant 1 : index
    %c0_93 = arith.constant 0 : index
    %c0_94 = arith.constant 0 : index
    %164 = vector.load %arg10[%c1_92, %c0_93, %c0_94] : memref<8x8x24xf32, #tpu.memory_space<vmem>>, vector<1x8x24xf32>
    %165 = vector.shape_cast %164 : vector<1x8x24xf32> to vector<8x24xf32>
    %166 = vector.shape_cast %162 : vector<8x24xf32> to vector<1x8x24xf32>
    tpu.vector_store %arg10[%c1_92, %c0_93, %c0_94], %166 {strides = array<i32>} : memref<8x8x24xf32, #tpu.memory_space<vmem>>, vector<1x8x24xf32>,
    %c1_95 = arith.constant 1 : index
    %c0_96 = arith.constant 0 : index
    %c0_97 = arith.constant 0 : index
    %167 = vector.load %arg3[%c1_95, %c0_96, %c0_97] : memref<4x32x16xf32, #tpu.memory_space<vmem>>, vector<1x32x16xf32>
    %168 = vector.shape_cast %167 : vector<1x32x16xf32> to vector<32x16xf32>
    %cst_98 = arith.constant dense<0.000000e+00> : vector<2x16xf32>
    %169 = tpu.matmul %16, %168, %cst_98 {dimension_numbers = #tpu.dot_dimension_numbers<[1], [0], [0], [1], [0, 0, 1, 1], [], []>} : vector<2x32xf32>, vector<32x16xf32>, vector<2x16xf32> -> vector<2x16xf32>
    %170 = vector.extract_strided_slice %152 {offsets = [8, 0], sizes = [8, 16], strides = [1, 1]} : vector<24x16xf32> to vector<8x16xf32>
    %cst_99 = arith.constant dense<0.000000e+00> : vector<8x8xf32>
    %171 = tpu.matmul %151, %170, %cst_99 {dimension_numbers = #tpu.dot_dimension_numbers<[1], [1], [0], [0], [0, 0, 1, 0], [], []>} : vector<8x16xf32>, vector<8x16xf32>, vector<8x8xf32> -> vector<8x8xf32>
    %cst_100 = arith.constant dense<0xFF800000> : vector<8xf32>
    %172 = vector.multi_reduction <maximumf>, %171, %cst_100 [1] : vector<8x8xf32> to vector<8xf32>
    %173 = vector.shape_cast %172 : vector<8xf32> to vector<8x1xf32>
    %174 = vector.broadcast %173 : vector<8x1xf32> to vector<8x8xf32>
    %175 = arith.subf %171, %174 : vector<8x8xf32>
    %176 = math.exp %175 : vector<8x8xf32>
    %cst_101 = arith.constant dense<0.000000e+00> : vector<8xf32>
    %177 = vector.multi_reduction <add>, %176, %cst_101 [1] : vector<8x8xf32> to vector<8xf32>
    %178 = vector.shape_cast %177 : vector<8xf32> to vector<8x1xf32>
    %179 = vector.broadcast %178 : vector<8x1xf32> to vector<8x8xf32>
    %180 = arith.divf %176, %179 : vector<8x8xf32>
    %cst_102 = arith.constant dense<0.000000e+00> : vector<8x16xf32>
    %181 = tpu.matmul %180, %170, %cst_102 {dimension_numbers = #tpu.dot_dimension_numbers<[1], [0], [0], [1], [0, 0, 1, 1], [], []>} : vector<8x8xf32>, vector<8x16xf32>, vector<8x16xf32> -> vector<8x16xf32>
    %cst_103 = arith.constant dense<0.000000e+00> : vector<8x2xf32>
    %182 = tpu.matmul %151, %169, %cst_103 {dimension_numbers = #tpu.dot_dimension_numbers<[1], [1], [0], [0], [0, 0, 1, 0], [], []>} : vector<8x16xf32>, vector<2x16xf32>, vector<8x2xf32> -> vector<8x2xf32>
    %cst_104 = arith.constant dense<0xFF800000> : vector<8xf32>
    %183 = vector.multi_reduction <maximumf>, %182, %cst_104 [1] : vector<8x2xf32> to vector<8xf32>
    %184 = vector.shape_cast %183 : vector<8xf32> to vector<8x1xf32>
    %185 = vector.broadcast %184 : vector<8x1xf32> to vector<8x2xf32>
    %186 = arith.subf %182, %185 : vector<8x2xf32>
    %187 = math.exp %186 : vector<8x2xf32>
    %cst_105 = arith.constant dense<0.000000e+00> : vector<8xf32>
    %188 = vector.multi_reduction <add>, %187, %cst_105 [1] : vector<8x2xf32> to vector<8xf32>
    %189 = vector.shape_cast %188 : vector<8xf32> to vector<8x1xf32>
    %190 = vector.broadcast %189 : vector<8x1xf32> to vector<8x2xf32>
    %191 = arith.divf %187, %190 : vector<8x2xf32>
    %cst_106 = arith.constant dense<0.000000e+00> : vector<8x16xf32>
    %192 = tpu.matmul %191, %169, %cst_106 {dimension_numbers = #tpu.dot_dimension_numbers<[1], [0], [0], [1], [0, 0, 1, 1], [], []>} : vector<8x2xf32>, vector<2x16xf32>, vector<8x16xf32> -> vector<8x16xf32>
    %193 = arith.subf %181, %192 : vector<8x16xf32>
    %cst_107 = arith.constant 0.000000e+00 : f32
    %194 = vector.broadcast %cst_107 : f32 to vector<8x16xf32>
    %195 = arith.select %32, %193, %194 : vector<8x16xi1>, vector<8x16xf32>
    %196 = arith.mulf %195, %195 : vector<8x16xf32>
    %197 = vector.shape_cast %196 : vector<8x16xf32> to vector<1x8x16xf32>
    %cst_108 = arith.constant dense<0.000000e+00> : vector<1xf32>
    %198 = vector.multi_reduction <add>, %197, %cst_108 [1, 2] : vector<1x8x16xf32> to vector<1xf32>
    %199 = vector.shape_cast %198 : vector<1xf32> to vector<1x1x1xf32>
    %200 = vector.extract %199[0, 0, 0] : f32 from vector<1x1x1xf32>
    %201 = arith.addf %140, %200 : f32
    %202 = vector.extract_strided_slice %147 {offsets = [8, 0], sizes = [8, 16], strides = [1, 1]} : vector<16x16xf32> to vector<8x16xf32>
    %203 = vector.extract_strided_slice %150 {offsets = [24, 0], sizes = [24, 16], strides = [1, 1]} : vector<48x16xf32> to vector<24x16xf32>
    %cst_109 = arith.constant dense<0.000000e+00> : vector<8x24xf32>
    %204 = tpu.matmul %202, %203, %cst_109 {dimension_numbers = #tpu.dot_dimension_numbers<[1], [1], [0], [0], [0, 0, 1, 0], [], []>} : vector<8x16xf32>, vector<24x16xf32>, vector<8x24xf32> -> vector<8x24xf32>
    %cst_110 = arith.constant dense<0xFF800000> : vector<8xf32>
    %205 = vector.multi_reduction <maximumf>, %204, %cst_110 [1] : vector<8x24xf32> to vector<8xf32>
    %206 = vector.shape_cast %205 : vector<8xf32> to vector<8x1xf32>
    %207 = vector.broadcast %206 : vector<8x1xf32> to vector<8x24xf32>
    %208 = arith.subf %204, %207 : vector<8x24xf32>
    %209 = math.exp %208 : vector<8x24xf32>
    %cst_111 = arith.constant dense<0.000000e+00> : vector<8xf32>
    %210 = vector.multi_reduction <add>, %209, %cst_111 [1] : vector<8x24xf32> to vector<8xf32>
    %211 = vector.shape_cast %210 : vector<8xf32> to vector<8x1xf32>
    %212 = vector.broadcast %211 : vector<8x1xf32> to vector<8x24xf32>
    %213 = arith.divf %209, %212 : vector<8x24xf32>
    %cst_112 = arith.constant dense<0.000000e+00> : vector<8x16xf32>
    %214 = tpu.matmul %213, %203, %cst_112 {dimension_numbers = #tpu.dot_dimension_numbers<[1], [0], [0], [1], [0, 0, 1, 1], [], []>} : vector<8x24xf32>, vector<24x16xf32>, vector<8x16xf32> -> vector<8x16xf32>
    %c5 = arith.constant 5 : index
    %c0_113 = arith.constant 0 : index
    %c0_114 = arith.constant 0 : index
    %215 = vector.load %arg10[%c5, %c0_113, %c0_114] : memref<8x8x24xf32, #tpu.memory_space<vmem>>, vector<1x8x24xf32>
    %216 = vector.shape_cast %215 : vector<1x8x24xf32> to vector<8x24xf32>
    %217 = vector.shape_cast %213 : vector<8x24xf32> to vector<1x8x24xf32>
    tpu.vector_store %arg10[%c5, %c0_113, %c0_114], %217 {strides = array<i32>} : memref<8x8x24xf32, #tpu.memory_space<vmem>>, vector<1x8x24xf32>,
    %c1_115 = arith.constant 1 : index
    %c0_116 = arith.constant 0 : index
    %c0_117 = arith.constant 0 : index
    %218 = vector.load %arg3[%c1_115, %c0_116, %c0_117] : memref<4x32x16xf32, #tpu.memory_space<vmem>>, vector<1x32x16xf32>
    %219 = vector.shape_cast %218 : vector<1x32x16xf32> to vector<32x16xf32>
    %cst_118 = arith.constant dense<0.000000e+00> : vector<2x16xf32>
    %220 = tpu.matmul %26, %219, %cst_118 {dimension_numbers = #tpu.dot_dimension_numbers<[1], [0], [0], [1], [0, 0, 1, 1], [], []>} : vector<2x32xf32>, vector<32x16xf32>, vector<2x16xf32> -> vector<2x16xf32>
    %221 = vector.extract_strided_slice %203 {offsets = [8, 0], sizes = [8, 16], strides = [1, 1]} : vector<24x16xf32> to vector<8x16xf32>
    %cst_119 = arith.constant dense<0.000000e+00> : vector<8x8xf32>
    %222 = tpu.matmul %202, %221, %cst_119 {dimension_numbers = #tpu.dot_dimension_numbers<[1], [1], [0], [0], [0, 0, 1, 0], [], []>} : vector<8x16xf32>, vector<8x16xf32>, vector<8x8xf32> -> vector<8x8xf32>
    %cst_120 = arith.constant dense<0xFF800000> : vector<8xf32>
    %223 = vector.multi_reduction <maximumf>, %222, %cst_120 [1] : vector<8x8xf32> to vector<8xf32>
    %224 = vector.shape_cast %223 : vector<8xf32> to vector<8x1xf32>
    %225 = vector.broadcast %224 : vector<8x1xf32> to vector<8x8xf32>
    %226 = arith.subf %222, %225 : vector<8x8xf32>
    %227 = math.exp %226 : vector<8x8xf32>
    %cst_121 = arith.constant dense<0.000000e+00> : vector<8xf32>
    %228 = vector.multi_reduction <add>, %227, %cst_121 [1] : vector<8x8xf32> to vector<8xf32>
    %229 = vector.shape_cast %228 : vector<8xf32> to vector<8x1xf32>
    %230 = vector.broadcast %229 : vector<8x1xf32> to vector<8x8xf32>
    %231 = arith.divf %227, %230 : vector<8x8xf32>
    %cst_122 = arith.constant dense<0.000000e+00> : vector<8x16xf32>
    %232 = tpu.matmul %231, %221, %cst_122 {dimension_numbers = #tpu.dot_dimension_numbers<[1], [0], [0], [1], [0, 0, 1, 1], [], []>} : vector<8x8xf32>, vector<8x16xf32>, vector<8x16xf32> -> vector<8x16xf32>
    %cst_123 = arith.constant dense<0.000000e+00> : vector<8x2xf32>
    %233 = tpu.matmul %202, %220, %cst_123 {dimension_numbers = #tpu.dot_dimension_numbers<[1], [1], [0], [0], [0, 0, 1, 0], [], []>} : vector<8x16xf32>, vector<2x16xf32>, vector<8x2xf32> -> vector<8x2xf32>
    %cst_124 = arith.constant dense<0xFF800000> : vector<8xf32>
    %234 = vector.multi_reduction <maximumf>, %233, %cst_124 [1] : vector<8x2xf32> to vector<8xf32>
    %235 = vector.shape_cast %234 : vector<8xf32> to vector<8x1xf32>
    %236 = vector.broadcast %235 : vector<8x1xf32> to vector<8x2xf32>
    %237 = arith.subf %233, %236 : vector<8x2xf32>
    %238 = math.exp %237 : vector<8x2xf32>
    %cst_125 = arith.constant dense<0.000000e+00> : vector<8xf32>
    %239 = vector.multi_reduction <add>, %238, %cst_125 [1] : vector<8x2xf32> to vector<8xf32>
    %240 = vector.shape_cast %239 : vector<8xf32> to vector<8x1xf32>
    %241 = vector.broadcast %240 : vector<8x1xf32> to vector<8x2xf32>
    %242 = arith.divf %238, %241 : vector<8x2xf32>
    %cst_126 = arith.constant dense<0.000000e+00> : vector<8x16xf32>
    %243 = tpu.matmul %242, %220, %cst_126 {dimension_numbers = #tpu.dot_dimension_numbers<[1], [0], [0], [1], [0, 0, 1, 1], [], []>} : vector<8x2xf32>, vector<2x16xf32>, vector<8x16xf32> -> vector<8x16xf32>
    %244 = arith.subf %232, %243 : vector<8x16xf32>
    %cst_127 = arith.constant 0.000000e+00 : f32
    %245 = vector.broadcast %cst_127 : f32 to vector<8x16xf32>
    %246 = arith.select %32, %244, %245 : vector<8x16xi1>, vector<8x16xf32>
    %247 = arith.mulf %246, %246 : vector<8x16xf32>
    %248 = vector.shape_cast %247 : vector<8x16xf32> to vector<1x8x16xf32>
    %cst_128 = arith.constant dense<0.000000e+00> : vector<1xf32>
    %249 = vector.multi_reduction <add>, %248, %cst_128 [1, 2] : vector<1x8x16xf32> to vector<1xf32>
    %250 = vector.shape_cast %249 : vector<1xf32> to vector<1x1x1xf32>
    %251 = vector.extract %250[0, 0, 0] : f32 from vector<1x1x1xf32>
    %252 = arith.addf %201, %251 : f32
    %253 = tpu.concatenate %163, %214 in 0 : vector<8x16xf32>, vector<8x16xf32> -> vector<16x16xf32>
    %c1_129 = arith.constant 1 : index
    %c0_130 = arith.constant 0 : index
    %c0_131 = arith.constant 0 : index
    %254 = vector.load %arg4[%c1_129, %c0_130, %c0_131] : memref<4x16x32xf32, #tpu.memory_space<vmem>>, vector<1x16x32xf32>
    %255 = vector.shape_cast %254 : vector<1x16x32xf32> to vector<16x32xf32>
    %cst_132 = arith.constant dense<0.000000e+00> : vector<16x32xf32>
    %256 = tpu.matmul %253, %255, %cst_132 {dimension_numbers = #tpu.dot_dimension_numbers<[1], [0], [0], [1], [0, 0, 1, 1], [], []>} : vector<16x16xf32>, vector<16x32xf32>, vector<16x32xf32> -> vector<16x32xf32>
    %257 = arith.addf %144, %256 : vector<16x32xf32>
    %c2 = arith.constant 2 : index
    %c0_133 = arith.constant 0 : index
    %c0_134 = arith.constant 0 : index
    %258 = vector.load %arg2[%c2, %c0_133, %c0_134] : memref<4x32x16xf32, #tpu.memory_space<vmem>>, vector<1x32x16xf32>
    %259 = vector.shape_cast %258 : vector<1x32x16xf32> to vector<32x16xf32>
    %cst_135 = arith.constant dense<0.000000e+00> : vector<16x16xf32>
    %260 = tpu.matmul %9, %259, %cst_135 {dimension_numbers = #tpu.dot_dimension_numbers<[1], [0], [0], [1], [0, 0, 1, 1], [], []>} : vector<16x32xf32>, vector<32x16xf32>, vector<16x16xf32> -> vector<16x16xf32>
    %c2_136 = arith.constant 2 : index
    %c0_137 = arith.constant 0 : index
    %c0_138 = arith.constant 0 : index
    %261 = vector.load %arg3[%c2_136, %c0_137, %c0_138] : memref<4x32x16xf32, #tpu.memory_space<vmem>>, vector<1x32x16xf32>
    %262 = vector.shape_cast %261 : vector<1x32x16xf32> to vector<32x16xf32>
    %cst_139 = arith.constant dense<0.000000e+00> : vector<48x16xf32>
    %263 = tpu.matmul %4, %262, %cst_139 {dimension_numbers = #tpu.dot_dimension_numbers<[1], [0], [0], [1], [0, 0, 1, 1], [], []>} : vector<48x32xf32>, vector<32x16xf32>, vector<48x16xf32> -> vector<48x16xf32>
    %264 = vector.extract_strided_slice %260 {offsets = [0, 0], sizes = [8, 16], strides = [1, 1]} : vector<16x16xf32> to vector<8x16xf32>
    %265 = vector.extract_strided_slice %263 {offsets = [0, 0], sizes = [24, 16], strides = [1, 1]} : vector<48x16xf32> to vector<24x16xf32>
    %cst_140 = arith.constant dense<0.000000e+00> : vector<8x24xf32>
    %266 = tpu.matmul %264, %265, %cst_140 {dimension_numbers = #tpu.dot_dimension_numbers<[1], [1], [0], [0], [0, 0, 1, 0], [], []>} : vector<8x16xf32>, vector<24x16xf32>, vector<8x24xf32> -> vector<8x24xf32>
    %cst_141 = arith.constant dense<0xFF800000> : vector<8xf32>
    %267 = vector.multi_reduction <maximumf>, %266, %cst_141 [1] : vector<8x24xf32> to vector<8xf32>
    %268 = vector.shape_cast %267 : vector<8xf32> to vector<8x1xf32>
    %269 = vector.broadcast %268 : vector<8x1xf32> to vector<8x24xf32>
    %270 = arith.subf %266, %269 : vector<8x24xf32>
    %271 = math.exp %270 : vector<8x24xf32>
    %cst_142 = arith.constant dense<0.000000e+00> : vector<8xf32>
    %272 = vector.multi_reduction <add>, %271, %cst_142 [1] : vector<8x24xf32> to vector<8xf32>
    %273 = vector.shape_cast %272 : vector<8xf32> to vector<8x1xf32>
    %274 = vector.broadcast %273 : vector<8x1xf32> to vector<8x24xf32>
    %275 = arith.divf %271, %274 : vector<8x24xf32>
    %cst_143 = arith.constant dense<0.000000e+00> : vector<8x16xf32>
    %276 = tpu.matmul %275, %265, %cst_143 {dimension_numbers = #tpu.dot_dimension_numbers<[1], [0], [0], [1], [0, 0, 1, 1], [], []>} : vector<8x24xf32>, vector<24x16xf32>, vector<8x16xf32> -> vector<8x16xf32>
    %c2_144 = arith.constant 2 : index
    %c0_145 = arith.constant 0 : index
    %c0_146 = arith.constant 0 : index
    %277 = vector.load %arg10[%c2_144, %c0_145, %c0_146] : memref<8x8x24xf32, #tpu.memory_space<vmem>>, vector<1x8x24xf32>
    %278 = vector.shape_cast %277 : vector<1x8x24xf32> to vector<8x24xf32>
    %279 = vector.shape_cast %275 : vector<8x24xf32> to vector<1x8x24xf32>
    tpu.vector_store %arg10[%c2_144, %c0_145, %c0_146], %279 {strides = array<i32>} : memref<8x8x24xf32, #tpu.memory_space<vmem>>, vector<1x8x24xf32>,
    %c2_147 = arith.constant 2 : index
    %c0_148 = arith.constant 0 : index
    %c0_149 = arith.constant 0 : index
    %280 = vector.load %arg3[%c2_147, %c0_148, %c0_149] : memref<4x32x16xf32, #tpu.memory_space<vmem>>, vector<1x32x16xf32>
    %281 = vector.shape_cast %280 : vector<1x32x16xf32> to vector<32x16xf32>
    %cst_150 = arith.constant dense<0.000000e+00> : vector<2x16xf32>
    %282 = tpu.matmul %16, %281, %cst_150 {dimension_numbers = #tpu.dot_dimension_numbers<[1], [0], [0], [1], [0, 0, 1, 1], [], []>} : vector<2x32xf32>, vector<32x16xf32>, vector<2x16xf32> -> vector<2x16xf32>
    %283 = vector.extract_strided_slice %265 {offsets = [8, 0], sizes = [8, 16], strides = [1, 1]} : vector<24x16xf32> to vector<8x16xf32>
    %cst_151 = arith.constant dense<0.000000e+00> : vector<8x8xf32>
    %284 = tpu.matmul %264, %283, %cst_151 {dimension_numbers = #tpu.dot_dimension_numbers<[1], [1], [0], [0], [0, 0, 1, 0], [], []>} : vector<8x16xf32>, vector<8x16xf32>, vector<8x8xf32> -> vector<8x8xf32>
    %cst_152 = arith.constant dense<0xFF800000> : vector<8xf32>
    %285 = vector.multi_reduction <maximumf>, %284, %cst_152 [1] : vector<8x8xf32> to vector<8xf32>
    %286 = vector.shape_cast %285 : vector<8xf32> to vector<8x1xf32>
    %287 = vector.broadcast %286 : vector<8x1xf32> to vector<8x8xf32>
    %288 = arith.subf %284, %287 : vector<8x8xf32>
    %289 = math.exp %288 : vector<8x8xf32>
    %cst_153 = arith.constant dense<0.000000e+00> : vector<8xf32>
    %290 = vector.multi_reduction <add>, %289, %cst_153 [1] : vector<8x8xf32> to vector<8xf32>
    %291 = vector.shape_cast %290 : vector<8xf32> to vector<8x1xf32>
    %292 = vector.broadcast %291 : vector<8x1xf32> to vector<8x8xf32>
    %293 = arith.divf %289, %292 : vector<8x8xf32>
    %cst_154 = arith.constant dense<0.000000e+00> : vector<8x16xf32>
    %294 = tpu.matmul %293, %283, %cst_154 {dimension_numbers = #tpu.dot_dimension_numbers<[1], [0], [0], [1], [0, 0, 1, 1], [], []>} : vector<8x8xf32>, vector<8x16xf32>, vector<8x16xf32> -> vector<8x16xf32>
    %cst_155 = arith.constant dense<0.000000e+00> : vector<8x2xf32>
    %295 = tpu.matmul %264, %282, %cst_155 {dimension_numbers = #tpu.dot_dimension_numbers<[1], [1], [0], [0], [0, 0, 1, 0], [], []>} : vector<8x16xf32>, vector<2x16xf32>, vector<8x2xf32> -> vector<8x2xf32>
    %cst_156 = arith.constant dense<0xFF800000> : vector<8xf32>
    %296 = vector.multi_reduction <maximumf>, %295, %cst_156 [1] : vector<8x2xf32> to vector<8xf32>
    %297 = vector.shape_cast %296 : vector<8xf32> to vector<8x1xf32>
    %298 = vector.broadcast %297 : vector<8x1xf32> to vector<8x2xf32>
    %299 = arith.subf %295, %298 : vector<8x2xf32>
    %300 = math.exp %299 : vector<8x2xf32>
    %cst_157 = arith.constant dense<0.000000e+00> : vector<8xf32>
    %301 = vector.multi_reduction <add>, %300, %cst_157 [1] : vector<8x2xf32> to vector<8xf32>
    %302 = vector.shape_cast %301 : vector<8xf32> to vector<8x1xf32>
    %303 = vector.broadcast %302 : vector<8x1xf32> to vector<8x2xf32>
    %304 = arith.divf %300, %303 : vector<8x2xf32>
    %cst_158 = arith.constant dense<0.000000e+00> : vector<8x16xf32>
    %305 = tpu.matmul %304, %282, %cst_158 {dimension_numbers = #tpu.dot_dimension_numbers<[1], [0], [0], [1], [0, 0, 1, 1], [], []>} : vector<8x2xf32>, vector<2x16xf32>, vector<8x16xf32> -> vector<8x16xf32>
    %306 = arith.subf %294, %305 : vector<8x16xf32>
    %cst_159 = arith.constant 0.000000e+00 : f32
    %307 = vector.broadcast %cst_159 : f32 to vector<8x16xf32>
    %308 = arith.select %32, %306, %307 : vector<8x16xi1>, vector<8x16xf32>
    %309 = arith.mulf %308, %308 : vector<8x16xf32>
    %310 = vector.shape_cast %309 : vector<8x16xf32> to vector<1x8x16xf32>
    %cst_160 = arith.constant dense<0.000000e+00> : vector<1xf32>
    %311 = vector.multi_reduction <add>, %310, %cst_160 [1, 2] : vector<1x8x16xf32> to vector<1xf32>
    %312 = vector.shape_cast %311 : vector<1xf32> to vector<1x1x1xf32>
    %313 = vector.extract %312[0, 0, 0] : f32 from vector<1x1x1xf32>
    %314 = arith.addf %252, %313 : f32
    %315 = vector.extract_strided_slice %260 {offsets = [8, 0], sizes = [8, 16], strides = [1, 1]} : vector<16x16xf32> to vector<8x16xf32>
    %316 = vector.extract_strided_slice %263 {offsets = [24, 0], sizes = [24, 16], strides = [1, 1]} : vector<48x16xf32> to vector<24x16xf32>
    %cst_161 = arith.constant dense<0.000000e+00> : vector<8x24xf32>
    %317 = tpu.matmul %315, %316, %cst_161 {dimension_numbers = #tpu.dot_dimension_numbers<[1], [1], [0], [0], [0, 0, 1, 0], [], []>} : vector<8x16xf32>, vector<24x16xf32>, vector<8x24xf32> -> vector<8x24xf32>
    %cst_162 = arith.constant dense<0xFF800000> : vector<8xf32>
    %318 = vector.multi_reduction <maximumf>, %317, %cst_162 [1] : vector<8x24xf32> to vector<8xf32>
    %319 = vector.shape_cast %318 : vector<8xf32> to vector<8x1xf32>
    %320 = vector.broadcast %319 : vector<8x1xf32> to vector<8x24xf32>
    %321 = arith.subf %317, %320 : vector<8x24xf32>
    %322 = math.exp %321 : vector<8x24xf32>
    %cst_163 = arith.constant dense<0.000000e+00> : vector<8xf32>
    %323 = vector.multi_reduction <add>, %322, %cst_163 [1] : vector<8x24xf32> to vector<8xf32>
    %324 = vector.shape_cast %323 : vector<8xf32> to vector<8x1xf32>
    %325 = vector.broadcast %324 : vector<8x1xf32> to vector<8x24xf32>
    %326 = arith.divf %322, %325 : vector<8x24xf32>
    %cst_164 = arith.constant dense<0.000000e+00> : vector<8x16xf32>
    %327 = tpu.matmul %326, %316, %cst_164 {dimension_numbers = #tpu.dot_dimension_numbers<[1], [0], [0], [1], [0, 0, 1, 1], [], []>} : vector<8x24xf32>, vector<24x16xf32>, vector<8x16xf32> -> vector<8x16xf32>
    %c6 = arith.constant 6 : index
    %c0_165 = arith.constant 0 : index
    %c0_166 = arith.constant 0 : index
    %328 = vector.load %arg10[%c6, %c0_165, %c0_166] : memref<8x8x24xf32, #tpu.memory_space<vmem>>, vector<1x8x24xf32>
    %329 = vector.shape_cast %328 : vector<1x8x24xf32> to vector<8x24xf32>
    %330 = vector.shape_cast %326 : vector<8x24xf32> to vector<1x8x24xf32>
    tpu.vector_store %arg10[%c6, %c0_165, %c0_166], %330 {strides = array<i32>} : memref<8x8x24xf32, #tpu.memory_space<vmem>>, vector<1x8x24xf32>,
    %c2_167 = arith.constant 2 : index
    %c0_168 = arith.constant 0 : index
    %c0_169 = arith.constant 0 : index
    %331 = vector.load %arg3[%c2_167, %c0_168, %c0_169] : memref<4x32x16xf32, #tpu.memory_space<vmem>>, vector<1x32x16xf32>
    %332 = vector.shape_cast %331 : vector<1x32x16xf32> to vector<32x16xf32>
    %cst_170 = arith.constant dense<0.000000e+00> : vector<2x16xf32>
    %333 = tpu.matmul %26, %332, %cst_170 {dimension_numbers = #tpu.dot_dimension_numbers<[1], [0], [0], [1], [0, 0, 1, 1], [], []>} : vector<2x32xf32>, vector<32x16xf32>, vector<2x16xf32> -> vector<2x16xf32>
    %334 = vector.extract_strided_slice %316 {offsets = [8, 0], sizes = [8, 16], strides = [1, 1]} : vector<24x16xf32> to vector<8x16xf32>
    %cst_171 = arith.constant dense<0.000000e+00> : vector<8x8xf32>
    %335 = tpu.matmul %315, %334, %cst_171 {dimension_numbers = #tpu.dot_dimension_numbers<[1], [1], [0], [0], [0, 0, 1, 0], [], []>} : vector<8x16xf32>, vector<8x16xf32>, vector<8x8xf32> -> vector<8x8xf32>
    %cst_172 = arith.constant dense<0xFF800000> : vector<8xf32>
    %336 = vector.multi_reduction <maximumf>, %335, %cst_172 [1] : vector<8x8xf32> to vector<8xf32>
    %337 = vector.shape_cast %336 : vector<8xf32> to vector<8x1xf32>
    %338 = vector.broadcast %337 : vector<8x1xf32> to vector<8x8xf32>
    %339 = arith.subf %335, %338 : vector<8x8xf32>
    %340 = math.exp %339 : vector<8x8xf32>
    %cst_173 = arith.constant dense<0.000000e+00> : vector<8xf32>
    %341 = vector.multi_reduction <add>, %340, %cst_173 [1] : vector<8x8xf32> to vector<8xf32>
    %342 = vector.shape_cast %341 : vector<8xf32> to vector<8x1xf32>
    %343 = vector.broadcast %342 : vector<8x1xf32> to vector<8x8xf32>
    %344 = arith.divf %340, %343 : vector<8x8xf32>
    %cst_174 = arith.constant dense<0.000000e+00> : vector<8x16xf32>
    %345 = tpu.matmul %344, %334, %cst_174 {dimension_numbers = #tpu.dot_dimension_numbers<[1], [0], [0], [1], [0, 0, 1, 1], [], []>} : vector<8x8xf32>, vector<8x16xf32>, vector<8x16xf32> -> vector<8x16xf32>
    %cst_175 = arith.constant dense<0.000000e+00> : vector<8x2xf32>
    %346 = tpu.matmul %315, %333, %cst_175 {dimension_numbers = #tpu.dot_dimension_numbers<[1], [1], [0], [0], [0, 0, 1, 0], [], []>} : vector<8x16xf32>, vector<2x16xf32>, vector<8x2xf32> -> vector<8x2xf32>
    %cst_176 = arith.constant dense<0xFF800000> : vector<8xf32>
    %347 = vector.multi_reduction <maximumf>, %346, %cst_176 [1] : vector<8x2xf32> to vector<8xf32>
    %348 = vector.shape_cast %347 : vector<8xf32> to vector<8x1xf32>
    %349 = vector.broadcast %348 : vector<8x1xf32> to vector<8x2xf32>
    %350 = arith.subf %346, %349 : vector<8x2xf32>
    %351 = math.exp %350 : vector<8x2xf32>
    %cst_177 = arith.constant dense<0.000000e+00> : vector<8xf32>
    %352 = vector.multi_reduction <add>, %351, %cst_177 [1] : vector<8x2xf32> to vector<8xf32>
    %353 = vector.shape_cast %352 : vector<8xf32> to vector<8x1xf32>
    %354 = vector.broadcast %353 : vector<8x1xf32> to vector<8x2xf32>
    %355 = arith.divf %351, %354 : vector<8x2xf32>
    %cst_178 = arith.constant dense<0.000000e+00> : vector<8x16xf32>
    %356 = tpu.matmul %355, %333, %cst_178 {dimension_numbers = #tpu.dot_dimension_numbers<[1], [0], [0], [1], [0, 0, 1, 1], [], []>} : vector<8x2xf32>, vector<2x16xf32>, vector<8x16xf32> -> vector<8x16xf32>
    %357 = arith.subf %345, %356 : vector<8x16xf32>
    %cst_179 = arith.constant 0.000000e+00 : f32
    %358 = vector.broadcast %cst_179 : f32 to vector<8x16xf32>
    %359 = arith.select %32, %357, %358 : vector<8x16xi1>, vector<8x16xf32>
    %360 = arith.mulf %359, %359 : vector<8x16xf32>
    %361 = vector.shape_cast %360 : vector<8x16xf32> to vector<1x8x16xf32>
    %cst_180 = arith.constant dense<0.000000e+00> : vector<1xf32>
    %362 = vector.multi_reduction <add>, %361, %cst_180 [1, 2] : vector<1x8x16xf32> to vector<1xf32>
    %363 = vector.shape_cast %362 : vector<1xf32> to vector<1x1x1xf32>
    %364 = vector.extract %363[0, 0, 0] : f32 from vector<1x1x1xf32>
    %365 = arith.addf %314, %364 : f32
    %366 = tpu.concatenate %276, %327 in 0 : vector<8x16xf32>, vector<8x16xf32> -> vector<16x16xf32>
    %c2_181 = arith.constant 2 : index
    %c0_182 = arith.constant 0 : index
    %c0_183 = arith.constant 0 : index
    %367 = vector.load %arg4[%c2_181, %c0_182, %c0_183] : memref<4x16x32xf32, #tpu.memory_space<vmem>>, vector<1x16x32xf32>
    %368 = vector.shape_cast %367 : vector<1x16x32xf32> to vector<16x32xf32>
    %cst_184 = arith.constant dense<0.000000e+00> : vector<16x32xf32>
    %369 = tpu.matmul %366, %368, %cst_184 {dimension_numbers = #tpu.dot_dimension_numbers<[1], [0], [0], [1], [0, 0, 1, 1], [], []>} : vector<16x16xf32>, vector<16x32xf32>, vector<16x32xf32> -> vector<16x32xf32>
    %370 = arith.addf %257, %369 : vector<16x32xf32>
    %c3 = arith.constant 3 : index
    %c0_185 = arith.constant 0 : index
    %c0_186 = arith.constant 0 : index
    %371 = vector.load %arg2[%c3, %c0_185, %c0_186] : memref<4x32x16xf32, #tpu.memory_space<vmem>>, vector<1x32x16xf32>
    %372 = vector.shape_cast %371 : vector<1x32x16xf32> to vector<32x16xf32>
    %cst_187 = arith.constant dense<0.000000e+00> : vector<16x16xf32>
    %373 = tpu.matmul %9, %372, %cst_187 {dimension_numbers = #tpu.dot_dimension_numbers<[1], [0], [0], [1], [0, 0, 1, 1], [], []>} : vector<16x32xf32>, vector<32x16xf32>, vector<16x16xf32> -> vector<16x16xf32>
    %c3_188 = arith.constant 3 : index
    %c0_189 = arith.constant 0 : index
    %c0_190 = arith.constant 0 : index
    %374 = vector.load %arg3[%c3_188, %c0_189, %c0_190] : memref<4x32x16xf32, #tpu.memory_space<vmem>>, vector<1x32x16xf32>
    %375 = vector.shape_cast %374 : vector<1x32x16xf32> to vector<32x16xf32>
    %cst_191 = arith.constant dense<0.000000e+00> : vector<48x16xf32>
    %376 = tpu.matmul %4, %375, %cst_191 {dimension_numbers = #tpu.dot_dimension_numbers<[1], [0], [0], [1], [0, 0, 1, 1], [], []>} : vector<48x32xf32>, vector<32x16xf32>, vector<48x16xf32> -> vector<48x16xf32>
    %377 = vector.extract_strided_slice %373 {offsets = [0, 0], sizes = [8, 16], strides = [1, 1]} : vector<16x16xf32> to vector<8x16xf32>
    %378 = vector.extract_strided_slice %376 {offsets = [0, 0], sizes = [24, 16], strides = [1, 1]} : vector<48x16xf32> to vector<24x16xf32>
    %cst_192 = arith.constant dense<0.000000e+00> : vector<8x24xf32>
    %379 = tpu.matmul %377, %378, %cst_192 {dimension_numbers = #tpu.dot_dimension_numbers<[1], [1], [0], [0], [0, 0, 1, 0], [], []>} : vector<8x16xf32>, vector<24x16xf32>, vector<8x24xf32> -> vector<8x24xf32>
    %cst_193 = arith.constant dense<0xFF800000> : vector<8xf32>
    %380 = vector.multi_reduction <maximumf>, %379, %cst_193 [1] : vector<8x24xf32> to vector<8xf32>
    %381 = vector.shape_cast %380 : vector<8xf32> to vector<8x1xf32>
    %382 = vector.broadcast %381 : vector<8x1xf32> to vector<8x24xf32>
    %383 = arith.subf %379, %382 : vector<8x24xf32>
    %384 = math.exp %383 : vector<8x24xf32>
    %cst_194 = arith.constant dense<0.000000e+00> : vector<8xf32>
    %385 = vector.multi_reduction <add>, %384, %cst_194 [1] : vector<8x24xf32> to vector<8xf32>
    %386 = vector.shape_cast %385 : vector<8xf32> to vector<8x1xf32>
    %387 = vector.broadcast %386 : vector<8x1xf32> to vector<8x24xf32>
    %388 = arith.divf %384, %387 : vector<8x24xf32>
    %cst_195 = arith.constant dense<0.000000e+00> : vector<8x16xf32>
    %389 = tpu.matmul %388, %378, %cst_195 {dimension_numbers = #tpu.dot_dimension_numbers<[1], [0], [0], [1], [0, 0, 1, 1], [], []>} : vector<8x24xf32>, vector<24x16xf32>, vector<8x16xf32> -> vector<8x16xf32>
    %c3_196 = arith.constant 3 : index
    %c0_197 = arith.constant 0 : index
    %c0_198 = arith.constant 0 : index
    %390 = vector.load %arg10[%c3_196, %c0_197, %c0_198] : memref<8x8x24xf32, #tpu.memory_space<vmem>>, vector<1x8x24xf32>
    %391 = vector.shape_cast %390 : vector<1x8x24xf32> to vector<8x24xf32>
    %392 = vector.shape_cast %388 : vector<8x24xf32> to vector<1x8x24xf32>
    tpu.vector_store %arg10[%c3_196, %c0_197, %c0_198], %392 {strides = array<i32>} : memref<8x8x24xf32, #tpu.memory_space<vmem>>, vector<1x8x24xf32>,
    %c3_199 = arith.constant 3 : index
    %c0_200 = arith.constant 0 : index
    %c0_201 = arith.constant 0 : index
    %393 = vector.load %arg3[%c3_199, %c0_200, %c0_201] : memref<4x32x16xf32, #tpu.memory_space<vmem>>, vector<1x32x16xf32>
    %394 = vector.shape_cast %393 : vector<1x32x16xf32> to vector<32x16xf32>
    %cst_202 = arith.constant dense<0.000000e+00> : vector<2x16xf32>
    %395 = tpu.matmul %16, %394, %cst_202 {dimension_numbers = #tpu.dot_dimension_numbers<[1], [0], [0], [1], [0, 0, 1, 1], [], []>} : vector<2x32xf32>, vector<32x16xf32>, vector<2x16xf32> -> vector<2x16xf32>
    %396 = vector.extract_strided_slice %378 {offsets = [8, 0], sizes = [8, 16], strides = [1, 1]} : vector<24x16xf32> to vector<8x16xf32>
    %cst_203 = arith.constant dense<0.000000e+00> : vector<8x8xf32>
    %397 = tpu.matmul %377, %396, %cst_203 {dimension_numbers = #tpu.dot_dimension_numbers<[1], [1], [0], [0], [0, 0, 1, 0], [], []>} : vector<8x16xf32>, vector<8x16xf32>, vector<8x8xf32> -> vector<8x8xf32>
    %cst_204 = arith.constant dense<0xFF800000> : vector<8xf32>
    %398 = vector.multi_reduction <maximumf>, %397, %cst_204 [1] : vector<8x8xf32> to vector<8xf32>
    %399 = vector.shape_cast %398 : vector<8xf32> to vector<8x1xf32>
    %400 = vector.broadcast %399 : vector<8x1xf32> to vector<8x8xf32>
    %401 = arith.subf %397, %400 : vector<8x8xf32>
    %402 = math.exp %401 : vector<8x8xf32>
    %cst_205 = arith.constant dense<0.000000e+00> : vector<8xf32>
    %403 = vector.multi_reduction <add>, %402, %cst_205 [1] : vector<8x8xf32> to vector<8xf32>
    %404 = vector.shape_cast %403 : vector<8xf32> to vector<8x1xf32>
    %405 = vector.broadcast %404 : vector<8x1xf32> to vector<8x8xf32>
    %406 = arith.divf %402, %405 : vector<8x8xf32>
    %cst_206 = arith.constant dense<0.000000e+00> : vector<8x16xf32>
    %407 = tpu.matmul %406, %396, %cst_206 {dimension_numbers = #tpu.dot_dimension_numbers<[1], [0], [0], [1], [0, 0, 1, 1], [], []>} : vector<8x8xf32>, vector<8x16xf32>, vector<8x16xf32> -> vector<8x16xf32>
    %cst_207 = arith.constant dense<0.000000e+00> : vector<8x2xf32>
    %408 = tpu.matmul %377, %395, %cst_207 {dimension_numbers = #tpu.dot_dimension_numbers<[1], [1], [0], [0], [0, 0, 1, 0], [], []>} : vector<8x16xf32>, vector<2x16xf32>, vector<8x2xf32> -> vector<8x2xf32>
    %cst_208 = arith.constant dense<0xFF800000> : vector<8xf32>
    %409 = vector.multi_reduction <maximumf>, %408, %cst_208 [1] : vector<8x2xf32> to vector<8xf32>
    %410 = vector.shape_cast %409 : vector<8xf32> to vector<8x1xf32>
    %411 = vector.broadcast %410 : vector<8x1xf32> to vector<8x2xf32>
    %412 = arith.subf %408, %411 : vector<8x2xf32>
    %413 = math.exp %412 : vector<8x2xf32>
    %cst_209 = arith.constant dense<0.000000e+00> : vector<8xf32>
    %414 = vector.multi_reduction <add>, %413, %cst_209 [1] : vector<8x2xf32> to vector<8xf32>
    %415 = vector.shape_cast %414 : vector<8xf32> to vector<8x1xf32>
    %416 = vector.broadcast %415 : vector<8x1xf32> to vector<8x2xf32>
    %417 = arith.divf %413, %416 : vector<8x2xf32>
    %cst_210 = arith.constant dense<0.000000e+00> : vector<8x16xf32>
    %418 = tpu.matmul %417, %395, %cst_210 {dimension_numbers = #tpu.dot_dimension_numbers<[1], [0], [0], [1], [0, 0, 1, 1], [], []>} : vector<8x2xf32>, vector<2x16xf32>, vector<8x16xf32> -> vector<8x16xf32>
    %419 = arith.subf %407, %418 : vector<8x16xf32>
    %cst_211 = arith.constant 0.000000e+00 : f32
    %420 = vector.broadcast %cst_211 : f32 to vector<8x16xf32>
    %421 = arith.select %32, %419, %420 : vector<8x16xi1>, vector<8x16xf32>
    %422 = arith.mulf %421, %421 : vector<8x16xf32>
    %423 = vector.shape_cast %422 : vector<8x16xf32> to vector<1x8x16xf32>
    %cst_212 = arith.constant dense<0.000000e+00> : vector<1xf32>
    %424 = vector.multi_reduction <add>, %423, %cst_212 [1, 2] : vector<1x8x16xf32> to vector<1xf32>
    %425 = vector.shape_cast %424 : vector<1xf32> to vector<1x1x1xf32>
    %426 = vector.extract %425[0, 0, 0] : f32 from vector<1x1x1xf32>
    %427 = arith.addf %365, %426 : f32
    %428 = vector.extract_strided_slice %373 {offsets = [8, 0], sizes = [8, 16], strides = [1, 1]} : vector<16x16xf32> to vector<8x16xf32>
    %429 = vector.extract_strided_slice %376 {offsets = [24, 0], sizes = [24, 16], strides = [1, 1]} : vector<48x16xf32> to vector<24x16xf32>
    %cst_213 = arith.constant dense<0.000000e+00> : vector<8x24xf32>
    %430 = tpu.matmul %428, %429, %cst_213 {dimension_numbers = #tpu.dot_dimension_numbers<[1], [1], [0], [0], [0, 0, 1, 0], [], []>} : vector<8x16xf32>, vector<24x16xf32>, vector<8x24xf32> -> vector<8x24xf32>
    %cst_214 = arith.constant dense<0xFF800000> : vector<8xf32>
    %431 = vector.multi_reduction <maximumf>, %430, %cst_214 [1] : vector<8x24xf32> to vector<8xf32>
    %432 = vector.shape_cast %431 : vector<8xf32> to vector<8x1xf32>
    %433 = vector.broadcast %432 : vector<8x1xf32> to vector<8x24xf32>
    %434 = arith.subf %430, %433 : vector<8x24xf32>
    %435 = math.exp %434 : vector<8x24xf32>
    %cst_215 = arith.constant dense<0.000000e+00> : vector<8xf32>
    %436 = vector.multi_reduction <add>, %435, %cst_215 [1] : vector<8x24xf32> to vector<8xf32>
    %437 = vector.shape_cast %436 : vector<8xf32> to vector<8x1xf32>
    %438 = vector.broadcast %437 : vector<8x1xf32> to vector<8x24xf32>
    %439 = arith.divf %435, %438 : vector<8x24xf32>
    %cst_216 = arith.constant dense<0.000000e+00> : vector<8x16xf32>
    %440 = tpu.matmul %439, %429, %cst_216 {dimension_numbers = #tpu.dot_dimension_numbers<[1], [0], [0], [1], [0, 0, 1, 1], [], []>} : vector<8x24xf32>, vector<24x16xf32>, vector<8x16xf32> -> vector<8x16xf32>
    %c7 = arith.constant 7 : index
    %c0_217 = arith.constant 0 : index
    %c0_218 = arith.constant 0 : index
    %441 = vector.load %arg10[%c7, %c0_217, %c0_218] : memref<8x8x24xf32, #tpu.memory_space<vmem>>, vector<1x8x24xf32>
    %442 = vector.shape_cast %441 : vector<1x8x24xf32> to vector<8x24xf32>
    %443 = vector.shape_cast %439 : vector<8x24xf32> to vector<1x8x24xf32>
    tpu.vector_store %arg10[%c7, %c0_217, %c0_218], %443 {strides = array<i32>} : memref<8x8x24xf32, #tpu.memory_space<vmem>>, vector<1x8x24xf32>,
    %c3_219 = arith.constant 3 : index
    %c0_220 = arith.constant 0 : index
    %c0_221 = arith.constant 0 : index
    %444 = vector.load %arg3[%c3_219, %c0_220, %c0_221] : memref<4x32x16xf32, #tpu.memory_space<vmem>>, vector<1x32x16xf32>
    %445 = vector.shape_cast %444 : vector<1x32x16xf32> to vector<32x16xf32>
    %cst_222 = arith.constant dense<0.000000e+00> : vector<2x16xf32>
    %446 = tpu.matmul %26, %445, %cst_222 {dimension_numbers = #tpu.dot_dimension_numbers<[1], [0], [0], [1], [0, 0, 1, 1], [], []>} : vector<2x32xf32>, vector<32x16xf32>, vector<2x16xf32> -> vector<2x16xf32>
    %447 = vector.extract_strided_slice %429 {offsets = [8, 0], sizes = [8, 16], strides = [1, 1]} : vector<24x16xf32> to vector<8x16xf32>
    %cst_223 = arith.constant dense<0.000000e+00> : vector<8x8xf32>
    %448 = tpu.matmul %428, %447, %cst_223 {dimension_numbers = #tpu.dot_dimension_numbers<[1], [1], [0], [0], [0, 0, 1, 0], [], []>} : vector<8x16xf32>, vector<8x16xf32>, vector<8x8xf32> -> vector<8x8xf32>
    %cst_224 = arith.constant dense<0xFF800000> : vector<8xf32>
    %449 = vector.multi_reduction <maximumf>, %448, %cst_224 [1] : vector<8x8xf32> to vector<8xf32>
    %450 = vector.shape_cast %449 : vector<8xf32> to vector<8x1xf32>
    %451 = vector.broadcast %450 : vector<8x1xf32> to vector<8x8xf32>
    %452 = arith.subf %448, %451 : vector<8x8xf32>
    %453 = math.exp %452 : vector<8x8xf32>
    %cst_225 = arith.constant dense<0.000000e+00> : vector<8xf32>
    %454 = vector.multi_reduction <add>, %453, %cst_225 [1] : vector<8x8xf32> to vector<8xf32>
    %455 = vector.shape_cast %454 : vector<8xf32> to vector<8x1xf32>
    %456 = vector.broadcast %455 : vector<8x1xf32> to vector<8x8xf32>
    %457 = arith.divf %453, %456 : vector<8x8xf32>
    %cst_226 = arith.constant dense<0.000000e+00> : vector<8x16xf32>
    %458 = tpu.matmul %457, %447, %cst_226 {dimension_numbers = #tpu.dot_dimension_numbers<[1], [0], [0], [1], [0, 0, 1, 1], [], []>} : vector<8x8xf32>, vector<8x16xf32>, vector<8x16xf32> -> vector<8x16xf32>
    %cst_227 = arith.constant dense<0.000000e+00> : vector<8x2xf32>
    %459 = tpu.matmul %428, %446, %cst_227 {dimension_numbers = #tpu.dot_dimension_numbers<[1], [1], [0], [0], [0, 0, 1, 0], [], []>} : vector<8x16xf32>, vector<2x16xf32>, vector<8x2xf32> -> vector<8x2xf32>
    %cst_228 = arith.constant dense<0xFF800000> : vector<8xf32>
    %460 = vector.multi_reduction <maximumf>, %459, %cst_228 [1] : vector<8x2xf32> to vector<8xf32>
    %461 = vector.shape_cast %460 : vector<8xf32> to vector<8x1xf32>
    %462 = vector.broadcast %461 : vector<8x1xf32> to vector<8x2xf32>
    %463 = arith.subf %459, %462 : vector<8x2xf32>
    %464 = math.exp %463 : vector<8x2xf32>
    %cst_229 = arith.constant dense<0.000000e+00> : vector<8xf32>
    %465 = vector.multi_reduction <add>, %464, %cst_229 [1] : vector<8x2xf32> to vector<8xf32>
    %466 = vector.shape_cast %465 : vector<8xf32> to vector<8x1xf32>
    %467 = vector.broadcast %466 : vector<8x1xf32> to vector<8x2xf32>
    %468 = arith.divf %464, %467 : vector<8x2xf32>
    %cst_230 = arith.constant dense<0.000000e+00> : vector<8x16xf32>
    %469 = tpu.matmul %468, %446, %cst_230 {dimension_numbers = #tpu.dot_dimension_numbers<[1], [0], [0], [1], [0, 0, 1, 1], [], []>} : vector<8x2xf32>, vector<2x16xf32>, vector<8x16xf32> -> vector<8x16xf32>
    %470 = arith.subf %458, %469 : vector<8x16xf32>
    %cst_231 = arith.constant 0.000000e+00 : f32
    %471 = vector.broadcast %cst_231 : f32 to vector<8x16xf32>
    %472 = arith.select %32, %470, %471 : vector<8x16xi1>, vector<8x16xf32>
    %473 = arith.mulf %472, %472 : vector<8x16xf32>
    %474 = vector.shape_cast %473 : vector<8x16xf32> to vector<1x8x16xf32>
    %cst_232 = arith.constant dense<0.000000e+00> : vector<1xf32>
    %475 = vector.multi_reduction <add>, %474, %cst_232 [1, 2] : vector<1x8x16xf32> to vector<1xf32>
    %476 = vector.shape_cast %475 : vector<1xf32> to vector<1x1x1xf32>
    %477 = vector.extract %476[0, 0, 0] : f32 from vector<1x1x1xf32>
    %478 = arith.addf %427, %477 : f32
    %479 = tpu.concatenate %389, %440 in 0 : vector<8x16xf32>, vector<8x16xf32> -> vector<16x16xf32>
    %c3_233 = arith.constant 3 : index
    %c0_234 = arith.constant 0 : index
    %c0_235 = arith.constant 0 : index
    %480 = vector.load %arg4[%c3_233, %c0_234, %c0_235] : memref<4x16x32xf32, #tpu.memory_space<vmem>>, vector<1x16x32xf32>
    %481 = vector.shape_cast %480 : vector<1x16x32xf32> to vector<16x32xf32>
    %cst_236 = arith.constant dense<0.000000e+00> : vector<16x32xf32>
    %482 = tpu.matmul %479, %481, %cst_236 {dimension_numbers = #tpu.dot_dimension_numbers<[1], [0], [0], [1], [0, 0, 1, 1], [], []>} : vector<16x16xf32>, vector<16x32xf32>, vector<16x32xf32> -> vector<16x32xf32>
    %483 = arith.addf %370, %482 : vector<16x32xf32>
    %c0_237 = arith.constant 0 : index
    %c0_238 = arith.constant 0 : index
    %484 = vector.load %arg5[%c0_237, %c0_238] : memref<1x32xf32, #tpu.memory_space<vmem>>, vector<1x32xf32>
    %485 = vector.broadcast %484 : vector<1x32xf32> to vector<16x32xf32>
    %486 = arith.addf %483, %485 : vector<16x32xf32>
    %487 = vector.extract_strided_slice %486 {offsets = [0, 0], sizes = [8, 32], strides = [1, 1]} : vector<16x32xf32> to vector<8x32xf32>
    %c0_239 = arith.constant 0 : index
    %c0_240 = arith.constant 0 : index
    %c0_241 = arith.constant 0 : index
    %488 = vector.load %arg9[%c0_239, %c0_240, %c0_241] : memref<2x8x32xf32, #tpu.memory_space<vmem>>, vector<1x8x32xf32>
    %489 = vector.shape_cast %488 : vector<1x8x32xf32> to vector<8x32xf32>
    %490 = vector.shape_cast %487 : vector<8x32xf32> to vector<1x8x32xf32>
    tpu.vector_store %arg9[%c0_239, %c0_240, %c0_241], %490 {strides = array<i32>} : memref<2x8x32xf32, #tpu.memory_space<vmem>>, vector<1x8x32xf32>,
    %491 = vector.extract_strided_slice %486 {offsets = [8, 0], sizes = [8, 32], strides = [1, 1]} : vector<16x32xf32> to vector<8x32xf32>
    %c1_242 = arith.constant 1 : index
    %c0_243 = arith.constant 0 : index
    %c0_244 = arith.constant 0 : index
    %492 = vector.load %arg9[%c1_242, %c0_243, %c0_244] : memref<2x8x32xf32, #tpu.memory_space<vmem>>, vector<1x8x32xf32>
    %493 = vector.shape_cast %492 : vector<1x8x32xf32> to vector<8x32xf32>
    %494 = vector.shape_cast %491 : vector<8x32xf32> to vector<1x8x32xf32>
    tpu.vector_store %arg9[%c1_242, %c0_243, %c0_244], %494 {strides = array<i32>} : memref<2x8x32xf32, #tpu.memory_space<vmem>>, vector<1x8x32xf32>,
    %495 = vector.broadcast %478 : f32 to vector<1x1xf32>
    %c0_245 = arith.constant 0 : index
    %c0_246 = arith.constant 0 : index
    %c0_247 = arith.constant 0 : index
    %496 = vector.load %arg12[%c0_245, %c0_246, %c0_247] : memref<1x1x1xf32, #tpu.memory_space<vmem>>, vector<1x1x1xf32>
    %497 = vector.shape_cast %496 : vector<1x1x1xf32> to vector<1x1xf32>
    %498 = vector.shape_cast %495 : vector<1x1xf32> to vector<1x1x1xf32>
    tpu.vector_store %arg12[%c0_245, %c0_246, %c0_247], %498 {strides = array<i32>} : memref<1x1x1xf32, #tpu.memory_space<vmem>>, vector<1x1x1xf32>,
    return
  }
  func.func @transform_0(%arg0: i32) -> (i32, i32, i32) {
    %c0_i32 = arith.constant 0 : i32
    %c0_i32_0 = arith.constant 0 : i32
    %c0_i32_1 = arith.constant 0 : i32
    return %arg0, %c0_i32, %c0_i32_0 : i32, i32, i32
  }
  func.func @transform_1(%arg0: i32) -> (i32, i32, i32) {
    %c0_i32 = arith.constant 0 : i32
    %c0_i32_0 = arith.constant 0 : i32
    %c0_i32_1 = arith.constant 0 : i32
    %c0_i32_2 = arith.constant 0 : i32
    return %c0_i32, %c0_i32_0, %c0_i32_1 : i32, i32, i32
  }
  func.func @transform_2(%arg0: i32) -> (i32, i32, i32) {
    %c0_i32 = arith.constant 0 : i32
    %c0_i32_0 = arith.constant 0 : i32
    %c0_i32_1 = arith.constant 0 : i32
    %c0_i32_2 = arith.constant 0 : i32
    return %c0_i32, %c0_i32_0, %c0_i32_1 : i32, i32, i32
  }
  func.func @transform_3(%arg0: i32) -> (i32, i32, i32) {
    %c0_i32 = arith.constant 0 : i32
    %c0_i32_0 = arith.constant 0 : i32
    %c0_i32_1 = arith.constant 0 : i32
    %c0_i32_2 = arith.constant 0 : i32
    return %c0_i32, %c0_i32_0, %c0_i32_1 : i32, i32, i32
  }
  func.func @transform_4(%arg0: i32) -> (i32, i32) {
    %c0_i32 = arith.constant 0 : i32
    %c0_i32_0 = arith.constant 0 : i32
    %c0_i32_1 = arith.constant 0 : i32
    return %c0_i32, %c0_i32_0 : i32, i32
  }
  func.func @transform_5(%arg0: i32) -> (i32, i32, i32) {
    %c0_i32 = arith.constant 0 : i32
    %c0_i32_0 = arith.constant 0 : i32
    %c0_i32_1 = arith.constant 0 : i32
    return %arg0, %c0_i32, %c0_i32_0 : i32, i32, i32
  }
  func.func @transform_6(%arg0: i32) -> (i32, i32) {
    %c0_i32 = arith.constant 0 : i32
    %c0_i32_0 = arith.constant 0 : i32
    %c0_i32_1 = arith.constant 0 : i32
    return %c0_i32, %c0_i32_0 : i32, i32
  }
  func.func @transform_7(%arg0: i32) -> (i32, i32) {
    %c0_i32 = arith.constant 0 : i32
    %c0_i32_0 = arith.constant 0 : i32
    %c0_i32_1 = arith.constant 0 : i32
    return %c0_i32, %c0_i32_0 : i32, i32
  }
  func.func @transform_8(%arg0: i32) -> (i32, i32, i32) {
    %c0_i32 = arith.constant 0 : i32
    %c0_i32_0 = arith.constant 0 : i32
    %c0_i32_1 = arith.constant 0 : i32
    return %arg0, %c0_i32, %c0_i32_0 : i32, i32, i32
  }
  func.func @transform_9(%arg0: i32) -> (i32, i32, i32) {
    %c0_i32 = arith.constant 0 : i32
    %c0_i32_0 = arith.constant 0 : i32
    %c0_i32_1 = arith.constant 0 : i32
    return %arg0, %c0_i32, %c0_i32_0 : i32, i32, i32
  }
  func.func @transform_10(%arg0: i32) -> (i32, i32, i32) {
    %c0_i32 = arith.constant 0 : i32
    %c0_i32_0 = arith.constant 0 : i32
    %c0_i32_1 = arith.constant 0 : i32
    return %arg0, %c0_i32, %c0_i32_0 : i32, i32, i32
  }
  func.func @transform_11(%arg0: i32) -> (i32, i32, i32) {
    %c0_i32 = arith.constant 0 : i32
    %c0_i32_0 = arith.constant 0 : i32
    %c0_i32_1 = arith.constant 0 : i32
    return %arg0, %c0_i32, %c0_i32_0 : i32, i32, i32
  }
}

</mosaic_0001>

<bundles_post_ra>
// kernel: memory_self_attention_forward.1
= control target key start
LH: loop header
LB: loop body
LE: loop exit
PB: predicated region body
PF: predicated region fallthrough
CT: control target
= control target key end

     0   :  { %17 = vsyncpa [#allocation3], 0  ;;  %v7472_v3 = vmov 0.0|0.0   ;;  %vm7473_vm0 = vmmov 0   ;;  %v7474_v6 = vmov 0.0   ;;  %s8519_s0 = inlined_call_operand.vmem [shape: f32[2,24,32], index: 0, kind: input, shape index: {}]   ;;  %s8520_s1 = inlined_call_operand.vmem [shape: f32[4,32,16], index: 1, kind: input, shape index: {}]   ;;  %s8521_s2 = inlined_call_operand.vmem [shape: f32[4,32,16], index: 2, kind: input, shape index: {}]   ;;  %s8522_s3 = inlined_call_operand.vmem [shape: f32[4,16,32], index: 3, kind: input, shape index: {}]   ;;  %s8523_s4 = inlined_call_operand.vmem [shape: f32[1,32], index: 4, kind: input, shape index: {}]   ;;  %s8524_s5 = inlined_call_operand.vmem [shape: f32[2,2,128], index: 5, kind: input, shape index: {}]   ;;  %s8525_s6 = inlined_call_operand.vmem [shape: f32[128,32], index: 6, kind: input, shape index: {}]   ;;  %s8526_s7 = inlined_call_operand.vmem [shape: f32[1,32], index: 7, kind: input, shape index: {}]   ;;  %s8527_s8 = inlined_call_operand.hbm [shape: f32[2,8,32], index: 8, kind: output, shape index: {0}]   ;;  %s8528_s9 = inlined_call_operand.hbm [shape: f32[8,8,24], index: 9, kind: output, shape index: {1}]   ;;  %s8529_s10 = inlined_call_operand.vmem [shape: f32[2,2,32], index: 10, kind: output, shape index: {2}]   ;;  %s8530_s11 = inlined_call_operand.hbm [shape: f32[1,1,1], index: 11, kind: output, shape index: {3}]  }
   0x1   :  { %v142_v0 = vld [vmem:[%s8525_s6] sm:$0xff]  ;;  %v143_v1 = vld [vmem:[%s8525_s6 + $0x8] sm:$0xff]  ;;  %v144_v2 = vld [vmem:[%s8525_s6 + $0x10] sm:$0xff]  ;;  %7062 = vmatprep.subr.bf16.mxu1 %v7472_v3  ;;  %7038 = vmatprep.subr.bf16.mxu0 %v7472_v3 }
   0x2   :  { %v7063_v4 = vpack.c.bf16 %v143_v1, %v142_v0  ;;  %v145_v5 = vld [vmem:[%s8525_s6 + $0x18] sm:$0xff]  ;;  %6503 = vmatprep.mubr.msk.f32.mxu1 %vm7473_vm0, %v7474_v6  ;;  %6468 = vmatprep.mubr.msk.f32.mxu0 %vm7473_vm0, %v7474_v6  ;;  %v146_v8 = vld [vmem:[%s8525_s6 + $0x20] sm:$0xff]  ;;  %v147_v9 = vld [vmem:[%s8525_s6 + $0x28] sm:$0xff] }
   0x3   :  { %v7066_v7 = vpack.c.bf16 %v145_v5, %v144_v2  ;;  %v7069_v10 = vpack.c.bf16 %v147_v9, %v146_v8  ;;  %v148_v11 = vld [vmem:[%s8525_s6 + $0x30] sm:$0xff]  ;;  %v149_v12 = vld [vmem:[%s8525_s6 + $0x38] sm:$0xff] }
   0x4   :  { %7064 = vmatpush3.bf16.msra.mxu1 %v7063_v4  ;;  %7040 = vmatpush3.bf16.msra.mxu0 %v7063_v4  ;;  %v7072_v13 = vpack.c.bf16 %v149_v12, %v148_v11 }
   0x5   :  { %7065 = vmatprep.subr.bf16.mxu1 %v7472_v3  ;;  %7041 = vmatprep.subr.bf16.mxu0 %v7472_v3 }
   0x8   :  { %7067 = vmatpush3.bf16.msra.mxu1 %v7066_v7  ;;  %7043 = vmatpush3.bf16.msra.mxu0 %v7066_v7 }
   0x9   :  { %7068 = vmatprep.subr.bf16.mxu1 %v7472_v3  ;;  %7044 = vmatprep.subr.bf16.mxu0 %v7472_v3 }
   0xc   :  { %7070 = vmatpush3.bf16.msra.mxu1 %v7069_v10  ;;  %7046 = vmatpush3.bf16.msra.mxu0 %v7069_v10 }
   0xd   :  { %18 = vsyncpa [#allocation5], 0  ;;  %7071 = vmatprep.subr.bf16.mxu1 %v7472_v3  ;;  %v150_v14 = vld [vmem:[%s8525_s6 + $0x40] sm:$0xff]  ;;  %v151_v15 = vld [vmem:[%s8525_s6 + $0x48] sm:$0xff]  ;;  %7047 = vmatprep.subr.bf16.mxu0 %v7472_v3  ;;  %vm244_vm1 = vcmask 261120   ;;  %vm138_vm2 = vcmask 254976  }
   0xe   :  { %v7075_v16 = vpack.c.bf16 %v151_v15, %v150_v14  ;;  %v152_v17 = vld [vmem:[%s8525_s6 + $0x50] sm:$0xff]  ;;  %v153_v18 = vld [vmem:[%s8525_s6 + $0x58] sm:$0xff]  ;;  %v154_v20 = vld [vmem:[%s8525_s6 + $0x60] sm:$0xff]  ;;  %vm443_vm3 = vcmask 130048   ;;  %vm526_vm5 = vcmask 195584   ;;  %vm759_vm6 = vcmask 64512  }
   0xf   :  { %v7078_v19 = vpack.c.bf16 %v153_v18, %v152_v17  ;;  %v155_v21 = vld [vmem:[%s8525_s6 + $0x68] sm:$0xff]  ;;  %v156_v23 = vld [vmem:[%s8525_s6 + $0x70] sm:$0xff]  ;;  %v157_v24 = vld [vmem:[%s8525_s6 + $0x78] sm:$0xff]  ;;  %vm917_vm7 = vcmask 15360   ;;  %vm932_vm8 = vcmask 1041408   ;;  %s7475_s30 = smov [#allocation4]  }
  0x10   :  { %7073 = vmatpush3.bf16.msra.mxu1 %v7072_v13  ;;  %7049 = vmatpush3.bf16.msra.mxu0 %v7072_v13  ;;  %v7081_v22 = vpack.c.bf16 %v155_v21, %v154_v20  ;;  %v326_v25 = vld [vmem:[%s8521_s2] sm:$0xff]  ;;  %v327_v26 = vld [vmem:[%s8521_s2 + $0x8] sm:$0xff]  ;;  %v7084_v29 = vpack.c.bf16 %v157_v24, %v156_v23  ;;  %v328_v32 = vld [vmem:[%s8521_s2 + $0x10] sm:$0xff]  ;;  %s5916_s12 = sshll.u32 %s7475_s30, 4  ;;  %s7476_s13 = smov [#allocation2]   ;;  %s5917_s12 = int_to_ptr.vmem [resolvable:$true] %s5916_s12 }
  0x11   :  { %7074 = vmatprep.subr.bf16.mxu1 %v7472_v3  ;;  %7050 = vmatprep.subr.bf16.mxu0 %v7472_v3  ;;  %v240_v27 = vld [vmem:[%s8520_s1] sm:$0xff]  ;;  %v241_v28 = vld [vmem:[%s8520_s1 + $0x8] sm:$0xff]  ;;  %v7619_v30 = vpack.c.bf16 %v327_v26, %v326_v25  ;;  %v329_v33 = vld [vmem:[%s8521_s2 + $0x18] sm:$0xff]  ;;  %s7402_s14 = scalar_lea.vmem %s5917_s12, 1024  ;;  %p7407_p1 = scmp.lt.s32.totalorder %s5917_s12, %s5917_s12 }
  0x12   :  { %v7086_v31 = vpack.c.bf16 %v241_v28, %v240_v27  ;;  %v242_v34 = vld [vmem:[%s8520_s1 + $0x10] sm:$0xff]  ;;  %v243_v35 = vld [vmem:[%s8520_s1 + $0x18] sm:$0xff]  ;;  %v5952_v36 = vld [vmem:[%s8524_s5 + $0x2] sm:$0x3]  ;;  %v7641_v38 = vpack.c.bf16 %v329_v33, %v328_v32  ;;  %p7403_p0 = scmp.ne.s32.totalorder %s5917_s12, %s7402_s14  ;;  %p7408_p2 = scmp.lt.s32.totalorder %s7402_s14, %s7402_s14 }
  0x13   :  { %v44_v37 = vld [vmem:[%s8524_s5] sm:$0x3]  ;;  %v7651_v40 = vld [vmem:[%s8519_s0 + $0x10] sm:$0xff]  ;;  %v7090_v41 = vpack.c.bf16 %v243_v35, %v242_v34  ;;  %v7665_v43 = vld [vmem:[%s8519_s0 + $0x28] sm:$0xff] }
  0x14   :  { %7076 = vmatpush3.bf16.msra.mxu1 %v7075_v16  ;;  %7052 = vmatpush3.bf16.msra.mxu0 %v7075_v16  ;;  %v7646_v39 = vld [vmem:[%s8519_s0] sm:$0xff]  ;;  %v7654_v42 = vmul.f32 0.35355338, %v7651_v40  ;;  %v7671_v44 = vld [vmem:[%s8519_s0 + $0x8] sm:$0xff]  ;;  %v7674_v45 = vmul.f32 0.35355338, %v7665_v43  ;;  %vm7723_vm4 = vmpackc.low %vm443_vm3, %vm443_vm3  ;;  %p7409_p3 = por %p7408_p2, %p7407_p1 }
  0x15   :  { %7077 = vmatprep.subr.bf16.mxu1 %v7472_v3  ;;  %7053 = vmatprep.subr.bf16.mxu0 %v7472_v3  ;;  %v7685_v46 = vld [vmem:[%s8519_s0 + $0x18] sm:$0xff]  ;;  %v7692_v47 = vld [vmem:[%s8519_s0 + $0x20] sm:$0xff] }
  0x16   :  { %v5953_v48 = vld [vmem:[%s8526_s7] ss:$0 sm:$0xff]  ;;  %p7410_p4 = pnand %p7409_p3, %p7403_p0 }
  0x18   :  { %7079 = vmatpush3.bf16.msra.mxu1 %v7078_v19  ;;  %7055 = vmatpush3.bf16.msra.mxu0 %v7078_v19 }
  0x19   :  { %7080 = vmatprep.subr.bf16.mxu1 %v7472_v3  ;;  %7056 = vmatprep.subr.bf16.mxu0 %v7472_v3 }
  0x1c   :  { %7082 = vmatpush3.bf16.msra.mxu1 %v7081_v22  ;;  %7058 = vmatpush3.bf16.msra.mxu0 %v7081_v22 }
  0x1d   :  { %7083 = vmatprep.subr.bf16.mxu1 %v7472_v3  ;;  %7059 = vmatprep.subr.bf16.mxu0 %v7472_v3 }
  0x20   :  { %7085 = vmatpush3.bf16.msra.mxu1 %v7084_v29  ;;  %7061 = vmatpush3.bf16.msra.mxu0 %v7084_v29 }
  0x21   :  { %7095 = vmatprep.subr.bf16.mxu1 %v7619_v30  ;;  %7087 = vmatprep.subr.bf16.mxu0 %v7086_v31 }
  0x23   :  { %6504 = vmatmul.mubr.f32.vlgmr.msra.gmra.mrb[0].mxu1 %v5952_v36  ;;  %6469 = vmatmul.mubr.f32.vlgmr.msra.gmra.mrb[0].mxu0 %v44_v37 }
  0x24   :  { %7097 = vmatpush3.bf16.msra.mxu1 %v7619_v30  ;;  %6525 = vmatprep.mubr.msk.f32.mxu1 %vm244_vm1, %v7646_v39 }
  0x25   :  { %7099 = vmatprep.subr.bf16.mxu1 %v7641_v38  ;;  %7089 = vmatpush3.bf16.msra.mxu0 %v7086_v31 }
  0x26   :  { %7091 = vmatprep.subr.bf16.mxu0 %v7090_v41  ;;  %6514 = vmatprep.mubr.msk.f32.mxu0 %vm244_vm1, %v7654_v42 }
  0x28   :  { %7101 = vmatpush3.bf16.msra.mxu1 %v7641_v38 }
  0x29   :  { %7093 = vmatpush3.bf16.msra.mxu0 %v7090_v41  ;;  %7106 = vmatprep.subr.bf16.mxu1 %v7472_v3 }
  0x2a   :  { %7102 = vmatprep.subr.bf16.mxu0 %v7472_v3 }
  0x2b   :  { %6526 = vmatmul.mubr.msk.f32.vlgmr.msra.gmra.mrb[2].mxu1 %vm244_vm1, %v7671_v44 }
  0x2c   :  { %6528 = vmatprep.mubr.msk.f32.mxu1 %vm244_vm1, %v7651_v40  ;;  %6515 = vmatmul.mubr.msk.f32.vlgmr.msra.gmra.mrb[2].mxu0 %vm244_vm1, %v7674_v45 }
  0x2d   :  { %6540 = vmatprep.mubr.msk.f32.mxu0 %vm7473_vm0, %v7474_v6 }
  0x2f   :  { %6529 = vmatmul.mubr.msk.f32.gmra.mrb[4].mxu1 %vm244_vm1, %v7685_v46 }
  0x30   :  { %6531 = vmatprep.mubr.msk.f32.mxu1 %vm244_vm1, %v7692_v47 }
  0x33   :  { %6532 = vmatmul.mubr.msk.f32.gmra.mrb[6].mxu1 %vm244_vm1, %v7665_v43 }
  0x34   :  { %6549 = vmatprep.mubr.msk.f32.mxu1 %vm7473_vm0, %v7474_v6 }
  0xf6   :  { %v231_v49 = vpop.f32.mrb[0].mxu1  ;;  %v134_v50 = vpop.f32.mrb[0].mxu0 }
  0xf7   :  { %v7707_v51 = vadd.f32 %v5953_v48, %v231_v49  ;;  %v6505_v52 = vpop.f32.mrb[1].mxu1  ;;  %v7709_v53 = vadd.f32 %v5953_v48, %v134_v50  ;;  %v6470_v54 = vpop.f32.mrb[1].mxu0 }
  0xf9   :  { %5954 = vst.msk [vmem:[%s8529_s10 + $0x2] sm:$0x3] %vm138_vm2, %v7707_v51  ;;  %139 = vst.msk [vmem:[%s8529_s10] sm:$0x3] %vm138_vm2, %v7709_v53 }
  0xfe   :  { %v7719_v55 = vpop.f32.mrb[2].mxu1 }
  0xff   :  { %v414_v56 = vpop.f32.mrb[3].mxu1  ;;  %v7727_v58 = vpop.f32.mrb[2].mxu0 }
 0x100   :  { %v7103_v59 = vpack.c.bf16 %v7719_v55, %v414_v56  ;;  %v317_v60 = vpop.f32.mrb[3].mxu0 }
 0x102   :  { %7105 = vmatpush3.bf16.xpose.msk.msra.mxu0 %vm7723_vm4, %v7103_v59  ;;  %7108 = vmatpush3.bf16.msra.mxu1 %v7103_v59  ;;  %v6530_v61 = vpop.f32.mrb[4].mxu1 }
 0x103   :  { %v424_v62 = vpop.f32.mrb[5].mxu1  ;;  %6547 = vmatprep.subr.mxu1 %v7474_v6  ;;  %6538 = vmatprep.subr.mxu0 %v7474_v6 }
 0x106   :  { %v7734_v63 = vpop.f32.mrb[6].mxu1  ;;  %6548 = vmatpush3.msra.mxu1 %v424_v62 }
 0x107   :  { %v7736_v0 = vpop.f32.mrb[7].mxu1  ;;  %6568 = vmatprep.subr.mxu1 %v7474_v6 }
 0x108   :  { %v7740_v1 = vpack.c.bf16 %v7736_v0, %v6530_v61 }
 0x10a   :  { %6539 = vmatpush3.xpose.msk.msra.mxu0 %vm443_vm3, %v424_v62 }
 0x10b   :  { %7109 = vmatprep.subr.bf16.mxu0 %v7472_v3 }
 0x10d   :  { %6541 = vmatmul.mubr.msk.f32.vlgmr.msra.gmra.mrb[4].mxu0 %vm443_vm3, %v317_v60 }
 0x10e   :  { %7111 = vmatpush3.bf16.msra.mxu0 %v7619_v30  ;;  %6560 = vmatprep.mubr.msk.f32.mxu0 %vm7473_vm0, %v7474_v6 }
 0x10f   :  { %7112 = vmatprep.subr.bf16.mxu0 %v7472_v3 }
 0x112   :  { %7114 = vmatpush3.bf16.msra.mxu0 %v7641_v38 }
 0x113   :  { %6563 = vmatprep.subr.mxu0 %v7474_v6 }
 0x115   :  { %6561 = vmatmul.mubr.msk.f32.vlgmr.msra.gmra.mrb[6].mxu0 %vm244_vm1, %v7709_v53 }
 0x116   :  { %6565 = vmatprep.mubr.msk.f32.mxu0 %vm7473_vm0, %v7474_v6 }
 0x11b   :  { %6564 = vmatpush3.xpose.msk.msra.mxu0 %vm443_vm3, %v7719_v55 }
 0x11c   :  { %6573 = vmatprep.subr.mxu0 %v7474_v6 }
 0x11e   :  { %6566 = vmatmul.mubr.msk.f32.vlgmr.msra.gmra.mrb[8].mxu0 %vm443_vm3, %v317_v60 }
 0x11f   :  { %6575 = vmatprep.mubr.msk.f32.mxu0 %vm7473_vm0, %v7474_v6 }
 0x1e0   :  { %v522_v2 = vpop.f32.mrb[4].mxu0 }
 0x1e1   :  { %v6542_v4 = vpop.f32.mrb[5].mxu0  ;;  %v527_v5 = vsel %vm526_vm5, %v522_v2, -inf }
 0x1e2   :  { %528 = vmax.xlane.f32.xlu0 %v527_v5 }
 0x1e8   :  { %v7762_v7 = vpop.f32.mrb[6].mxu0 }
 0x1e9   :  { %v6562_v8 = vpop.f32.mrb[7].mxu0  ;;  %6574 = vmatpush3.xpose.msk.msra.mxu0 %vm443_vm3, %v7762_v7 }
 0x1ea   :  { %7115 = vmatprep.subr.bf16.mxu0 %v7472_v3 }
 0x1ec   :  { %6576 = vmatmul.mubr.msk.f32.vlgmr.msra.gmra.mrb[10].mxu0 %vm443_vm3, %v317_v60 }
 0x1ed   :  { %7118 = vmatpush3.bf16.xpose.msk.msra.mxu0 %vm7723_vm4, %v7740_v1  ;;  %6589 = vmatprep.mubr.msk.f32.mxu0 %vm7473_vm0, %v7474_v6 }
 0x1ee   :  { %6587 = vmatprep.subr.mxu0 %v7474_v6 }
 0x1f1   :  { %v755_v9 = vpop.f32.mrb[8].mxu0 }
 0x1f2   :  { %v6567_v10 = vpop.f32.mrb[9].mxu0  ;;  %v760_v11 = vsel %vm759_vm6, %v755_v9, -inf }
 0x1f3   :  { %761 = vmax.xlane.f32.xlu0 %v760_v11 }
 0x1f5   :  { %6588 = vmatpush3.xpose.msk.msra.mxu0 %vm443_vm3, %v7734_v63 }
 0x1f6   :  { %6612 = vmatprep.subr.mxu0 %v7474_v6 }
 0x1f8   :  { %6590 = vmatmul.mubr.msk.f32.vlgmr.msra.gmra.mrb[12].mxu0 %vm443_vm3, %v7727_v58 }
 0x1f9   :  { %6613 = vmatpush3.xpose.msk.msra.mxu0 %vm443_vm3, %v7736_v0  ;;  %6614 = vmatprep.mubr.msk.f32.mxu0 %vm7473_vm0, %v7474_v6 }
 0x1fa   :  { %6622 = vmatprep.subr.mxu0 %v7474_v6 }
 0x1fc   :  { %6615 = vmatmul.mubr.msk.f32.vlgmr.msra.gmra.mrb[14].mxu0 %vm443_vm3, %v7727_v58 }
 0x1fd   :  { %6624 = vmatprep.mubr.msk.f32.mxu0 %vm7473_vm0, %v7474_v6 }
 0x26f   :  { %v529_v12 = vpop.xlane.xlu0 %528 }
 0x270   :  { %v530_v13 = vsub.f32 %v522_v2, %v529_v12 }
 0x272   :  { %v531_v14 = vmul.f32 1.442695, %v530_v13 }
 0x274   :  { %7300 = vpow2.f32 %v531_v14 }
 0x27e   :  { %v7301_v15 = vpop.eup %7300 }
 0x27f   :  { %v533_v16 = vsel %vm526_vm5, %v7301_v15, 0.0 }
 0x280   :  { %534 = vadd.xlane.f32.xlu0 %v533_v16  ;;  %v762_v17 = vpop.xlane.xlu0 %761 }
 0x281   :  { %v763_v18 = vsub.f32 %v755_v9, %v762_v17 }
 0x283   :  { %v764_v19 = vmul.f32 1.442695, %v763_v18 }
 0x285   :  { %7302 = vpow2.f32 %v764_v19 }
 0x28f   :  { %v7303_v26 = vpop.eup %7302 }
 0x290   :  { %v766_v29 = vsel %vm759_vm6, %v7303_v26, 0.0 }
 0x2bf   :  { %v913_v20 = vpop.f32.mrb[10].mxu0 }
 0x2c0   :  { %v6577_v21 = vpop.f32.mrb[11].mxu0  ;;  %v918_v22 = vsel %vm917_vm7, %v913_v20, -inf }
 0x2c1   :  { %919 = vmax.xlane.f32.xlu1 %v918_v22 }
 0x2cb   :  { %v1097_v23 = vpop.f32.mrb[12].mxu0 }
 0x2cc   :  { %v6591_v24 = vpop.f32.mrb[13].mxu0  ;;  %v1101_v25 = vsel %vm526_vm5, %v1097_v23, -inf }
 0x2cd   :  { %1102 = vmax.xlane.f32.xlu1 %v1101_v25 }
 0x2cf   :  { %v1330_v27 = vpop.f32.mrb[14].mxu0 }
 0x2d0   :  { %v6616_v28 = vpop.f32.mrb[15].mxu0  ;;  %v1334_v54 = vsel %vm759_vm6, %v1330_v27, -inf }
 0x2d1   :  { %767 = vadd.xlane.f32.xlu1 %v766_v29 }
 0x30d   :  { %v535_v31 = vpop.xlane.xlu0 %534 }
 0x30e   :  { %7304 = vrcp.f32 %v535_v31 }
 0x318   :  { %v7305_v32 = vpop.eup %7304 }
 0x319   :  { %v537_v33 = vmul.f32 %v7305_v32, %v7301_v15 }
 0x31b   :  { %611 = vst.msk [vmem:[#allocation4] sm:$0xff] %vm526_vm5, %v537_v33  ;;  %6550 = vmatmul.mubr.msk.f32.vlgmr.msra.gmra.mrb[8].mxu1 %vm526_vm5, %v537_v33  ;;  %v5996_v33 = vld [vmem:[%s8521_s2 + $0x28] sm:$0xff] }
 0x31c   :  { %6569 = vmatpush3.msra.mxu1 %v7719_v55  ;;  %6570 = vmatprep.mubr.msk.f32.mxu1 %vm7473_vm0, %v7474_v6 }
 0x31d   :  { %6578 = vmatprep.subr.mxu1 %v7474_v6 }
 0x34e   :  { %v920_v34 = vpop.xlane.xlu1 %919 }
 0x34f   :  { %v921_v35 = vsub.f32 %v913_v20, %v920_v34 }
 0x351   :  { %v922_v36 = vmul.f32 1.442695, %v921_v35  ;;  %v5989_v35 = vld [vmem:[%s8520_s1 + $0x20] sm:$0xff] }
 0x353   :  { %7306 = vpow2.f32 %v922_v36  ;;  %v5990_v36 = vld [vmem:[%s8520_s1 + $0x28] sm:$0xff] }
 0x35a   :  { %v1103_v37 = vpop.xlane.xlu1 %1102 }
 0x35b   :  { %v1104_v41 = vsub.f32 %v1097_v23, %v1103_v37  ;;  %v7128_v37 = vpack.c.bf16 %v5990_v36, %v5989_v35 }
 0x35d   :  { %v7307_v48 = vpop.eup %7306  ;;  %v1105_v49 = vmul.f32 1.442695, %v1104_v41  ;;  %v5991_v41 = vld [vmem:[%s8520_s1 + $0x30] sm:$0xff] }
 0x35e   :  { %v768_v50 = vpop.xlane.xlu1 %767  ;;  %v924_v52 = vsel %vm917_vm7, %v7307_v48, 0.0 }
 0x35f   :  { %7308 = vpow2.f32 %v1105_v49  ;;  %925 = vadd.xlane.f32.xlu0 %v924_v52  ;;  %v5997_v52 = vld [vmem:[%s8521_s2 + $0x30] sm:$0xff] }
 0x360   :  { %7310 = vrcp.f32 %v768_v50 }
 0x363   :  { %1335 = vmax.xlane.f32.xlu0 %v1334_v54  ;;  %v5998_v54 = vld [vmem:[%s8521_s2 + $0x38] sm:$0xff] }
 0x369   :  { %v7309_v55 = vpop.eup %7308 }
 0x36a   :  { %v7311_v56 = vpop.eup %7310  ;;  %v1107_v59 = vsel %vm526_vm5, %v7309_v55, 0.0 }
 0x36b   :  { %v770_v60 = vmul.f32 %v7311_v56, %v7303_v26  ;;  %1108 = vadd.xlane.f32.xlu1 %v1107_v59  ;;  %v7885_v59 = vpack.c.bf16 %v5998_v54, %v5997_v52 }
 0x36d   :  { %6571 = vmatmul.mubr.msk.f32.vlgmr.msra.gmra.mrb[10].mxu1 %vm759_vm6, %v770_v60 }
 0x36e   :  { %6579 = vmatpush3.msk.msra.mxu1 %vm932_vm8, %v7762_v7  ;;  %6580 = vmatprep.mubr.msk.f32.mxu1 %vm7473_vm0, %v7474_v6 }
 0x36f   :  { %7119 = vmatprep.subr.bf16.mxu1 %v7472_v3 }
 0x3ec   :  { %v926_v61 = vpop.xlane.xlu0 %925 }
 0x3ed   :  { %7312 = vrcp.f32 %v926_v61 }
 0x3ee   :  { %v7808_v62 = vpop.f32.mrb[8].mxu1 }
 0x3ef   :  { %v6551_v2 = vpop.f32.mrb[9].mxu1 }
 0x3f0   :  { %v1336_v4 = vpop.xlane.xlu0 %1335 }
 0x3f1   :  { %v1337_v5 = vsub.f32 %v1330_v27, %v1336_v4 }
 0x3f3   :  { %v1338_v8 = vmul.f32 1.442695, %v1337_v5 }
 0x3f5   :  { %7314 = vpow2.f32 %v1338_v8 }
 0x3f7   :  { %v7313_v9 = vpop.eup %7312 }
 0x3f8   :  { %v928_v10 = vmul.f32 %v7313_v9, %v7307_v48  ;;  %v1109_v11 = vpop.xlane.xlu1 %1108  ;;  %v5992_v48 = vld [vmem:[%s8520_s1 + $0x38] sm:$0xff] }
 0x3f9   :  { %7316 = vrcp.f32 %v1109_v11  ;;  %v7132_v49 = vpack.c.bf16 %v5992_v48, %v5991_v41 }
 0x3fa   :  { %6581 = vmatmul.mubr.msk.f32.vlgmr.msra.gmra.mrb[12].mxu1 %vm917_vm7, %v928_v10 }
 0x3fb   :  { %7121 = vmatpush3.bf16.msra.mxu1 %v7740_v1  ;;  %6598 = vmatprep.mubr.msk.f32.mxu1 %vm7473_vm0, %v7474_v6 }
 0x3fc   :  { %6596 = vmatprep.subr.mxu1 %v7474_v6 }
 0x3ff   :  { %v7315_v7 = vpop.eup %7314  ;;  %6597 = vmatpush3.msra.mxu1 %v7734_v63 }
 0x400   :  { %v1340_v12 = vsel %vm759_vm6, %v7315_v7, 0.0  ;;  %7122 = vmatprep.subr.bf16.mxu1 %v7472_v3 }
 0x401   :  { %1341 = vadd.xlane.f32.xlu0 %v1340_v12 }
 0x403   :  { %v7317_v13 = vpop.eup %7316 }
 0x404   :  { %v1111_v14 = vmul.f32 %v7317_v13, %v7309_v55 }
 0x406   :  { %1186 = vst.msk [vmem:[#allocation4 + $0x20] sm:$0xff] %vm526_vm5, %v1111_v14  ;;  %6599 = vmatmul.mubr.msk.f32.vlgmr.msra.gmra.mrb[14].mxu1 %vm526_vm5, %v1111_v14 }
 0x407   :  { %7124 = vmatpush3.bf16.msra.mxu1 %v7619_v30  ;;  %6609 = vmatprep.mubr.msk.f32.mxu1 %vm7473_vm0, %v7474_v6 }
 0x408   :  { %7125 = vmatprep.subr.bf16.mxu1 %v7472_v3 }
 0x40b   :  { %7127 = vmatpush3.bf16.msra.mxu1 %v7641_v38 }
 0x40c   :  { %6617 = vmatprep.subr.mxu1 %v7474_v6 }
 0x40e   :  { %6610 = vmatmul.mubr.msk.f32.vlgmr.msra.gmra.mrb[16].mxu1 %vm244_vm1, %v7707_v51 }
 0x40f   :  { %6618 = vmatpush3.msra.mxu1 %v7736_v0  ;;  %6619 = vmatprep.mubr.msk.f32.mxu1 %vm7473_vm0, %v7474_v6 }
 0x410   :  { %6627 = vmatprep.subr.mxu1 %v7474_v6 }
 0x440   :  { %v7832_v30 = vpop.f32.mrb[10].mxu1 }
 0x441   :  { %v6572_v63 = vpop.f32.mrb[11].mxu1 }
 0x48e   :  { %v1342_v1 = vpop.xlane.xlu0 %1341 }
 0x48f   :  { %7318 = vrcp.f32 %v1342_v1 }
 0x499   :  { %v7319_v15 = vpop.eup %7318 }
 0x49a   :  { %v1344_v16 = vmul.f32 %v7319_v15, %v7315_v7 }
 0x49c   :  { %6620 = vmatmul.mubr.msk.f32.vlgmr.msra.gmra.mrb[18].mxu1 %vm759_vm6, %v1344_v16 }
 0x49d   :  { %6629 = vmatprep.mubr.msk.f32.mxu1 %vm7473_vm0, %v7474_v6 }
 0x4cd   :  { %v7837_v38 = vpop.f32.mrb[12].mxu1 }
 0x4ce   :  { %v1005_v0 = vsub.f32 %v7832_v30, %v7837_v38  ;;  %v6582_v17 = vpop.f32.mrb[13].mxu1 }
 0x4d9   :  { %v7841_v18 = vpop.f32.mrb[14].mxu1 }
 0x4da   :  { %v6600_v19 = vpop.f32.mrb[15].mxu1 }
 0x4e1   :  { %v1260_v20 = vpop.f32.mrb[16].mxu1 }
 0x4e2   :  { %v6611_v21 = vpop.f32.mrb[17].mxu1  ;;  %6623 = vmatpush3.xpose.msk.msra.mxu0 %vm443_vm3, %v1260_v20  ;;  %6628 = vmatpush3.msk.msra.mxu1 %vm932_vm8, %v1260_v20 }
 0x4e3   :  { %7129 = vmatprep.subr.bf16.mxu0 %v7128_v37 }
 0x4e5   :  { %6625 = vmatmul.mubr.msk.f32.vlgmr.msra.gmra.mrb[16].mxu0 %vm443_vm3, %v7727_v58  ;;  %v5995_v58 = vld [vmem:[%s8521_s2 + $0x20] sm:$0xff] }
 0x4e6   :  { %6640 = vmatprep.mubr.msk.f32.mxu0 %vm244_vm1, %v7654_v42  ;;  %v7859_v34 = vpack.c.bf16 %v5996_v33, %v5995_v58  ;;  %7131 = vmatpush3.bf16.msra.mxu0 %v7128_v37 }
 0x4e7   :  { %7133 = vmatprep.subr.bf16.mxu0 %v7132_v49 }
 0x4e8   :  { %7137 = vmatprep.subr.bf16.mxu1 %v7859_v34 }
 0x4ea   :  { %7135 = vmatpush3.bf16.msra.mxu0 %v7132_v49 }
 0x4eb   :  { %7144 = vmatprep.subr.bf16.mxu0 %v7472_v3 }
 0x4ed   :  { %6641 = vmatmul.mubr.msk.f32.vlgmr.msra.gmra.mrb[18].mxu0 %vm244_vm1, %v7674_v45 }
 0x4ee   :  { %6666 = vmatprep.mubr.msk.f32.mxu0 %vm7473_vm0, %v7474_v6 }
 0x56f   :  { %v7849_v22 = vpop.f32.mrb[18].mxu1 }
 0x570   :  { %v6621_v23 = vpop.f32.mrb[19].mxu1 }
 0x5b8   :  { %v1487_v24 = vpop.f32.mrb[16].mxu0 }
 0x5b9   :  { %v6626_v25 = vpop.f32.mrb[17].mxu0  ;;  %v1491_v26 = vsel %vm917_vm7, %v1487_v24, -inf }
 0x5ba   :  { %1492 = vmax.xlane.f32.xlu1 %v1491_v26 }
 0x5c0   :  { %v7906_v60 = vpop.f32.mrb[18].mxu0 }
 0x5c1   :  { %v7908_v61 = vpop.f32.mrb[19].mxu0 }
 0x647   :  { %v1493_v27 = vpop.xlane.xlu1 %1492 }
 0x648   :  { %v1494_v28 = vsub.f32 %v1487_v24, %v1493_v27 }
 0x64a   :  { %v1495_v29 = vmul.f32 1.442695, %v1494_v28 }
 0x64c   :  { %7320 = vpow2.f32 %v1495_v29 }
 0x656   :  { %v7321_v31 = vpop.eup %7320 }
 0x657   :  { %v1497_v32 = vsel %vm917_vm7, %v7321_v31, 0.0 }
 0x658   :  { %1498 = vadd.xlane.f32.xlu1 %v1497_v32 }
 0x6e5   :  { %v1499_v50 = vpop.xlane.xlu1 %1498 }
 0x6e6   :  { %7322 = vrcp.f32 %v1499_v50 }
 0x6f0   :  { %v7323_v55 = vpop.eup %7322 }
 0x6f1   :  { %v1501_v56 = vmul.f32 %v7323_v55, %v7321_v31 }
 0x6f3   :  { %6630 = vmatmul.mubr.msk.f32.vlgmr.msra.gmra.mrb[20].mxu1 %vm917_vm7, %v1501_v56 }
 0x6f4   :  { %7139 = vmatpush3.bf16.msra.mxu1 %v7859_v34  ;;  %6651 = vmatprep.mubr.msk.f32.mxu1 %vm244_vm1, %v7646_v39 }
 0x6f5   :  { %7141 = vmatprep.subr.bf16.mxu1 %v7885_v59 }
 0x6f8   :  { %7143 = vmatpush3.bf16.msra.mxu1 %v7885_v59 }
 0x6f9   :  { %7148 = vmatprep.subr.bf16.mxu1 %v7472_v3 }
 0x6fb   :  { %6652 = vmatmul.mubr.msk.f32.vlgmr.msra.gmra.mrb[22].mxu1 %vm244_vm1, %v7671_v44 }
 0x6fc   :  { %6654 = vmatprep.mubr.msk.f32.mxu1 %vm244_vm1, %v7651_v40 }
 0x6ff   :  { %6655 = vmatmul.mubr.msk.f32.gmra.mrb[24].mxu1 %vm244_vm1, %v7685_v46 }
 0x700   :  { %6657 = vmatprep.mubr.msk.f32.mxu1 %vm244_vm1, %v7692_v47 }
 0x703   :  { %6658 = vmatmul.mubr.msk.f32.gmra.mrb[26].mxu1 %vm244_vm1, %v7665_v43 }
 0x704   :  { %6675 = vmatprep.mubr.msk.f32.mxu1 %vm7473_vm0, %v7474_v6 }
 0x7c6   :  { %v7910_v2 = vpop.f32.mrb[20].mxu1 }
 0x7c7   :  { %v1577_v4 = vsub.f32 %v7849_v22, %v7910_v2  ;;  %v6631_v5 = vpop.f32.mrb[21].mxu1 }
 0x7ce   :  { %v7914_v8 = vpop.f32.mrb[22].mxu1 }
 0x7cf   :  { %v1744_v9 = vpop.f32.mrb[23].mxu1 }
 0x7d0   :  { %v7145_v10 = vpack.c.bf16 %v7914_v8, %v1744_v9 }
 0x7d2   :  { %7147 = vmatpush3.bf16.xpose.msk.msra.mxu0 %vm7723_vm4, %v7145_v10  ;;  %7150 = vmatpush3.bf16.msra.mxu1 %v7145_v10  ;;  %v6656_v11 = vpop.f32.mrb[24].mxu1 }
 0x7d3   :  { %v1754_v7 = vpop.f32.mrb[25].mxu1  ;;  %6673 = vmatprep.subr.mxu1 %v7474_v6  ;;  %6664 = vmatprep.subr.mxu0 %v7474_v6 }
 0x7d6   :  { %v7921_v12 = vpop.f32.mrb[26].mxu1  ;;  %6674 = vmatpush3.msra.mxu1 %v1754_v7 }
 0x7d7   :  { %v1764_v13 = vpop.f32.mrb[27].mxu1  ;;  %6689 = vmatprep.subr.mxu1 %v7474_v6 }
 0x7d8   :  { %v7924_v14 = vpack.c.bf16 %v1764_v13, %v6656_v11 }
 0x7da   :  { %6665 = vmatpush3.xpose.msk.msra.mxu0 %vm443_vm3, %v1754_v7 }
 0x7db   :  { %7151 = vmatprep.subr.bf16.mxu0 %v7472_v3 }
 0x7dd   :  { %6667 = vmatmul.mubr.msk.f32.vlgmr.msra.gmra.mrb[20].mxu0 %vm443_vm3, %v7908_v61 }
 0x7de   :  { %7153 = vmatpush3.bf16.msra.mxu0 %v7859_v34  ;;  %6686 = vmatprep.mubr.msk.f32.mxu0 %vm7473_vm0, %v7474_v6 }
 0x7df   :  { %7154 = vmatprep.subr.bf16.mxu0 %v7472_v3 }
 0x7e2   :  { %7156 = vmatpush3.bf16.msra.mxu0 %v7885_v59 }
 0x7e3   :  { %6699 = vmatprep.subr.mxu0 %v7474_v6 }
 0x7e5   :  { %6687 = vmatmul.mubr.msk.f32.vlgmr.msra.gmra.mrb[22].mxu0 %vm244_vm1, %v7709_v53 }
 0x7e6   :  { %6701 = vmatprep.mubr.msk.f32.mxu0 %vm7473_vm0, %v7474_v6 }
 0x8b0   :  { %v1851_v63 = vpop.f32.mrb[20].mxu0 }
 0x8b1   :  { %v6668_v1 = vpop.f32.mrb[21].mxu0  ;;  %v1855_v15 = vsel %vm526_vm5, %v1851_v63, -inf }
 0x8b2   :  { %1856 = vmax.xlane.f32.xlu0 %v1855_v15 }
 0x8b8   :  { %v7941_v16 = vpop.f32.mrb[22].mxu0 }
 0x8b9   :  { %v6688_v17 = vpop.f32.mrb[23].mxu0  ;;  %6700 = vmatpush3.xpose.msk.msra.mxu0 %vm443_vm3, %v7941_v16 }
 0x8ba   :  { %7157 = vmatprep.subr.bf16.mxu0 %v7472_v3 }
 0x8bc   :  { %6702 = vmatmul.mubr.msk.f32.vlgmr.msra.gmra.mrb[24].mxu0 %vm443_vm3, %v7908_v61 }
 0x8bd   :  { %7160 = vmatpush3.bf16.xpose.msk.msra.mxu0 %vm7723_vm4, %v7924_v14  ;;  %6715 = vmatprep.mubr.msk.f32.mxu0 %vm7473_vm0, %v7474_v6 }
 0x8be   :  { %6713 = vmatprep.subr.mxu0 %v7474_v6 }
 0x8c5   :  { %6714 = vmatpush3.xpose.msk.msra.mxu0 %vm443_vm3, %v7921_v12 }
 0x8c6   :  { %6738 = vmatprep.subr.mxu0 %v7474_v6 }
 0x8c8   :  { %6716 = vmatmul.mubr.msk.f32.vlgmr.msra.gmra.mrb[26].mxu0 %vm443_vm3, %v7906_v60 }
 0x8c9   :  { %6739 = vmatpush3.xpose.msk.msra.mxu0 %vm443_vm3, %v1764_v13  ;;  %6740 = vmatprep.mubr.msk.f32.mxu0 %vm7473_vm0, %v7474_v6 }
 0x8ca   :  { %6743 = vmatprep.subr.mxu0 %v7474_v6 }
 0x8cc   :  { %6741 = vmatmul.mubr.msk.f32.vlgmr.msra.gmra.mrb[28].mxu0 %vm443_vm3, %v7906_v60 }
 0x8cd   :  { %6744 = vmatpush3.msra.mxu0 %v1764_v13  ;;  %6745 = vmatprep.mubr.msk.f32.mxu0 %vm7473_vm0, %v7474_v6 }
 0x8ce   :  { %6753 = vmatprep.subr.mxu0 %v7474_v6 }
 0x93f   :  { %v1857_v19 = vpop.xlane.xlu0 %1856 }
 0x940   :  { %v1858_v20 = vsub.f32 %v1851_v63, %v1857_v19 }
 0x942   :  { %v1859_v21 = vmul.f32 1.442695, %v1858_v20 }
 0x944   :  { %7324 = vpow2.f32 %v1859_v21 }
 0x94e   :  { %v7325_v23 = vpop.eup %7324 }
 0x94f   :  { %v1861_v24 = vsel %vm526_vm5, %v7325_v23, 0.0 }
 0x950   :  { %1862 = vadd.xlane.f32.xlu1 %v1861_v24 }
 0x98f   :  { %v2238_v25 = vpop.f32.mrb[24].mxu0 }
 0x990   :  { %v6703_v26 = vpop.f32.mrb[25].mxu0  ;;  %v2242_v27 = vsel %vm917_vm7, %v2238_v25, -inf }
 0x991   :  { %2243 = vmax.xlane.f32.xlu1 %v2242_v27 }
 0x99b   :  { %v2420_v28 = vpop.f32.mrb[26].mxu0 }
 0x99c   :  { %v6717_v29 = vpop.f32.mrb[27].mxu0  ;;  %v2424_v55 = vsel %vm526_vm5, %v2420_v28, -inf }
 0x99f   :  { %v2650_v31 = vpop.f32.mrb[28].mxu0 }
 0x9a0   :  { %v6742_v32 = vpop.f32.mrb[29].mxu0  ;;  %v2654_v5 = vsel %vm759_vm6, %v2650_v31, -inf }
 0x9dd   :  { %v1863_v58 = vpop.xlane.xlu1 %1862 }
 0x9de   :  { %7326 = vrcp.f32 %v1863_v58 }
 0x9e8   :  { %v7327_v33 = vpop.eup %7326 }
 0x9e9   :  { %v1865_v35 = vmul.f32 %v7327_v33, %v7325_v23 }
 0x9eb   :  { %1940 = vst.msk [vmem:[#allocation4 + $0x8] sm:$0xff] %vm526_vm5, %v1865_v35  ;;  %6676 = vmatmul.mubr.msk.f32.vlgmr.msra.gmra.mrb[28].mxu1 %vm526_vm5, %v1865_v35 }
 0x9ec   :  { %6690 = vmatpush3.xpose.msk.msra.mxu1 %vm443_vm3, %v7914_v8  ;;  %6691 = vmatprep.mubr.msk.f32.mxu1 %vm7473_vm0, %v7474_v6 }
 0x9ed   :  { %6694 = vmatprep.subr.mxu1 %v7474_v6 }
 0x9ef   :  { %6692 = vmatmul.mubr.msk.f32.vlgmr.msra.gmra.mrb[30].mxu1 %vm443_vm3, %v7908_v61 }
 0x9f0   :  { %6695 = vmatpush3.msra.mxu1 %v7914_v8  ;;  %6696 = vmatprep.mubr.msk.f32.mxu1 %vm7473_vm0, %v7474_v6 }
 0x9f1   :  { %6704 = vmatprep.subr.mxu1 %v7474_v6 }
 0xa1e   :  { %v2244_v36 = vpop.xlane.xlu1 %2243 }
 0xa1f   :  { %v2245_v37 = vsub.f32 %v2238_v25, %v2244_v36 }
 0xa21   :  { %v2246_v41 = vmul.f32 1.442695, %v2245_v37 }
 0xa23   :  { %7328 = vpow2.f32 %v2246_v41 }
 0xa2d   :  { %v7329_v56 = vpop.eup %7328 }
 0xa2e   :  { %v2248_v61 = vsel %vm917_vm7, %v7329_v56, 0.0 }
 0xabe   :  { %v7983_v48 = vpop.f32.mrb[28].mxu1 }
 0xabf   :  { %v6677_v49 = vpop.f32.mrb[29].mxu1 }
 0xac2   :  { %v2081_v50 = vpop.f32.mrb[30].mxu1 }
 0xac3   :  { %v6693_v52 = vpop.f32.mrb[31].mxu1  ;;  %v2085_v54 = vsel %vm759_vm6, %v2081_v50, -inf }
 0xac4   :  { %2086 = vmax.xlane.f32.xlu0 %v2085_v54  ;;  %v6039_v54 = vld [vmem:[%s8522_s3 + $0x10] sm:$0xff] }
 0xac8   :  { %2425 = vmax.xlane.f32.xlu0 %v2424_v55  ;;  %v6040_v55 = vld [vmem:[%s8522_s3 + $0x18] sm:$0xff] }
 0xacc   :  { %2249 = vadd.xlane.f32.xlu0 %v2248_v61  ;;  %v1591_v61 = vld [vmem:[%s8522_s3] sm:$0xff] }
 0xad0   :  { %2655 = vmax.xlane.f32.xlu0 %v2654_v5  ;;  %v1592_v5 = vld [vmem:[%s8522_s3 + $0x8] sm:$0xff] }
 0xb51   :  { %v2087_v8 = vpop.xlane.xlu0 %2086 }
 0xb52   :  { %v2088_v9 = vsub.f32 %v2081_v50, %v2087_v8 }
 0xb54   :  { %v2089_v10 = vmul.f32 1.442695, %v2088_v9 }
 0xb55   :  { %v2426_v11 = vpop.xlane.xlu0 %2425 }
 0xb56   :  { %7330 = vpow2.f32 %v2089_v10  ;;  %v2427_v7 = vsub.f32 %v2420_v28, %v2426_v11  ;;  %v7174_v10 = vpack.c.bf16 %v1592_v5, %v1591_v61 }
 0xb58   :  { %v2428_v13 = vmul.f32 1.442695, %v2427_v7 }
 0xb59   :  { %v2250_v63 = vpop.xlane.xlu0 %2249 }
 0xb5a   :  { %7332 = vpow2.f32 %v2428_v13 }
 0xb5d   :  { %v2656_v1 = vpop.xlane.xlu0 %2655 }
 0xb5e   :  { %v2657_v15 = vsub.f32 %v2650_v31, %v2656_v1 }
 0xb60   :  { %v7331_v17 = vpop.eup %7330  ;;  %v2658_v19 = vmul.f32 1.442695, %v2657_v15 }
 0xb61   :  { %v2091_v20 = vsel %vm759_vm6, %v7331_v17, 0.0 }
 0xb62   :  { %7334 = vpow2.f32 %v2658_v19  ;;  %2092 = vadd.xlane.f32.xlu1 %v2091_v20  ;;  %v6054_v19 = vld [vmem:[%s8521_s2 + $0x58] sm:$0xff] }
 0xb64   :  { %v7333_v21 = vpop.eup %7332 }
 0xb65   :  { %v2430_v23 = vsel %vm526_vm5, %v7333_v21, 0.0 }
 0xb66   :  { %2431 = vadd.xlane.f32.xlu1 %v2430_v23  ;;  %v6046_v23 = vld [vmem:[%s8520_s1 + $0x48] sm:$0xff] }
 0xb6c   :  { %v7335_v24 = vpop.eup %7334 }
 0xb6d   :  { %v2660_v25 = vsel %vm759_vm6, %v7335_v24, 0.0 }
 0xb6e   :  { %2661 = vadd.xlane.f32.xlu0 %v2660_v25 }
 0xbef   :  { %v2093_v26 = vpop.xlane.xlu1 %2092 }
 0xbf0   :  { %7336 = vrcp.f32 %v2093_v26 }
 0xbf1   :  { %7338 = vrcp.f32 %v2250_v63 }
 0xbf3   :  { %v2432_v27 = vpop.xlane.xlu1 %2431 }
 0xbf4   :  { %7340 = vrcp.f32 %v2432_v27 }
 0xbfa   :  { %v7337_v28 = vpop.eup %7336 }
 0xbfb   :  { %v2095_v29 = vmul.f32 %v7337_v28, %v7331_v17  ;;  %v2662_v31 = vpop.xlane.xlu0 %2661  ;;  %v7339_v32 = vpop.eup %7338  ;;  %v6053_v17 = vld [vmem:[%s8521_s2 + $0x50] sm:$0xff] }
 0xbfc   :  { %7342 = vrcp.f32 %v2662_v31  ;;  %v2252_v33 = vmul.f32 %v7339_v32, %v7329_v56  ;;  %v7170_v56 = vpack.c.bf16 %v6040_v55, %v6039_v54  ;;  %v8071_v20 = vpack.c.bf16 %v6054_v19, %v6053_v17 }
 0xbfd   :  { %6697 = vmatmul.mubr.msk.f32.vlgmr.msra.gmra.mrb[32].mxu1 %vm759_vm6, %v2095_v29 }
 0xbfe   :  { %v7341_v58 = vpop.eup %7340  ;;  %6705 = vmatpush3.msk.msra.mxu1 %vm932_vm8, %v7941_v16  ;;  %6706 = vmatprep.mubr.msk.f32.mxu1 %vm7473_vm0, %v7474_v6 }
 0xbff   :  { %v2434_v35 = vmul.f32 %v7341_v58, %v7333_v21  ;;  %7161 = vmatprep.subr.bf16.mxu1 %v7472_v3  ;;  %v6045_v21 = vld [vmem:[%s8520_s1 + $0x40] sm:$0xff] }
 0xc01   :  { %2509 = vst.msk [vmem:[#allocation4 + $0x28] sm:$0xff] %vm526_vm5, %v2434_v35  ;;  %6707 = vmatmul.mubr.msk.f32.vlgmr.msra.gmra.mrb[34].mxu1 %vm917_vm7, %v2252_v33 }
 0xc02   :  { %7163 = vmatpush3.bf16.msra.mxu1 %v7924_v14  ;;  %6724 = vmatprep.mubr.msk.f32.mxu1 %vm7473_vm0, %v7474_v6 }
 0xc03   :  { %6722 = vmatprep.subr.mxu1 %v7474_v6 }
 0xc06   :  { %v7343_v36 = vpop.eup %7342  ;;  %6723 = vmatpush3.msra.mxu1 %v7921_v12 }
 0xc07   :  { %v2664_v16 = vmul.f32 %v7343_v36, %v7335_v24  ;;  %6725 = vmatmul.mubr.msk.f32.vlgmr.msra.gmra.mrb[36].mxu1 %vm526_vm5, %v2434_v35  ;;  %7164 = vmatprep.subr.bf16.mxu1 %v7472_v3  ;;  %v7178_v24 = vpack.c.bf16 %v6046_v23, %v6045_v21 }
 0xc08   :  { %7166 = vmatpush3.bf16.msra.mxu1 %v7859_v34  ;;  %6735 = vmatprep.mubr.msk.f32.mxu1 %vm7473_vm0, %v7474_v6 }
 0xc09   :  { %6746 = vmatmul.mubr.msk.f32.vlgmr.msra.gmra.mrb[30].mxu0 %vm759_vm6, %v2664_v16  ;;  %7167 = vmatprep.subr.bf16.mxu1 %v7472_v3 }
 0xc0a   :  { %6755 = vmatprep.mubr.msk.f32.mxu0 %vm7473_vm0, %v7474_v6 }
 0xc0c   :  { %7169 = vmatpush3.bf16.msra.mxu1 %v7885_v59 }
 0xc0d   :  { %6748 = vmatprep.subr.mxu1 %v7474_v6 }
 0xc0f   :  { %6736 = vmatmul.mubr.msk.f32.vlgmr.msra.gmra.mrb[38].mxu1 %vm244_vm1, %v7707_v51 }
 0xc10   :  { %6750 = vmatprep.mubr.msk.f32.mxu1 %vm7473_vm0, %v7474_v6 }
 0xcd0   :  { %v8020_v34 = vpop.f32.mrb[32].mxu1 }
 0xcd1   :  { %v6698_v12 = vpop.f32.mrb[33].mxu1 }
 0xcd4   :  { %v8022_v14 = vpop.f32.mrb[34].mxu1 }
 0xcd5   :  { %v2328_v37 = vsub.f32 %v8020_v34, %v8022_v14  ;;  %v6708_v41 = vpop.f32.mrb[35].mxu1 }
 0xcda   :  { %v2504_v49 = vpop.f32.mrb[36].mxu1 }
 0xcdb   :  { %v6726_v50 = vpop.f32.mrb[37].mxu1 }
 0xcdc   :  { %v8026_v59 = vpop.f32.mrb[30].mxu0 }
 0xcdd   :  { %v6747_v52 = vpop.f32.mrb[31].mxu0 }
 0xce2   :  { %v2580_v8 = vpop.f32.mrb[38].mxu1 }
 0xce3   :  { %v6737_v9 = vpop.f32.mrb[39].mxu1  ;;  %6749 = vmatpush3.xpose.msk.msra.mxu1 %vm443_vm3, %v2580_v8  ;;  %6754 = vmatpush3.msk.msra.mxu0 %vm932_vm8, %v2580_v8 }
 0xce4   :  { %7171 = vmatprep.subr.bf16.mxu1 %v7170_v56  ;;  %7179 = vmatprep.subr.bf16.mxu0 %v7178_v24 }
 0xce6   :  { %6751 = vmatmul.mubr.msk.f32.vlgmr.msra.gmra.mrb[40].mxu1 %vm443_vm3, %v7906_v60 }
 0xce7   :  { %7173 = vmatpush3.bf16.msra.mxu1 %v7170_v56  ;;  %6762 = vmatprep.mubr.msk.f32.mxu1 %vm443_vm3, %v7983_v48  ;;  %v6051_v48 = vld [vmem:[%s8521_s2 + $0x40] sm:$0xff] }
 0xce8   :  { %7175 = vmatprep.subr.bf16.mxu1 %v7174_v10 }
 0xcea   :  { %6763 = vmatmul.mubr.msk.f32.vlgmr.msra.gmra.mrb[42].mxu1 %vm443_vm3, %v2504_v49 }
 0xceb   :  { %6769 = vmatprep.mubr.msk.f32.mxu1 %vm443_vm3, %v7808_v62  ;;  %7177 = vmatpush3.bf16.msra.mxu1 %v7174_v10  ;;  %v6052_v62 = vld [vmem:[%s8521_s2 + $0x48] sm:$0xff] }
 0xcec   :  { %v8060_v13 = vpack.c.bf16 %v6052_v62, %v6051_v48 }
 0xcee   :  { %7187 = vmatprep.subr.bf16.mxu1 %v8060_v13 }
 0xcf2   :  { %6770 = vmatmul.mubr.msk.f32.vlgmr.msra.gmra.mrb[42].mxu1 %vm443_vm3, %v7841_v18 }
 0xcf3   :  { %6791 = vmatprep.mubr.msk.f32.mxu1 %vm244_vm1, %v7646_v39  ;;  %7189 = vmatpush3.bf16.msra.mxu1 %v8060_v13 }
 0xcf4   :  { %7191 = vmatprep.subr.bf16.mxu1 %v8071_v20 }
 0xcf7   :  { %7193 = vmatpush3.bf16.msra.mxu1 %v8071_v20 }
 0xcf8   :  { %7198 = vmatprep.subr.bf16.mxu1 %v7472_v3 }
 0xcfa   :  { %6792 = vmatmul.mubr.msk.f32.vlgmr.msra.gmra.mrb[44].mxu1 %vm244_vm1, %v7671_v44  ;;  %v6047_v44 = vld [vmem:[%s8520_s1 + $0x50] sm:$0xff] }
 0xcfb   :  { %6794 = vmatprep.mubr.msk.f32.mxu1 %vm244_vm1, %v7651_v40 }
 0xcfe   :  { %6795 = vmatmul.mubr.msk.f32.gmra.mrb[46].mxu1 %vm244_vm1, %v7685_v46  ;;  %v6048_v46 = vld [vmem:[%s8520_s1 + $0x58] sm:$0xff] }
 0xcff   :  { %6797 = vmatprep.mubr.msk.f32.mxu1 %vm244_vm1, %v7692_v47  ;;  %v7182_v47 = vpack.c.bf16 %v6048_v46, %v6047_v44 }
 0xd02   :  { %6798 = vmatmul.mubr.msk.f32.gmra.mrb[48].mxu1 %vm244_vm1, %v7665_v43 }
 0xd03   :  { %6815 = vmatprep.mubr.msk.f32.mxu1 %vm7473_vm0, %v7474_v6 }
 0xdb9   :  { %v2807_v11 = vpop.f32.mrb[40].mxu1 }
 0xdba   :  { %v6752_v7 = vpop.f32.mrb[41].mxu1  ;;  %v2811_v60 = vsel %vm917_vm7, %v2807_v11, -inf }
 0xdbb   :  { %2812 = vmax.xlane.f32.xlu1 %v2811_v60 }
 0xdcd   :  { %v6793_v43 = vpop.f32.mrb[44].mxu1 }
 0xdce   :  { %v3227_v27 = vpop.f32.mrb[45].mxu1 }
 0xdcf   :  { %v7195_v28 = vpack.c.bf16 %v6793_v43, %v3227_v27 }
 0xdd1   :  { %7200 = vmatpush3.bf16.msra.mxu1 %v7195_v28  ;;  %v6796_v29 = vpop.f32.mrb[46].mxu1 }
 0xdd2   :  { %6813 = vmatprep.subr.mxu1 %v7474_v6  ;;  %v3237_v31 = vpop.f32.mrb[47].mxu1 }
 0xdd5   :  { %v8112_v32 = vpop.f32.mrb[48].mxu1  ;;  %6814 = vmatpush3.msra.mxu1 %v3237_v31 }
 0xdd6   :  { %v3247_v58 = vpop.f32.mrb[49].mxu1  ;;  %6829 = vmatprep.subr.mxu1 %v7474_v6 }
 0xdd7   :  { %v8116_v33 = vpack.c.bf16 %v3247_v58, %v6796_v29 }
 0xe48   :  { %v2813_v39 = vpop.xlane.xlu1 %2812 }
 0xe49   :  { %v2814_v18 = vsub.f32 %v2807_v11, %v2813_v39 }
 0xe4b   :  { %v2815_v63 = vmul.f32 1.442695, %v2814_v18 }
 0xe4d   :  { %7344 = vpow2.f32 %v2815_v63 }
 0xe57   :  { %v7345_v1 = vpop.eup %7344 }
 0xe58   :  { %v2817_v15 = vsel %vm917_vm7, %v7345_v1, 0.0 }
 0xe59   :  { %2818 = vadd.xlane.f32.xlu1 %v2817_v15 }
 0xee6   :  { %v2819_v40 = vpop.xlane.xlu1 %2818 }
 0xee7   :  { %7346 = vrcp.f32 %v2819_v40 }
 0xef1   :  { %v7347_v25 = vpop.eup %7346 }
 0xef2   :  { %v2821_v26 = vmul.f32 %v7347_v25, %v7345_v1 }
 0xef4   :  { %6756 = vmatmul.mubr.msk.f32.vlgmr.msra.gmra.mrb[32].mxu0 %vm917_vm7, %v2821_v26 }
 0xef5   :  { %7181 = vmatpush3.bf16.msra.mxu0 %v7178_v24  ;;  %6780 = vmatprep.mubr.msk.f32.mxu0 %vm244_vm1, %v7654_v42 }
 0xef6   :  { %7183 = vmatprep.subr.bf16.mxu0 %v7182_v47 }
 0xef9   :  { %7185 = vmatpush3.bf16.msra.mxu0 %v7182_v47 }
 0xefa   :  { %7194 = vmatprep.subr.bf16.mxu0 %v7472_v3 }
 0xefc   :  { %6781 = vmatmul.mubr.msk.f32.vlgmr.msra.gmra.mrb[34].mxu0 %vm244_vm1, %v7674_v45 }
 0xefd   :  { %6806 = vmatprep.mubr.msk.f32.mxu0 %vm7473_vm0, %v7474_v6 }
 0xf02   :  { %7197 = vmatpush3.bf16.xpose.msk.msra.mxu0 %vm7723_vm4, %v7195_v28 }
 0xf03   :  { %6804 = vmatprep.subr.mxu0 %v7474_v6 }
 0xf0a   :  { %6805 = vmatpush3.xpose.msk.msra.mxu0 %vm443_vm3, %v3237_v31 }
 0xf0b   :  { %7201 = vmatprep.subr.bf16.mxu0 %v7472_v3 }
 0xfc7   :  { %v8119_v35 = vpop.f32.mrb[32].mxu0 }
 0xfc8   :  { %v2897_v36 = vsub.f32 %v8026_v59, %v8119_v35  ;;  %v6757_v16 = vpop.f32.mrb[33].mxu0  ;;  %v6149_v35 = vld [vmem:[%s8522_s3 + $0x30] sm:$0xff] }
 0xfcf   :  { %v8123_v12 = vpop.f32.mrb[34].mxu0 }
 0xfd0   :  { %v3147_v41 = vpop.f32.mrb[35].mxu0 }
 0xfd1   :  { %6807 = vmatmul.mubr.msk.f32.vlgmr.msra.gmra.mrb[36].mxu0 %vm443_vm3, %v3147_v41 }
 0xfd2   :  { %7203 = vmatpush3.bf16.msra.mxu0 %v8060_v13  ;;  %6826 = vmatprep.mubr.msk.f32.mxu0 %vm7473_vm0, %v7474_v6 }
 0xfd3   :  { %7204 = vmatprep.subr.bf16.mxu0 %v7472_v3 }
 0xfd6   :  { %7206 = vmatpush3.bf16.msra.mxu0 %v8071_v20 }
 0xfd7   :  { %6834 = vmatprep.subr.mxu0 %v7474_v6 }
 0xfd9   :  { %6827 = vmatmul.mubr.msk.f32.vlgmr.msra.gmra.mrb[38].mxu0 %vm244_vm1, %v7709_v53 }
 0xfda   :  { %6835 = vmatpush3.msra.mxu0 %v6793_v43  ;;  %6836 = vmatprep.mubr.msk.f32.mxu0 %vm7473_vm0, %v7474_v6 }
 0xfdb   :  { %6844 = vmatprep.subr.mxu0 %v7474_v6 }
0x10a4   :  { %v3334_v49 = vpop.f32.mrb[36].mxu0 }
0x10a5   :  { %v6808_v50 = vpop.f32.mrb[37].mxu0  ;;  %v3338_v52 = vsel %vm526_vm5, %v3334_v49, -inf }
0x10a6   :  { %3339 = vmax.xlane.f32.xlu0 %v3338_v52 }
0x10ac   :  { %v8138_v54 = vpop.f32.mrb[38].mxu0 }
0x10ad   :  { %v6828_v55 = vpop.f32.mrb[39].mxu0 }
0x1133   :  { %v3340_v56 = vpop.xlane.xlu0 %3339 }
0x1134   :  { %v3341_v61 = vsub.f32 %v3334_v49, %v3340_v56 }
0x1136   :  { %v3342_v5 = vmul.f32 1.442695, %v3341_v61 }
0x1138   :  { %7348 = vpow2.f32 %v3342_v5 }
0x1142   :  { %v7349_v8 = vpop.eup %7348 }
0x1143   :  { %v3344_v9 = vsel %vm526_vm5, %v7349_v8, 0.0 }
0x1144   :  { %3345 = vadd.xlane.f32.xlu1 %v3344_v9 }
0x11d1   :  { %v3346_v10 = vpop.xlane.xlu1 %3345 }
0x11d2   :  { %7350 = vrcp.f32 %v3346_v10 }
0x11dc   :  { %v7351_v11 = vpop.eup %7350 }
0x11dd   :  { %v3348_v7 = vmul.f32 %v7351_v11, %v7349_v8 }
0x11df   :  { %3423 = vst.msk [vmem:[#allocation4 + $0x10] sm:$0xff] %vm526_vm5, %v3348_v7  ;;  %6816 = vmatmul.mubr.msk.f32.vlgmr.msra.gmra.mrb[50].mxu1 %vm526_vm5, %v3348_v7 }
0x11e0   :  { %6830 = vmatpush3.xpose.msk.msra.mxu1 %vm443_vm3, %v6793_v43  ;;  %6831 = vmatprep.mubr.msk.f32.mxu1 %vm7473_vm0, %v7474_v6 }
0x11e1   :  { %6839 = vmatprep.subr.mxu1 %v7474_v6 }
0x11e3   :  { %6832 = vmatmul.mubr.msk.f32.vlgmr.msra.gmra.mrb[52].mxu1 %vm443_vm3, %v3147_v41 }
0x11e4   :  { %6840 = vmatpush3.xpose.msk.msra.mxu1 %vm443_vm3, %v8138_v54  ;;  %6841 = vmatprep.mubr.msk.f32.mxu1 %vm7473_vm0, %v7474_v6 }
0x11e5   :  { %7207 = vmatprep.subr.bf16.mxu1 %v7472_v3 }
0x11e7   :  { %6842 = vmatmul.mubr.msk.f32.vlgmr.msra.gmra.mrb[54].mxu1 %vm443_vm3, %v3147_v41 }
0x11e8   :  { %7210 = vmatpush3.bf16.xpose.msk.msra.mxu1 %vm7723_vm4, %v8116_v33  ;;  %6855 = vmatprep.mubr.msk.f32.mxu1 %vm7473_vm0, %v7474_v6 }
0x11e9   :  { %6853 = vmatprep.subr.mxu1 %v7474_v6 }
0x11f0   :  { %6854 = vmatpush3.xpose.msk.msra.mxu1 %vm443_vm3, %v8112_v32 }
0x11f1   :  { %6878 = vmatprep.subr.mxu1 %v7474_v6 }
0x11f3   :  { %6856 = vmatmul.mubr.msk.f32.vlgmr.msra.gmra.mrb[56].mxu1 %vm443_vm3, %v8123_v12 }
0x11f4   :  { %6879 = vmatpush3.xpose.msk.msra.mxu1 %vm443_vm3, %v3247_v58  ;;  %6880 = vmatprep.mubr.msk.f32.mxu1 %vm7473_vm0, %v7474_v6 }
0x11f5   :  { %6883 = vmatprep.subr.mxu1 %v7474_v6 }
0x11f7   :  { %6881 = vmatmul.mubr.msk.f32.vlgmr.msra.gmra.mrb[58].mxu1 %vm443_vm3, %v8123_v12 }
0x11f8   :  { %6884 = vmatpush3.msra.mxu1 %v3247_v58  ;;  %6885 = vmatprep.mubr.msk.f32.mxu1 %vm7473_vm0, %v7474_v6 }
0x11f9   :  { %6893 = vmatprep.subr.mxu1 %v7474_v6 }
0x12b2   :  { %v8174_v60 = vpop.f32.mrb[50].mxu1 }
0x12b3   :  { %v6817_v48 = vpop.f32.mrb[51].mxu1 }
0x12b6   :  { %v3564_v62 = vpop.f32.mrb[52].mxu1 }
0x12b7   :  { %v6833_v39 = vpop.f32.mrb[53].mxu1  ;;  %v3568_v18 = vsel %vm759_vm6, %v3564_v62, -inf }
0x12b8   :  { %3569 = vmax.xlane.f32.xlu0 %v3568_v18 }
0x12ba   :  { %v3721_v63 = vpop.f32.mrb[54].mxu1 }
0x12bb   :  { %v6843_v1 = vpop.f32.mrb[55].mxu1  ;;  %v3725_v15 = vsel %vm917_vm7, %v3721_v63, -inf }
0x12bc   :  { %3726 = vmax.xlane.f32.xlu1 %v3725_v15 }
0x12c6   :  { %v3903_v17 = vpop.f32.mrb[56].mxu1 }
0x12c7   :  { %v6857_v19 = vpop.f32.mrb[57].mxu1  ;;  %v3907_v21 = vsel %vm526_vm5, %v3903_v17, -inf }
0x12c8   :  { %3908 = vmax.xlane.f32.xlu0 %v3907_v21 }
0x12ca   :  { %v4133_v23 = vpop.f32.mrb[58].mxu1 }
0x12cb   :  { %v6882_v24 = vpop.f32.mrb[59].mxu1  ;;  %v4137_v41 = vsel %vm759_vm6, %v4133_v23, -inf }
0x1345   :  { %v3570_v40 = vpop.xlane.xlu0 %3569 }
0x1346   :  { %v3571_v44 = vsub.f32 %v3564_v62, %v3570_v40 }
0x1348   :  { %v3572_v46 = vmul.f32 1.442695, %v3571_v44 }
0x1349   :  { %v3727_v25 = vpop.xlane.xlu1 %3726 }
0x134a   :  { %7352 = vpow2.f32 %v3572_v46  ;;  %v3728_v26 = vsub.f32 %v3721_v63, %v3727_v25 }
0x134c   :  { %v3729_v47 = vmul.f32 1.442695, %v3728_v26 }
0x134e   :  { %7354 = vpow2.f32 %v3729_v47 }
0x1354   :  { %v7353_v43 = vpop.eup %7352 }
0x1355   :  { %v3909_v27 = vpop.xlane.xlu0 %3908  ;;  %v3574_v28 = vsel %vm759_vm6, %v7353_v43, 0.0 }
0x1356   :  { %v3910_v29 = vsub.f32 %v3903_v17, %v3909_v27  ;;  %3575 = vadd.xlane.f32.xlu1 %v3574_v28 }
0x1358   :  { %v7355_v31 = vpop.eup %7354  ;;  %v3911_v58 = vmul.f32 1.442695, %v3910_v29 }
0x1359   :  { %v3731_v16 = vsel %vm917_vm7, %v7355_v31, 0.0 }
0x135a   :  { %7356 = vpow2.f32 %v3911_v58  ;;  %3732 = vadd.xlane.f32.xlu0 %v3731_v16  ;;  %v6100_v58 = vld [vmem:[%s8520_s1 + $0x68] sm:$0xff] }
0x135e   :  { %4138 = vmax.xlane.f32.xlu0 %v4137_v41  ;;  %v6101_v41 = vld [vmem:[%s8520_s1 + $0x70] sm:$0xff] }
0x1364   :  { %v7357_v49 = vpop.eup %7356 }
0x1365   :  { %v3913_v50 = vsel %vm526_vm5, %v7357_v49, 0.0 }
0x1366   :  { %3914 = vadd.xlane.f32.xlu1 %v3913_v50 }
0x13e3   :  { %v3576_v52 = vpop.xlane.xlu1 %3575 }
0x13e4   :  { %7358 = vrcp.f32 %v3576_v52 }
0x13e7   :  { %v3733_v55 = vpop.xlane.xlu0 %3732 }
0x13e8   :  { %7360 = vrcp.f32 %v3733_v55  ;;  %v6105_v55 = vld [vmem:[%s8521_s2 + $0x60] sm:$0xff] }
0x13eb   :  { %v4139_v56 = vpop.xlane.xlu0 %4138 }
0x13ec   :  { %v4140_v61 = vsub.f32 %v4133_v23, %v4139_v56  ;;  %v6106_v56 = vld [vmem:[%s8521_s2 + $0x68] sm:$0xff] }
0x13ee   :  { %v7359_v5 = vpop.eup %7358  ;;  %v4141_v8 = vmul.f32 1.442695, %v4140_v61 }
0x13ef   :  { %v3578_v9 = vmul.f32 %v7359_v5, %v7353_v43 }
0x13f0   :  { %7362 = vpow2.f32 %v4141_v8  ;;  %v8257_v8 = vpack.c.bf16 %v6106_v56, %v6105_v55 }
0x13f1   :  { %6837 = vmatmul.mubr.msk.f32.vlgmr.msra.gmra.mrb[40].mxu0 %vm759_vm6, %v3578_v9  ;;  %v6108_v9 = vld [vmem:[%s8521_s2 + $0x78] sm:$0xff] }
0x13f2   :  { %v7361_v10 = vpop.eup %7360  ;;  %6845 = vmatpush3.msk.msra.mxu0 %vm932_vm8, %v8138_v54  ;;  %6846 = vmatprep.mubr.msk.f32.mxu0 %vm7473_vm0, %v7474_v6 }
0x13f3   :  { %v3735_v11 = vmul.f32 %v7361_v10, %v7355_v31  ;;  %v3915_v7 = vpop.xlane.xlu1 %3914  ;;  %7211 = vmatprep.subr.bf16.mxu0 %v7472_v3  ;;  %v6099_v31 = vld [vmem:[%s8520_s1 + $0x60] sm:$0xff] }
0x13f4   :  { %7364 = vrcp.f32 %v3915_v7  ;;  %v7224_v16 = vpack.c.bf16 %v6100_v58, %v6099_v31  ;;  %v7398_v7 = vld [vmem:[%s8519_s0 + $0x10] sm:$0xff] }
0x13f5   :  { %6847 = vmatmul.mubr.msk.f32.vlgmr.msra.gmra.mrb[42].mxu0 %vm917_vm7, %v3735_v11  ;;  %v7396_v11 = vld [vmem:[%s8519_s0] sm:$0xff] }
0x13f6   :  { %7213 = vmatpush3.bf16.msra.mxu0 %v8116_v33  ;;  %6864 = vmatprep.mubr.msk.f32.mxu0 %vm7473_vm0, %v7474_v6 }
0x13f7   :  { %6862 = vmatprep.subr.mxu0 %v7474_v6 }
0x13fa   :  { %v7363_v48 = vpop.eup %7362  ;;  %6863 = vmatpush3.msra.mxu0 %v8112_v32 }
0x13fb   :  { %v4143_v54 = vsel %vm759_vm6, %v7363_v48, 0.0  ;;  %7214 = vmatprep.subr.bf16.mxu0 %v7472_v3 }
0x13fc   :  { %4144 = vadd.xlane.f32.xlu0 %v4143_v54  ;;  %v7400_v54 = vld [vmem:[%s8519_s0 + $0x20] sm:$0xff] }
0x13fe   :  { %v7365_v62 = vpop.eup %7364 }
0x13ff   :  { %v3917_v39 = vmul.f32 %v7365_v62, %v7357_v49  ;;  %v6102_v49 = vld [vmem:[%s8520_s1 + $0x78] sm:$0xff]  ;;  %v7401_v62 = vld [vmem:[%s8519_s0 + $0x28] sm:$0xff] }
0x1400   :  { %v7228_v50 = vpack.c.bf16 %v6102_v49, %v6101_v41 }
0x1401   :  { %3992 = vst.msk [vmem:[#allocation4 + $0x30] sm:$0xff] %vm526_vm5, %v3917_v39  ;;  %6865 = vmatmul.mubr.msk.f32.vlgmr.msra.gmra.mrb[44].mxu0 %vm526_vm5, %v3917_v39 }
0x1402   :  { %7216 = vmatpush3.bf16.msra.mxu0 %v8060_v13  ;;  %6875 = vmatprep.mubr.msk.f32.mxu0 %vm7473_vm0, %v7474_v6 }
0x1403   :  { %7217 = vmatprep.subr.bf16.mxu0 %v7472_v3 }
0x1406   :  { %7219 = vmatpush3.bf16.msra.mxu0 %v8071_v20 }
0x1407   :  { %6888 = vmatprep.subr.mxu0 %v7474_v6 }
0x1409   :  { %6876 = vmatmul.mubr.msk.f32.vlgmr.msra.gmra.mrb[46].mxu0 %vm244_vm1, %v7707_v51 }
0x140a   :  { %6890 = vmatprep.mubr.msk.f32.mxu0 %vm7473_vm0, %v7474_v6 }
0x1489   :  { %v4145_v32 = vpop.xlane.xlu0 %4144 }
0x148a   :  { %7366 = vrcp.f32 %v4145_v32 }
0x1494   :  { %v7367_v33 = vpop.eup %7366 }
0x1495   :  { %v4147_v18 = vmul.f32 %v7367_v33, %v7363_v48  ;;  %v7399_v48 = vld [vmem:[%s8519_s0 + $0x18] sm:$0xff] }
0x1497   :  { %6886 = vmatmul.mubr.msk.f32.vlgmr.msra.gmra.mrb[60].mxu1 %vm759_vm6, %v4147_v18 }
0x1498   :  { %6895 = vmatprep.mubr.msk.f32.mxu1 %vm7473_vm0, %v7474_v6 }
0x14c4   :  { %v8212_v13 = vpop.f32.mrb[40].mxu0 }
0x14c5   :  { %v6838_v20 = vpop.f32.mrb[41].mxu0 }
0x14c8   :  { %v8214_v63 = vpop.f32.mrb[42].mxu0 }
0x14c9   :  { %v3811_v1 = vsub.f32 %v8212_v13, %v8214_v63  ;;  %v6848_v15 = vpop.f32.mrb[43].mxu0 }
0x14d4   :  { %v3987_v17 = vpop.f32.mrb[44].mxu0 }
0x14d5   :  { %v6866_v19 = vpop.f32.mrb[45].mxu0 }
0x14dc   :  { %v4063_v21 = vpop.f32.mrb[46].mxu0 }
0x14dd   :  { %v6877_v23 = vpop.f32.mrb[47].mxu0  ;;  %6889 = vmatpush3.xpose.msk.msra.mxu0 %vm443_vm3, %v4063_v21  ;;  %6894 = vmatpush3.msk.msra.mxu1 %vm932_vm8, %v4063_v21 }
0x14de   :  { %7225 = vmatprep.subr.bf16.mxu0 %v7224_v16 }
0x14e0   :  { %6891 = vmatmul.mubr.msk.f32.vlgmr.msra.gmra.mrb[48].mxu0 %vm443_vm3, %v8123_v12  ;;  %v6096_v12 = vld [vmem:[%s8522_s3 + $0x28] sm:$0xff] }
0x14e1   :  { %6913 = vmatprep.mubr.msk.f32.mxu0 %vm244_vm1, %v7654_v42  ;;  %v6095_v42 = vld [vmem:[%s8522_s3 + $0x20] sm:$0xff]  ;;  %7227 = vmatpush3.bf16.msra.mxu0 %v7224_v16 }
0x14e2   :  { %v7220_v29 = vpack.c.bf16 %v6096_v12, %v6095_v42  ;;  %7229 = vmatprep.subr.bf16.mxu0 %v7228_v50 }
0x14e4   :  { %7221 = vmatprep.subr.bf16.mxu1 %v7220_v29 }
0x14e5   :  { %7231 = vmatpush3.bf16.msra.mxu0 %v7228_v50 }
0x14e6   :  { %7240 = vmatprep.subr.bf16.mxu0 %v7472_v3 }
0x14e8   :  { %6914 = vmatmul.mubr.msk.f32.vlgmr.msra.gmra.mrb[50].mxu0 %vm244_vm1, %v7674_v45  ;;  %v6107_v45 = vld [vmem:[%s8521_s2 + $0x70] sm:$0xff] }
0x14e9   :  { %6939 = vmatprep.mubr.msk.f32.mxu0 %vm7473_vm0, %v7474_v6  ;;  %v8269_v10 = vpack.c.bf16 %v6108_v9, %v6107_v45 }
0x156a   :  { %v8224_v24 = vpop.f32.mrb[60].mxu1 }
0x156b   :  { %v6887_v40 = vpop.f32.mrb[61].mxu1 }
0x15b3   :  { %v4290_v44 = vpop.f32.mrb[48].mxu0 }
0x15b4   :  { %v6892_v46 = vpop.f32.mrb[49].mxu0  ;;  %v4294_v25 = vsel %vm917_vm7, %v4290_v44, -inf }
0x15b5   :  { %4295 = vmax.xlane.f32.xlu1 %v4294_v25 }
0x15bb   :  { %v8310_v39 = vpop.f32.mrb[50].mxu0 }
0x15bc   :  { %v4551_v32 = vpop.f32.mrb[51].mxu0 }
0x1642   :  { %v4296_v26 = vpop.xlane.xlu1 %4295 }
0x1643   :  { %v4297_v47 = vsub.f32 %v4290_v44, %v4296_v26 }
0x1645   :  { %v4298_v43 = vmul.f32 1.442695, %v4297_v47 }
0x1647   :  { %7368 = vpow2.f32 %v4298_v43 }
0x1651   :  { %v7369_v27 = vpop.eup %7368 }
0x1652   :  { %v4300_v28 = vsel %vm917_vm7, %v7369_v27, 0.0 }
0x1653   :  { %4301 = vadd.xlane.f32.xlu1 %v4300_v28 }
0x16e0   :  { %v4302_v52 = vpop.xlane.xlu1 %4301 }
0x16e1   :  { %7370 = vrcp.f32 %v4302_v52 }
0x16eb   :  { %v7371_v61 = vpop.eup %7370 }
0x16ec   :  { %v4304_v5 = vmul.f32 %v7371_v61, %v7369_v27 }
0x16ee   :  { %6896 = vmatmul.mubr.msk.f32.vlgmr.msra.gmra.mrb[62].mxu1 %vm917_vm7, %v4304_v5 }
0x16ef   :  { %7223 = vmatpush3.bf16.msra.mxu1 %v7220_v29  ;;  %6902 = vmatprep.mubr.msk.f32.mxu1 %vm443_vm3, %v8174_v60  ;;  %v7397_v60 = vld [vmem:[%s8519_s0 + $0x8] sm:$0xff] }
0x16f0   :  { %7233 = vmatprep.subr.bf16.mxu1 %v8257_v8 }
0x16f2   :  { %6903 = vmatmul.mubr.msk.f32.vlgmr.msra.gmra.mrb[42].mxu1 %vm443_vm3, %v3987_v17 }
0x16f3   :  { %7235 = vmatpush3.bf16.msra.mxu1 %v8257_v8  ;;  %6924 = vmatprep.mubr.msk.f32.mxu1 %vm244_vm1, %v7396_v11 }
0x16f4   :  { %7237 = vmatprep.subr.bf16.mxu1 %v8269_v10 }
0x16f7   :  { %7239 = vmatpush3.bf16.msra.mxu1 %v8269_v10 }
0x16f8   :  { %7247 = vmatprep.subr.bf16.mxu1 %v7472_v3 }
0x16fa   :  { %6925 = vmatmul.mubr.msk.f32.vlgmr.msra.gmra.mrb[64].mxu1 %vm244_vm1, %v7397_v60 }
0x16fb   :  { %6927 = vmatprep.mubr.msk.f32.mxu1 %vm244_vm1, %v7398_v7  ;;  %7249 = vmatpush3.bf16.msra.mxu1 %v8257_v8 }
0x16fc   :  { %7250 = vmatprep.subr.bf16.mxu1 %v7472_v3 }
0x16fe   :  { %6928 = vmatmul.mubr.msk.f32.gmra.mrb[66].mxu1 %vm244_vm1, %v7399_v48 }
0x16ff   :  { %6930 = vmatprep.mubr.msk.f32.mxu1 %vm244_vm1, %v7400_v54  ;;  %7252 = vmatpush3.bf16.msra.mxu1 %v8269_v10 }
0x1700   :  { %6967 = vmatprep.subr.mxu1 %v7474_v6 }
0x1702   :  { %6931 = vmatmul.mubr.msk.f32.gmra.mrb[68].mxu1 %vm244_vm1, %v7401_v62 }
0x1703   :  { %6959 = vmatprep.mubr.msk.f32.mxu1 %vm7473_vm0, %v7474_v6 }
0x1706   :  { %6960 = vmatmul.mubr.msk.f32.vlgmr.msra.gmra.mrb[70].mxu1 %vm244_vm1, %v7709_v53 }
0x1707   :  { %6969 = vmatprep.mubr.msk.f32.mxu1 %vm7473_vm0, %v7474_v6 }
0x17c1   :  { %v8312_v33 = vpop.f32.mrb[62].mxu1 }
0x17c2   :  { %v4380_v18 = vsub.f32 %v8224_v24, %v8312_v33  ;;  %v6897_v20 = vpop.f32.mrb[63].mxu1 }
0x17cd   :  { %v6926_v15 = vpop.f32.mrb[64].mxu1 }
0x17ce   :  { %v4631_v17 = vpop.f32.mrb[65].mxu1  ;;  %6968 = vmatpush3.msra.mxu1 %v6926_v15 }
0x17cf   :  { %v7241_v19 = vpack.c.bf16 %v6926_v15, %v4631_v17  ;;  %6977 = vmatprep.subr.mxu1 %v7474_v6 }
0x17d1   :  { %7243 = vmatpush3.bf16.xpose.msk.msra.mxu0 %vm7723_vm4, %v7241_v19  ;;  %v6929_v53 = vpop.f32.mrb[66].mxu1 }
0x17d2   :  { %v4641_v21 = vpop.f32.mrb[67].mxu1  ;;  %6937 = vmatprep.subr.mxu0 %v7474_v6 }
0x17d5   :  { %v8320_v23 = vpop.f32.mrb[68].mxu1 }
0x17d6   :  { %v8322_v40 = vpop.f32.mrb[69].mxu1 }
0x17d7   :  { %v8325_v44 = vpack.c.bf16 %v8322_v40, %v6929_v53 }
0x17d9   :  { %6938 = vmatpush3.xpose.msk.msra.mxu0 %vm443_vm3, %v4641_v21  ;;  %v8328_v46 = vpop.f32.mrb[70].mxu1 }
0x17da   :  { %v6961_v25 = vpop.f32.mrb[71].mxu1  ;;  %7244 = vmatprep.subr.bf16.mxu0 %v7472_v3 }
0x17dc   :  { %6940 = vmatmul.mubr.msk.f32.vlgmr.msra.gmra.mrb[52].mxu0 %vm443_vm3, %v4551_v32 }
0x17dd   :  { %7246 = vmatpush3.bf16.msra.mxu0 %v7241_v19  ;;  %6948 = vmatprep.mubr.msk.f32.mxu0 %vm7473_vm0, %v7474_v6 }
0x17de   :  { %6946 = vmatprep.subr.mxu0 %v7474_v6 }
0x17e1   :  { %6947 = vmatpush3.msra.mxu0 %v4641_v21 }
0x17e2   :  { %6962 = vmatprep.subr.mxu0 %v7474_v6 }
0x18af   :  { %v4738_v26 = vpop.f32.mrb[52].mxu0 }
0x18b0   :  { %v6941_v47 = vpop.f32.mrb[53].mxu0  ;;  %v4742_v43 = vsel %vm526_vm5, %v4738_v26, -inf }
0x18b1   :  { %4743 = vmax.xlane.f32.xlu0 %v4742_v43 }
0x193e   :  { %v4744_v27 = vpop.xlane.xlu0 %4743 }
0x193f   :  { %v4745_v28 = vsub.f32 %v4738_v26, %v4744_v27 }
0x1941   :  { %v4746_v42 = vmul.f32 1.442695, %v4745_v28 }
0x1943   :  { %7372 = vpow2.f32 %v4746_v42 }
0x194d   :  { %v7373_v12 = vpop.eup %7372 }
0x194e   :  { %v4748_v29 = vsel %vm526_vm5, %v7373_v12, 0.0 }
0x194f   :  { %4749 = vadd.xlane.f32.xlu1 %v4748_v29 }
0x19dc   :  { %v4750_v31 = vpop.xlane.xlu1 %4749 }
0x19dd   :  { %7374 = vrcp.f32 %v4750_v31  ;;  %v237_v31 = vlaneseq }
0x19e7   :  { %v7375_v58 = vpop.eup %7374 }
0x19e8   :  { %v4752_v16 = vmul.f32 %v7375_v58, %v7373_v12 }
0x19ea   :  { %4827 = vst.msk [vmem:[#allocation4 + $0x18] sm:$0xff] %vm526_vm5, %v4752_v16  ;;  %6949 = vmatmul.mubr.msk.f32.vlgmr.msra.gmra.mrb[54].mxu0 %vm526_vm5, %v4752_v16 }
0x19eb   :  { %6963 = vmatpush3.xpose.msk.msra.mxu0 %vm443_vm3, %v6926_v15  ;;  %6964 = vmatprep.mubr.msk.f32.mxu0 %vm7473_vm0, %v7474_v6 }
0x19ec   :  { %6972 = vmatprep.subr.mxu0 %v7474_v6 }
0x19ee   :  { %6965 = vmatmul.mubr.msk.f32.vlgmr.msra.gmra.mrb[56].mxu0 %vm443_vm3, %v4551_v32 }
0x19ef   :  { %6973 = vmatpush3.xpose.msk.msra.mxu0 %vm443_vm3, %v8328_v46  ;;  %6974 = vmatprep.mubr.msk.f32.mxu0 %vm7473_vm0, %v7474_v6 }
0x19f0   :  { %7253 = vmatprep.subr.bf16.mxu0 %v7472_v3 }
0x19f2   :  { %6975 = vmatmul.mubr.msk.f32.vlgmr.msra.gmra.mrb[58].mxu0 %vm443_vm3, %v4551_v32 }
0x19f3   :  { %7256 = vmatpush3.bf16.xpose.msk.msra.mxu0 %vm7723_vm4, %v8325_v44  ;;  %6988 = vmatprep.mubr.msk.f32.mxu0 %vm7473_vm0, %v7474_v6 }
0x19f4   :  { %6986 = vmatprep.subr.mxu0 %v7474_v6 }
0x19fb   :  { %6987 = vmatpush3.xpose.msk.msra.mxu0 %vm443_vm3, %v8320_v23 }
0x19fc   :  { %7011 = vmatprep.subr.mxu0 %v7474_v6 }
0x19fe   :  { %6989 = vmatmul.mubr.msk.f32.vlgmr.msra.gmra.mrb[60].mxu0 %vm443_vm3, %v8310_v39 }
0x19ff   :  { %7012 = vmatpush3.xpose.msk.msra.mxu0 %vm443_vm3, %v8322_v40  ;;  %7013 = vmatprep.mubr.msk.f32.mxu0 %vm7473_vm0, %v7474_v6 }
0x1a00   :  { %7021 = vmatprep.subr.mxu0 %v7474_v6 }
0x1a02   :  { %7014 = vmatmul.mubr.msk.f32.vlgmr.msra.gmra.mrb[62].mxu0 %vm443_vm3, %v8310_v39 }
0x1a03   :  { %7023 = vmatprep.mubr.msk.f32.mxu0 %vm7473_vm0, %v7474_v6 }
0x1abd   :  { %v8371_v57 = vpop.f32.mrb[54].mxu0 }
0x1abe   :  { %v6950_v41 = vpop.f32.mrb[55].mxu0 }
0x1ac1   :  { %v4968_v49 = vpop.f32.mrb[56].mxu0 }
0x1ac2   :  { %v6966_v50 = vpop.f32.mrb[57].mxu0  ;;  %v4972_v52 = vsel %vm759_vm6, %v4968_v49, -inf }
0x1ac3   :  { %4973 = vmax.xlane.f32.xlu0 %v4972_v52 }
0x1ac5   :  { %v5125_v55 = vpop.f32.mrb[58].mxu0 }
0x1ac6   :  { %v6976_v56 = vpop.f32.mrb[59].mxu0  ;;  %v5129_v61 = vsel %vm917_vm7, %v5125_v55, -inf }
0x1ac7   :  { %5130 = vmax.xlane.f32.xlu1 %v5129_v61 }
0x1ad1   :  { %v5307_v5 = vpop.f32.mrb[60].mxu0 }
0x1ad2   :  { %v6990_v45 = vpop.f32.mrb[61].mxu0  ;;  %v5311_v9 = vsel %vm526_vm5, %v5307_v5, -inf }
0x1ad3   :  { %5312 = vmax.xlane.f32.xlu0 %v5311_v9 }
0x1ad5   :  { %v5537_v11 = vpop.f32.mrb[62].mxu0 }
0x1ad6   :  { %v7015_v60 = vpop.f32.mrb[63].mxu0  ;;  %v5541_v47 = vsel %vm759_vm6, %v5537_v11, -inf }
0x1b50   :  { %v4974_v7 = vpop.xlane.xlu0 %4973 }
0x1b51   :  { %v4975_v48 = vsub.f32 %v4968_v49, %v4974_v7  ;;  %v8380_v49 = vand.u32 127, %v237_v31 }
0x1b53   :  { %v4976_v54 = vmul.f32 1.442695, %v4975_v48  ;;  %vm239_vm9 = vcmp.ge.s32.totalorder %v8380_v49, 8 }
0x1b54   :  { %v5131_v62 = vpop.xlane.xlu1 %5130  ;;  %v4381_v22 = vsel %vm239_vm9, %v4380_v18, 0.0 }
0x1b55   :  { %7376 = vpow2.f32 %v4976_v54  ;;  %v5132_v32 = vsub.f32 %v5125_v55, %v5131_v62 }
0x1b57   :  { %v5133_v20 = vmul.f32 1.442695, %v5132_v32 }
0x1b59   :  { %7378 = vpow2.f32 %v5133_v20 }
0x1b5f   :  { %v7377_v15 = vpop.eup %7376 }
0x1b60   :  { %v5313_v17 = vpop.xlane.xlu0 %5312  ;;  %v4978_v19 = vsel %vm759_vm6, %v7377_v15, 0.0 }
0x1b61   :  { %v5314_v53 = vsub.f32 %v5307_v5, %v5313_v17  ;;  %4979 = vadd.xlane.f32.xlu1 %v4978_v19 }
0x1b63   :  { %v7379_v21 = vpop.eup %7378  ;;  %v5315_v25 = vmul.f32 1.442695, %v5314_v53 }
0x1b64   :  { %v5135_v26 = vsel %vm917_vm7, %v7379_v21, 0.0 }
0x1b65   :  { %7380 = vpow2.f32 %v5315_v25  ;;  %5136 = vadd.xlane.f32.xlu0 %v5135_v26 }
0x1b69   :  { %5542 = vmax.xlane.f32.xlu0 %v5541_v47 }
0x1b6f   :  { %v7381_v43 = vpop.eup %7380 }
0x1b70   :  { %v5317_v27 = vsel %vm526_vm5, %v7381_v43, 0.0 }
0x1b71   :  { %5318 = vadd.xlane.f32.xlu1 %v5317_v27 }
0x1bee   :  { %v4980_v28 = vpop.xlane.xlu1 %4979 }
0x1bef   :  { %7382 = vrcp.f32 %v4980_v28 }
0x1bf2   :  { %v5137_v42 = vpop.xlane.xlu0 %5136 }
0x1bf3   :  { %7384 = vrcp.f32 %v5137_v42 }
0x1bf6   :  { %v5543_v12 = vpop.xlane.xlu0 %5542 }
0x1bf7   :  { %v5544_v29 = vsub.f32 %v5537_v11, %v5543_v12  ;;  %v1578_v12 = vsel %vm239_vm9, %v1577_v4, 0.0  ;;  %v4382_v4 = vmul.f32 %v4381_v22, %v4381_v22 }
0x1bf8   :  { %v1579_v31 = vmul.f32 %v1578_v12, %v1578_v12 }
0x1bf9   :  { %v7383_v58 = vpop.eup %7382  ;;  %v5545_v16 = vmul.f32 1.442695, %v5544_v29  ;;  %v4383_v59 = vsel %vm443_vm3, %v4382_v4, 0.0 }
0x1bfa   :  { %v4982_v41 = vmul.f32 %v7383_v58, %v7377_v15  ;;  %v2898_v58 = vsel %vm239_vm9, %v2897_v36, 0.0  ;;  %v6150_v36 = vld [vmem:[%s8522_s3 + $0x38] sm:$0xff] }
0x1bfb   :  { %7386 = vpow2.f32 %v5545_v16  ;;  %v1580_v16 = vsel %vm443_vm3, %v1579_v31, 0.0  ;;  %v7266_v24 = vpack.c.bf16 %v6150_v36, %v6149_v35 }
0x1bfc   :  { %6970 = vmatmul.mubr.msk.f32.vlgmr.msra.gmra.mrb[72].mxu1 %vm759_vm6, %v4982_v41  ;;  %v2899_v41 = vmul.f32 %v2898_v58, %v2898_v58 }
0x1bfd   :  { %v7385_v50 = vpop.eup %7384  ;;  %6978 = vmatpush3.msk.msra.mxu1 %vm932_vm8, %v8328_v46  ;;  %6979 = vmatprep.mubr.msk.f32.mxu1 %vm7473_vm0, %v7474_v6  ;;  %v1006_v46 = vsel %vm239_vm9, %v1005_v0, 0.0 }
0x1bfe   :  { %v5139_v52 = vmul.f32 %v7385_v50, %v7379_v21  ;;  %v5319_v55 = vpop.xlane.xlu1 %5318  ;;  %7257 = vmatprep.subr.bf16.mxu1 %v7472_v3  ;;  %v1007_v5 = vmul.f32 %v1006_v46, %v1006_v46  ;;  %v2900_v2 = vsel %vm443_vm3, %v2899_v41, 0.0 }
0x1bff   :  { %7388 = vrcp.f32 %v5319_v55 }
0x1c00   :  { %6980 = vmatmul.mubr.msk.f32.vlgmr.msra.gmra.mrb[74].mxu1 %vm917_vm7, %v5139_v52  ;;  %v1008_v38 = vsel %vm443_vm3, %v1007_v5, 0.0 }
0x1c01   :  { %7259 = vmatpush3.bf16.msra.mxu1 %v8325_v44  ;;  %6997 = vmatprep.mubr.msk.f32.mxu1 %vm7473_vm0, %v7474_v6  ;;  %v2329_v44 = vsel %vm239_vm9, %v2328_v37, 0.0 }
0x1c02   :  { %6995 = vmatprep.subr.mxu1 %v7474_v6  ;;  %v2330_v0 = vmul.f32 %v2329_v44, %v2329_v44 }
0x1c04   :  { %v2331_v34 = vsel %vm443_vm3, %v2330_v0, 0.0 }
0x1c05   :  { %v7387_v56 = vpop.eup %7386  ;;  %6996 = vmatpush3.msra.mxu1 %v8320_v23  ;;  %v3812_v23 = vsel %vm239_vm9, %v3811_v1, 0.0 }
0x1c06   :  { %v5547_v61 = vsel %vm759_vm6, %v7387_v56, 0.0  ;;  %7260 = vmatprep.subr.bf16.mxu1 %v7472_v3  ;;  %v3813_v14 = vmul.f32 %v3812_v23, %v3812_v23 }
0x1c07   :  { %5548 = vadd.xlane.f32.xlu0 %v5547_v61 }
0x1c08   :  { %v3814_v37 = vsel %vm443_vm3, %v3813_v14, 0.0 }
0x1c09   :  { %v7389_v45 = vpop.eup %7388 }
0x1c0a   :  { %v5321_v30 = vmul.f32 %v7389_v45, %v7381_v43 }
0x1c0b   :  { %1009 = vadd.xlane.f32.xlu0 %v1008_v38 }
0x1c0c   :  { %5396 = vst.msk [vmem:[#allocation4 + $0x38] sm:$0xff] %vm526_vm5, %v5321_v30  ;;  %6998 = vmatmul.mubr.msk.f32.vlgmr.msra.gmra.mrb[76].mxu1 %vm526_vm5, %v5321_v30 }
0x1c0d   :  { %7262 = vmatpush3.bf16.msra.mxu1 %v8257_v8  ;;  %7008 = vmatprep.mubr.msk.f32.mxu1 %vm7473_vm0, %v7474_v6 }
0x1c0e   :  { %7263 = vmatprep.subr.bf16.mxu1 %v7472_v3 }
0x1c0f   :  { %2332 = vadd.xlane.f32.xlu0 %v2331_v34 }
0x1c11   :  { %7265 = vmatpush3.bf16.msra.mxu1 %v8269_v10 }
0x1c12   :  { %7016 = vmatprep.subr.mxu1 %v7474_v6 }
0x1c13   :  { %3815 = vadd.xlane.f32.xlu0 %v3814_v37 }
0x1c14   :  { %7009 = vmatmul.mubr.msk.f32.vlgmr.msra.gmra.mrb[78].mxu1 %vm244_vm1, %v7707_v51 }
0x1c15   :  { %7017 = vmatpush3.msra.mxu1 %v8322_v40  ;;  %7018 = vmatprep.mubr.msk.f32.mxu1 %vm7473_vm0, %v7474_v6 }
0x1c16   :  { %7026 = vmatprep.subr.mxu1 %v7474_v6 }
0x1c94   :  { %v5549_v3 = vpop.xlane.xlu0 %5548 }
0x1c95   :  { %7390 = vrcp.f32 %v5549_v3 }
0x1c98   :  { %v1010_v13 = vpop.xlane.xlu0 %1009 }
0x1c99   :  { %v1011_v63 = vrot.slane %v1010_v13, 4 }
0x1c9b   :  { %v1012_v1 = vadd.f32 %v1011_v63, %v1010_v13 }
0x1c9c   :  { %v2333_v33 = vpop.xlane.xlu0 %2332 }
0x1c9d   :  { %v1013_v8 = vrot.slane %v1012_v1, 2  ;;  %v2334_v18 = vrot.slane %v2333_v33, 4 }
0x1c9f   :  { %v7391_v10 = vpop.eup %7390  ;;  %v1014_v9 = vadd.f32 %v1013_v8, %v1012_v1  ;;  %v2335_v52 = vadd.f32 %v2334_v18, %v2333_v33 }
0x1ca0   :  { %v5551_v11 = vmul.f32 %v7391_v10, %v7387_v56  ;;  %v3816_v50 = vpop.xlane.xlu0 %3815 }
0x1ca1   :  { %v1015_v60 = vrot.slane %v1014_v9, 1  ;;  %v3817_v55 = vrot.slane %v3816_v50, 4  ;;  %v2336_v61 = vrot.slane %v2335_v52, 2 }
0x1ca2   :  { %7019 = vmatmul.mubr.msk.f32.vlgmr.msra.gmra.mrb[80].mxu1 %vm759_vm6, %v5551_v11 }
0x1ca3   :  { %v1016_v51 = vadd.f32 %v1015_v60, %v1014_v9  ;;  %7028 = vmatprep.mubr.msk.f32.mxu1 %vm7473_vm0, %v7474_v6  ;;  %v3818_v5 = vadd.f32 %v3817_v55, %v3816_v50  ;;  %v2337_v14 = vadd.f32 %v2336_v61, %v2335_v52 }
0x1ca5   :  { %7276 = vpush %v1016_v51  ;;  %v3819_v0 = vrot.slane %v3818_v5, 2  ;;  %v2338_v11 = vrot.slane %v2337_v14, 1 }
0x1ca7   :  { %v3820_v60 = vadd.f32 %v3819_v0, %v3818_v5 }
0x1ccf   :  { %v5052_v40 = vpop.f32.mrb[72].mxu1 }
0x1cd0   :  { %v6971_v7 = vpop.f32.mrb[73].mxu1 }
0x1cd3   :  { %v5211_v48 = vpop.f32.mrb[74].mxu1 }
0x1cd4   :  { %v5215_v54 = vsub.f32 %v5052_v40, %v5211_v48  ;;  %v6981_v62 = vpop.f32.mrb[75].mxu1 }
0x1cd6   :  { %v5216_v32 = vsel %vm239_vm9, %v5215_v54, 0.0 }
0x1cd7   :  { %v5217_v20 = vmul.f32 %v5216_v32, %v5216_v32 }
0x1cd9   :  { %v5218_v15 = vsel %vm443_vm3, %v5217_v20, 0.0  ;;  %v2339_v20 = vadd.f32 %v2338_v11, %v2337_v14 }
0x1cda   :  { %5219 = vadd.xlane.f32.xlu0 %v5218_v15  ;;  %v3821_v15 = vrot.slane %v3820_v60, 1 }
0x1cdf   :  { %v8435_v17 = vpop.f32.mrb[76].mxu1 }
0x1ce0   :  { %v6999_v19 = vpop.f32.mrb[77].mxu1 }
0x1ce7   :  { %v5467_v53 = vpop.f32.mrb[78].mxu1 }
0x1ce8   :  { %v7010_v21 = vpop.f32.mrb[79].mxu1  ;;  %7022 = vmatpush3.xpose.msk.msra.mxu0 %vm443_vm3, %v5467_v53  ;;  %7027 = vmatpush3.msk.msra.mxu1 %vm932_vm8, %v5467_v53 }
0x1ce9   :  { %7267 = vmatprep.subr.bf16.mxu1 %v7266_v24 }
0x1ceb   :  { %7024 = vmatmul.mubr.msk.f32.vlgmr.msra.gmra.mrb[64].mxu0 %vm443_vm3, %v8310_v39 }
0x1d67   :  { %v5220_v56 = vpop.xlane.xlu0 %5219 }
0x1d68   :  { %v5221_v44 = vrot.slane %v5220_v56, 4 }
0x1d6a   :  { %v5222_v23 = vadd.f32 %v5221_v44, %v5220_v56 }
0x1d6c   :  { %v5223_v8 = vrot.slane %v5222_v23, 2 }
0x1d6e   :  { %v5224_v32 = vadd.f32 %v5223_v8, %v5222_v23 }
0x1d75   :  { %v8441_v6 = vpop.f32.mrb[80].mxu1 }
0x1d76   :  { %v7020_v25 = vpop.f32.mrb[81].mxu1 }
0x1dbe   :  { %v5694_v26 = vpop.f32.mrb[64].mxu0 }
0x1dbf   :  { %v7025_v47 = vpop.f32.mrb[65].mxu0  ;;  %v5698_v43 = vsel %vm917_vm7, %v5694_v26, -inf }
0x1dc0   :  { %5699 = vmax.xlane.f32.xlu1 %v5698_v43  ;;  %v5225_v47 = vrot.slane %v5224_v32, 1 }
0x1e4d   :  { %v5700_v27 = vpop.xlane.xlu1 %5699 }
0x1e4e   :  { %v5701_v28 = vsub.f32 %v5694_v26, %v5700_v27  ;;  %v3822_v26 = vadd.f32 %v3821_v15, %v3820_v60  ;;  %v5226_v27 = vadd.f32 %v5225_v47, %v5224_v32 }
0x1e50   :  { %v5702_v42 = vmul.f32 1.442695, %v5701_v28 }
0x1e52   :  { %7392 = vpow2.f32 %v5702_v42 }
0x1e5c   :  { %v7393_v29 = vpop.eup %7392 }
0x1e5d   :  { %v5704_v39 = vsel %vm917_vm7, %v7393_v29, 0.0 }
0x1e5e   :  { %5705 = vadd.xlane.f32.xlu1 %v5704_v39 }
0x1e62   :  { %1581 = vadd.xlane.f32.xlu1 %v1580_v16 }
0x1e66   :  { %2901 = vadd.xlane.f32.xlu1 %v2900_v2 }
0x1e6a   :  { %4384 = vadd.xlane.f32.xlu1 %v4383_v59 }
0x1eeb   :  { %v5706_v46 = vpop.xlane.xlu1 %5705 }
0x1eec   :  { %7394 = vrcp.f32 %v5706_v46 }
0x1eef   :  { %v1582_v45 = vpop.xlane.xlu1 %1581 }
0x1ef0   :  { %v1583_v30 = vrot.slane %v1582_v45, 4 }
0x1ef2   :  { %v1584_v38 = vadd.f32 %v1583_v30, %v1582_v45 }
0x1ef3   :  { %v2902_v34 = vpop.xlane.xlu1 %2901 }
0x1ef4   :  { %v1585_v37 = vrot.slane %v1584_v38, 2  ;;  %v2903_v3 = vrot.slane %v2902_v34, 4 }
0x1ef6   :  { %v7395_v13 = vpop.eup %7394  ;;  %v2904_v63 = vadd.f32 %v2903_v3, %v2902_v34  ;;  %v1586_v1 = vadd.f32 %v1585_v37, %v1584_v38 }
0x1ef7   :  { %v5708_v10 = vmul.f32 %v7395_v13, %v7393_v29  ;;  %v4385_v9 = vpop.xlane.xlu1 %4384  ;;  %v6153_v29 = vld [vmem:[%s8523_s4] ss:$0 sm:$0xff]  ;;  %s5904_s4 = sshll.u32 %s7476_s13, 4  ;;  %s5905_s4 = int_to_ptr.vmem [resolvable:$true] %s5904_s4 }
0x1ef8   :  { %v2905_v51 = vrot.slane %v2904_v63, 2  ;;  %v4386_v40 = vrot.slane %v4385_v9, 4  ;;  %v1587_v7 = vrot.slane %v1586_v1, 1 }
0x1ef9   :  { %7029 = vmatmul.mubr.msk.f32.vlgmr.msra.gmra.mrb[82].mxu1 %vm917_vm7, %v5708_v10 }
0x1efa   :  { %v4387_v48 = vadd.f32 %v4386_v40, %v4385_v9  ;;  %7269 = vmatpush3.bf16.msra.mxu1 %v7266_v24  ;;  %7035 = vmatprep.mubr.msk.f32.mxu1 %vm443_vm3, %v8371_v57  ;;  %v1588_v54 = vadd.f32 %v1587_v7, %v1586_v1  ;;  %v2906_v62 = vadd.f32 %v2905_v51, %v2904_v63 }
0x1efc   :  { %v4388_v19 = vrot.slane %v4387_v48, 2  ;;  %7278 = vpush %v1588_v54  ;;  %v2907_v53 = vrot.slane %v2906_v62, 1 }
0x1efd   :  { %7280 = vpush %v2339_v20  ;;  %7036 = vmatmul.mubr.msk.f32.vlgmr.msra.gmra.mrb[42].mxu1 %vm443_vm3, %v8435_v17 }
0x1efe   :  { %v2908_v21 = vadd.f32 %v2907_v53, %v2906_v62  ;;  %v4389_v25 = vadd.f32 %v4388_v19, %v4387_v48 }
0x1f00   :  { %7282 = vpush %v2908_v21  ;;  %v4390_v43 = vrot.slane %v4389_v25, 1 }
0x1f01   :  { %7284 = vpush %v3822_v26 }
0x1f02   :  { %v4391_v57 = vadd.f32 %v4390_v43, %v4389_v25 }
0x1f04   :  { %7286 = vpush %v4391_v57 }
0x1f05   :  { %7288 = vpush %v5226_v27 }
0x1fcc   :  { %v5780_v28 = vpop.f32.mrb[82].mxu1 }
0x1fcd   :  { %v5784_v42 = vsub.f32 %v8441_v6, %v5780_v28  ;;  %v7030_v12 = vpop.f32.mrb[83].mxu1 }
0x1fcf   :  { %v5785_v17 = vsel %vm239_vm9, %v5784_v42, 0.0 }
0x1fd0   :  { %v7037_v39 = vpop.f32.mrb[42].mxu1  ;;  %v5786_v31 = vmul.f32 %v5785_v17, %v5785_v17 }
0x1fd1   :  { %v5892_v58 = vadd.f32 %v7037_v39, %v6153_v29  ;;  %v5873_v16 = vpop.f32.mrb[43].mxu1 }
0x1fd2   :  { %v5891_v41 = vadd.f32 %v6153_v29, %v5873_v16  ;;  %v5787_v22 = vsel %vm443_vm3, %v5786_v31, 0.0 }
0x1fd3   :  { %5895 = vst.msk [vmem:[#allocation2 + $0x8] sm:$0xff] %vm244_vm1, %v5892_v58  ;;  %5788 = vadd.xlane.f32.xlu1 %v5787_v22 }
0x1fd4   :  { %5893 = vst.msk [vmem:[#allocation2] sm:$0xff] %vm244_vm1, %v5891_v41 }
0x1fd5   :  { %7413 = shalt.err (!%p7410_p4)
}
0x1fd6   :  { %s7414_s15 = scalar_lea.hbm %s8528_s9, 1024 }
0x1fd7   :  { %p7415_p5 = scmp.ne.s32.totalorder %s8528_s9, %s7414_s15  ;;  %p7418_p6 = scmp.lt.u32.totalorder %s7414_s15, %s8528_s9 }
0x1fd9   :  { %p7420_p7 = pnand %p7418_p6, %p7415_p5 }
0x1fdb   :  { %7423 = shalt.err (!%p7420_p7)
}
0x1fdc   :  { %s7477_s2 = smov 128   ;;  %s7478_s19 = smov 8  }
0x1fdd   :  { %5922 = dma.vmem_to_hbm [thread:$0]  %s5917_s12, 1024, %s8528_s9, [#allocation5], %s7477_s2, %s7477_s2, %s7478_s19  }
0x1fde   :  { %s7424_s22 = scalar_lea.vmem %s5905_s4, 256  ;;  %p7429_p9 = scmp.lt.s32.totalorder %s5905_s4, %s5905_s4 }
0x1fdf   :  { %p7425_p8 = scmp.ne.s32.totalorder %s5905_s4, %s7424_s22  ;;  %p7430_p10 = scmp.lt.s32.totalorder %s7424_s22, %s7424_s22 }
0x1fe1   :  { %p7431_p11 = por %p7430_p10, %p7429_p9 }
0x1fe3   :  { %p7432_p12 = pnand %p7431_p11, %p7425_p8 }
0x1fe5   :  { %7435 = shalt.err (!%p7432_p12)
}
0x1fe6   :  { %s7436_s25 = scalar_lea.hbm %s8527_s8, 256 }
0x1fe7   :  { %p7437_p13 = scmp.ne.s32.totalorder %s8527_s8, %s7436_s25  ;;  %p7440_p0 = scmp.lt.u32.totalorder %s7436_s25, %s8527_s8 }
0x1fe9   :  { %p7442_p1 = pnand %p7440_p0, %p7437_p13 }
0x1feb   :  { %7445 = shalt.err (!%p7442_p1)
}
0x1fec   :  { %5910 = dma.vmem_to_hbm [thread:$0]  %s5905_s4, 256, %s8527_s8, [#allocation3], %s7477_s2, %s7477_s2, %s7478_s19   ;;  %vm5897_vm10 = vcmask 0  }
0x1fed   :  { %s7277_s28 = spop %7276  ;;  %s7479_s17 = smov [#allocation6]  }
0x1fee   :  { %s7279_s3 = spop %7278  ;;  %s5931_s18 = sshll.u32 %s7479_s17, 4  ;;  %s5932_s18 = int_to_ptr.vmem [resolvable:$true] %s5931_s18 }
0x1fef   :  { %s1590_s29 = sadd.f32 %s7279_s3, %s7277_s28  ;;  %s7281_s30 = spop %7280 }
0x1ff0   :  { %s7283_s13 = spop %7282  ;;  %s7446_s19 = scalar_lea.vmem %s5932_s18, 16 }
0x1ff1   :  { %s2341_s12 = sadd.f32 %s7281_s30, %s1590_s29  ;;  %s7285_s5 = spop %7284 }
0x1ff2   :  { %s7287_s15 = spop %7286  ;;  %p7447_p2 = scmp.ne.s32.totalorder %s5932_s18, %s7446_s19 }
0x1ff3   :  { %s2910_s14 = sadd.f32 %s7283_s13, %s2341_s12  ;;  %s7289_s8 = spop %7288 }
0x1ff4   :  { %s7450_s20 = scalar_lea.vmem %s5932_s18, 32  ;;  %p7451_p3 = scmp.lt.s32.totalorder %s5932_s18, %s5932_s18 }
0x1ff5   :  { %s3824_s1 = sadd.f32 %s7285_s5, %s2910_s14  ;;  %p7452_p4 = scmp.lt.s32.totalorder %s7450_s20, %s7446_s19 }
0x1ff7   :  { %s4393_s16 = sadd.f32 %s7287_s15, %s3824_s1  ;;  %p7453_p5 = por %p7452_p4, %p7451_p3 }
0x1ff9   :  { %s5228_s4 = sadd.f32 %s7289_s8, %s4393_s16  ;;  %p7454_p6 = pnand %p7453_p5, %p7447_p2 }
0x2060   :  { %v5789_v49 = vpop.xlane.xlu1 %5788 }
0x2061   :  { %v5790_v6 = vrot.slane %v5789_v49, 4 }
0x2063   :  { %v5791_v2 = vadd.f32 %v5790_v6, %v5789_v49 }
0x2065   :  { %v5792_v4 = vrot.slane %v5791_v2, 2 }
0x2067   :  { %v5793_v59 = vadd.f32 %v5792_v4, %v5791_v2 }
0x2069   :  { %v5794_v35 = vrot.slane %v5793_v59, 1 }
0x206b   :  { %v5795_v36 = vadd.f32 %v5794_v35, %v5793_v59 }
0x206d   :  { %7290 = vpush %v5795_v36 }
0x209e   :  { %s7291_s6 = spop %7290 }
0x209f   :  { %s5797_s2 = sadd.f32 %s7291_s6, %s5228_s4 }
0x20a1   :  { %v5896_v24 = vstv %s5797_s2 }
0x20a2   :  { %5898 = vst.msk [vmem:[#allocation6] sm:$0x1] %vm5897_vm10, %v5896_v24 }
0x20a3   :  { %7457 = shalt.err (!%p7454_p6)
}
0x20a4   :  { %s7458_s23 = scalar_lea.hbm %s8530_s11, 16 }
0x20a5   :  { %p7459_p7 = scmp.ne.s32.totalorder %s8530_s11, %s7458_s23  ;;  %p7462_p8 = scmp.lt.u32.totalorder %s7458_s23, %s8530_s11 }
0x20a7   :  { %p7464_p9 = pnand %p7462_p8, %p7459_p7 }
0x20a9   :  { %7467 = shalt.err (!%p7464_p9)
}
0x20aa   :  { %5934 = dma.vmem_to_hbm [thread:$0]  %s5932_s18, 16, %s8530_s11, [#allocation5]  }
0x20ab   :  { %7468 = dma.done.wait [#allocation3], 256  }
0x20ac   :  { %7469 = vsyncadd [#allocation3], 4294967040 }
0x20ad   :  { %7470 = dma.done.wait [#allocation5], 1040  }
0x20ae   :  { %7471 = vsyncadd [#allocation5], 4294966256 }
0x20af   :  { %5946 = vsyncpa [#allocation3], 1 }
0x20b0   :  { %5947 = vsyncpa [#allocation5], 1 }

</bundles_post_ra>
